<compile_context>
chip_gen: v7x
topology: tpu7x:2x2x1
jax: 0.10.0
libtpu: 0.0.40
codegen_flags: <defaults>
</compile_context>

<pallas_src>
import functools

import jax
import jax.numpy as jnp
from jax import lax
from jax.experimental import pallas as pl
from jax.experimental.pallas import tpu as pltpu

LANE = 128


def _round_up(n, m):
    return ((n + m - 1) // m) * m


# ----------------------------- Pallas kernels ------------------------------

def _conv_pool_proj_kernel(p_ref, wc_ref, bc_ref, wih_ref, brnn_ref, o_ref, *, n_freq):
    # p_ref   : [tm, H, C*9]  bf16 im2col patches, rows ordered (time, batch)
    # wc_ref  : [C*9, Cout]   bf16 conv weight (PyTorch OIHW flattened, transposed)
    # bc_ref  : [1, Cout]     f32 conv bias
    # wih_ref : [Cout, Hp]    f32 RNN input projection (hidden padded to 128 lanes)
    # brnn_ref: [1, Hp]       f32 RNN bias (padded)
    # o_ref   : [tm, Hp]      f32 x_proj = mean_h relu(conv) @ W_ih + b   (lane-dense)
    tm = o_ref.shape[0]
    cout = wc_ref.shape[1]
    wc = wc_ref[...]
    bc = bc_ref[...]
    acc = jnp.zeros((tm, cout), jnp.float32)
    # Static loop over the frequency rows of each conv-output column: conv + ReLU + sum.
    for h in range(n_freq):
        y = jnp.dot(p_ref[:, h, :], wc, preferred_element_type=jnp.float32)
        acc = acc + jnp.maximum(y + bc, 0.0)
    pooled = acc * (1.0 / n_freq)                                    # mean over freq
    xp = jnp.dot(pooled, wih_ref[...], preferred_element_type=jnp.float32) + brnn_ref[...]
    o_ref[...] = xp.astype(o_ref.dtype)


def _rnn_predict_kernel(xp_ref, whh_ref, pw_ref, pb_ref, o_ref, *, seq_len):
    # xp_ref : [T, B, Hp] f32  precomputed x_t @ W_ih + b (time-major), whole sequence in VMEM
    # whh_ref: [Hp, Hp]   f32  recurrent weight (zero-padded beyond true hidden size)
    # pw_ref : [Hp, Np]   f32  predictor weight (zero-padded)
    # pb_ref : [1, Np]    f32  predictor bias   (zero-padded)
    # o_ref  : [B, Np]    f32  logits (padded lanes; sliced in the wrapper)
    B = xp_ref.shape[1]
    Hp = xp_ref.shape[2]
    whh = whh_ref[...]

    def step(t, h):
        x_t = xp_ref[t]                                              # [B, Hp]
        return jnp.tanh(x_t + jnp.dot(h, whh, preferred_element_type=jnp.float32))

    h_last = lax.fori_loop(0, seq_len, step,
                           jnp.zeros((B, Hp), jnp.float32), unroll=True)
    logits = jnp.dot(h_last, pw_ref[...], preferred_element_type=jnp.float32) + pb_ref[...]
    o_ref[...] = logits.astype(o_ref.dtype)


# ------------------------------ Wrappers ------------------------------------

def conv_pool_proj(patches, w_conv, b_conv, w_ih_p, b_rnn_p):
    """patches: [W*B, H, C*9] bf16 -> x_proj: [W*B, Hp] f32."""
    WB, H, K = patches.shape
    Cout = w_conv.shape[1]
    Hp = w_ih_p.shape[1]
    tm = WB if WB <= 512 else 512                        # rows are independent -> edge blocks safe
    grid = (pl.cdiv(WB, tm),)
    cost = pl.CostEstimate(
        flops=2 * WB * H * K * Cout + 2 * WB * Cout * Hp,
        transcendentals=0,
        bytes_accessed=WB * H * K * 2 + WB * Hp * 4 + K * Cout * 2 + Cout * Hp * 4,
    )
    return pl.pallas_call(
        functools.partial(_conv_pool_proj_kernel, n_freq=H),
        out_shape=jax.ShapeDtypeStruct((WB, Hp), jnp.float32),
        grid_spec=pltpu.PrefetchScalarGridSpec(
            num_scalar_prefetch=0,
            grid=grid,
            in_specs=[
                pl.BlockSpec((tm, H, K), lambda i: (i, 0, 0)),
                pl.BlockSpec((K, Cout), lambda i: (0, 0)),
                pl.BlockSpec((1, Cout), lambda i: (0, 0)),
                pl.BlockSpec((Cout, Hp), lambda i: (0, 0)),
                pl.BlockSpec((1, Hp), lambda i: (0, 0)),
            ],
            out_specs=pl.BlockSpec((tm, Hp), lambda i: (i, 0)),
        ),
        compiler_params=pltpu.CompilerParams(
            dimension_semantics=("parallel",),          # megacore splits the row axis (v7x)
            vmem_limit_bytes=32 * 1024 * 1024,
        ),
        cost_estimate=cost,
    )(patches, w_conv, b_conv, w_ih_p, b_rnn_p)


def rnn_predict(x_proj_tbh, w_hh_p, pred_w_p, pred_b_p):
    """x_proj_tbh: [T, B, Hp] -> logits (padded): [B, Np]. Single kernel invocation."""
    T, B, Hp = x_proj_tbh.shape
    Np = pred_w_p.shape[1]
    cost = pl.CostEstimate(
        flops=2 * T * B * Hp * Hp + 2 * B * Hp * Np,
        transcendentals=T * B * Hp,
        bytes_accessed=(T * B * Hp + Hp * Hp + Hp * Np + B * Np) * 4,
    )
    return pl.pallas_call(
        functools.partial(_rnn_predict_kernel, seq_len=T),
        out_shape=jax.ShapeDtypeStruct((B, Np), jnp.float32),
        cost_estimate=cost,
    )(x_proj_tbh, w_hh_p, pred_w_p, pred_b_p)


# ------------------------- StackedNNModel forward ---------------------------

@jax.jit
def stacked_nn_forward(x_nchw, params):
    B, C, H, W = x_nchw.shape
    conv_w = params["conv_w"]                       # [Cout, C, 3, 3]
    Cout = conv_w.shape[0]
    hidden = params["rnn_w_hh"].shape[0]
    n_classes = params["pred_w"].shape[1]
    Hp = _round_up(hidden, LANE)
    Np = _round_up(n_classes, LANE)

    # im2col glue: rows ordered (time w, batch b) so pooling + RNN need no extra transpose.
    # Patch channel order is (C-major, then kh*3+kw) to match PyTorch weight.reshape(Cout, C*9).
    xp = jnp.pad(x_nchw, ((0, 0), (0, 0), (1, 1), (1, 1)))
    patch_list = [xp[:, :, dh:dh + H, dw:dw + W] for dh in range(3) for dw in range(3)]
    patches = jnp.stack(patch_list, axis=2).reshape(B, C * 9, H, W)
    patches = jnp.transpose(patches, (3, 0, 2, 1)).reshape(W * B, H, C * 9)
    patches = patches.astype(jnp.bfloat16)                         # bf16 MXU operands (f32 accum)

    w_conv = conv_w.reshape(Cout, C * 9).T.astype(jnp.bfloat16)    # [C*9, Cout]
    b_conv = params["conv_b"].reshape(1, Cout).astype(jnp.float32)

    # Zero-pad hidden / class dims to 128 lanes; padded lanes stay exactly 0 through the RNN.
    w_ih_p = jnp.zeros((Cout, Hp), jnp.float32).at[:, :hidden].set(params["rnn_w_ih"])
    b_rnn_p = jnp.zeros((1, Hp), jnp.float32).at[:, :hidden].set(params["rnn_b"])
    w_hh_p = jnp.zeros((Hp, Hp), jnp.float32).at[:hidden, :hidden].set(params["rnn_w_hh"])
    pred_w_p = jnp.zeros((Hp, Np), jnp.float32).at[:hidden, :n_classes].set(params["pred_w"])
    pred_b_p = jnp.zeros((1, Np), jnp.float32).at[:, :n_classes].set(params["pred_b"])

    # Kernel 1: conv + ReLU + freq mean-pool + RNN input projection (hoisted out of the recurrence).
    x_proj = conv_pool_proj(patches, w_conv, b_conv, w_ih_p, b_rnn_p)   # [W*B, Hp]
    x_proj = x_proj.reshape(W, B, Hp)                                   # time-major view

    # Kernel 2: full serial recurrence + fused linear predictor, one invocation.
    logits_p = rnn_predict(x_proj, w_hh_p, pred_w_p, pred_b_p)          # [B, Np]
    return logits_p[:, :n_classes]
    # TODO(synk): AttentionClassifier / MultitaskPredictor / bidirectional branches of the
    # PyTorch module are config-dependent and not exercised here (attention=False, multitask=False).


# ------------------------------ Reference & init -----------------------------

def reference_forward(x, params):
    """Pure-JAX f32 reference of the same forward pass (for a loose sanity check)."""
    B, C, H, W = x.shape
    feat = lax.conv_general_dilated(x, params["conv_w"], (1, 1), "SAME",
                                    dimension_numbers=("NCHW", "OIHW", "NCHW"))
    feat = jax.nn.relu(feat + params["conv_b"][None, :, None, None])    # [B, Cout, H, W]
    seq = jnp.mean(feat, axis=2)                                        # [B, Cout, W]
    seq = jnp.transpose(seq, (2, 0, 1))                                 # [W, B, Cout]

    def step(h, x_t):
        h = jnp.tanh(x_t @ params["rnn_w_ih"] + h @ params["rnn_w_hh"] + params["rnn_b"])
        return h, None

    h0 = jnp.zeros((B, params["rnn_w_hh"].shape[0]), jnp.float32)
    h_last, _ = lax.scan(step, h0, seq)
    return h_last @ params["pred_w"] + params["pred_b"]


def init_params(key, c_in=4, c_out=8, hidden=32, n_classes=5):
    ks = jax.random.split(key, 7)
    s = 0.1
    return {
        "conv_w":   s * jax.random.normal(ks[0], (c_out, c_in, 3, 3), jnp.float32),
        "conv_b":   s * jax.random.normal(ks[1], (c_out,), jnp.float32),
        "rnn_w_ih": s * jax.random.normal(ks[2], (c_out, hidden), jnp.float32),
        "rnn_w_hh": s * jax.random.normal(ks[3], (hidden, hidden), jnp.float32),
        "rnn_b":    s * jax.random.normal(ks[4], (hidden,), jnp.float32),
        "pred_w":   s * jax.random.normal(ks[5], (hidden, n_classes), jnp.float32),
        "pred_b":   s * jax.random.normal(ks[6], (n_classes,), jnp.float32),
    }


if __name__ == "__main__":
    key = jax.random.PRNGKey(0)
    k_x, k_p = jax.random.split(key)

    B, C, H, W = 2, 4, 16, 16                       # NCHW, H=freq, W=time
    x = jax.random.normal(k_x, (B, C, H, W), jnp.float32)
    params = init_params(k_p, c_in=C, c_out=8, hidden=32, n_classes=5)

    logits = stacked_nn_forward(x, params)
    jax.block_until_ready(logits)
    assert logits.shape == (B, 5) and logits.dtype == jnp.float32
    assert bool(jnp.all(jnp.isfinite(logits)))

    ref = reference_forward(x, params)
    assert bool(jnp.allclose(logits, ref, atol=1e-2, rtol=1e-2)), "mismatch vs f32 reference"
    print("KERNEL_OK")
</pallas_src>

<mosaic_0001>
module attributes {stable_mosaic.version = 11 : i64} {
  func.func @_conv_pool_proj_kernel(%arg0: i32, %arg1: memref<32x16x36xbf16, #tpu.memory_space<vmem>>, %arg2: memref<36x8xbf16, #tpu.memory_space<vmem>>, %arg3: memref<1x8xf32, #tpu.memory_space<vmem>>, %arg4: memref<8x128xf32, #tpu.memory_space<vmem>>, %arg5: memref<1x128xf32, #tpu.memory_space<vmem>>, %arg6: memref<32x128xf32, #tpu.memory_space<vmem>>) attributes {dimension_semantics = [#tpu.dimension_semantics<parallel>], iteration_bounds = array<i64: 1>, scalar_prefetch = 0 : i64, scratch_operands = 0 : i64, tpu.core_type = #tpu.core_type<tc>, window_params = [{transform_indices = @transform_0, window_bounds = array<i64: 32, 16, 36>}, {pipeline_mode = #tpu.pipeline_mode<synchronous>, transform_indices = @transform_1, window_bounds = array<i64: 36, 8>}, {pipeline_mode = #tpu.pipeline_mode<synchronous>, transform_indices = @transform_2, window_bounds = array<i64: 1, 8>}, {pipeline_mode = #tpu.pipeline_mode<synchronous>, transform_indices = @transform_3, window_bounds = array<i64: 8, 128>}, {pipeline_mode = #tpu.pipeline_mode<synchronous>, transform_indices = @transform_4, window_bounds = array<i64: 1, 128>}, {transform_indices = @transform_5, window_bounds = array<i64: 32, 128>}]} {
    %c0 = arith.constant 0 : index
    %c0_0 = arith.constant 0 : index
    %0 = vector.load %arg2[%c0, %c0_0] : memref<36x8xbf16, #tpu.memory_space<vmem>>, vector<36x8xbf16>
    %c0_1 = arith.constant 0 : index
    %c0_2 = arith.constant 0 : index
    %1 = vector.load %arg3[%c0_1, %c0_2] : memref<1x8xf32, #tpu.memory_space<vmem>>, vector<1x8xf32>
    %cst = arith.constant 0.000000e+00 : f32
    %2 = vector.broadcast %cst : f32 to vector<32x8xf32>
    %c0_3 = arith.constant 0 : index
    %c0_4 = arith.constant 0 : index
    %c0_5 = arith.constant 0 : index
    %3 = vector.load %arg1[%c0_3, %c0_4, %c0_5] : memref<32x16x36xbf16, #tpu.memory_space<vmem>>, vector<32x1x36xbf16>
    %4 = vector.shape_cast %3 : vector<32x1x36xbf16> to vector<32x36xbf16>
    %cst_6 = arith.constant dense<0.000000e+00> : vector<32x8xf32>
    %5 = tpu.matmul %4, %0, %cst_6 {dimension_numbers = #tpu.dot_dimension_numbers<[1], [0], [0], [1], [0, 0, 1, 1], [], []>} : vector<32x36xbf16>, vector<36x8xbf16>, vector<32x8xf32> -> vector<32x8xf32>
    %6 = vector.broadcast %1 : vector<1x8xf32> to vector<32x8xf32>
    %7 = arith.addf %5, %6 : vector<32x8xf32>
    %cst_7 = arith.constant 0.000000e+00 : f32
    %8 = vector.broadcast %cst_7 : f32 to vector<32x8xf32>
    %9 = arith.maximumf %7, %8 : vector<32x8xf32>
    %10 = arith.addf %2, %9 : vector<32x8xf32>
    %c0_8 = arith.constant 0 : index
    %c1 = arith.constant 1 : index
    %c0_9 = arith.constant 0 : index
    %11 = vector.load %arg1[%c0_8, %c1, %c0_9] : memref<32x16x36xbf16, #tpu.memory_space<vmem>>, vector<32x1x36xbf16>
    %12 = vector.shape_cast %11 : vector<32x1x36xbf16> to vector<32x36xbf16>
    %cst_10 = arith.constant dense<0.000000e+00> : vector<32x8xf32>
    %13 = tpu.matmul %12, %0, %cst_10 {dimension_numbers = #tpu.dot_dimension_numbers<[1], [0], [0], [1], [0, 0, 1, 1], [], []>} : vector<32x36xbf16>, vector<36x8xbf16>, vector<32x8xf32> -> vector<32x8xf32>
    %14 = vector.broadcast %1 : vector<1x8xf32> to vector<32x8xf32>
    %15 = arith.addf %13, %14 : vector<32x8xf32>
    %cst_11 = arith.constant 0.000000e+00 : f32
    %16 = vector.broadcast %cst_11 : f32 to vector<32x8xf32>
    %17 = arith.maximumf %15, %16 : vector<32x8xf32>
    %18 = arith.addf %10, %17 : vector<32x8xf32>
    %c0_12 = arith.constant 0 : index
    %c2 = arith.constant 2 : index
    %c0_13 = arith.constant 0 : index
    %19 = vector.load %arg1[%c0_12, %c2, %c0_13] : memref<32x16x36xbf16, #tpu.memory_space<vmem>>, vector<32x1x36xbf16>
    %20 = vector.shape_cast %19 : vector<32x1x36xbf16> to vector<32x36xbf16>
    %cst_14 = arith.constant dense<0.000000e+00> : vector<32x8xf32>
    %21 = tpu.matmul %20, %0, %cst_14 {dimension_numbers = #tpu.dot_dimension_numbers<[1], [0], [0], [1], [0, 0, 1, 1], [], []>} : vector<32x36xbf16>, vector<36x8xbf16>, vector<32x8xf32> -> vector<32x8xf32>
    %22 = vector.broadcast %1 : vector<1x8xf32> to vector<32x8xf32>
    %23 = arith.addf %21, %22 : vector<32x8xf32>
    %cst_15 = arith.constant 0.000000e+00 : f32
    %24 = vector.broadcast %cst_15 : f32 to vector<32x8xf32>
    %25 = arith.maximumf %23, %24 : vector<32x8xf32>
    %26 = arith.addf %18, %25 : vector<32x8xf32>
    %c0_16 = arith.constant 0 : index
    %c3 = arith.constant 3 : index
    %c0_17 = arith.constant 0 : index
    %27 = vector.load %arg1[%c0_16, %c3, %c0_17] : memref<32x16x36xbf16, #tpu.memory_space<vmem>>, vector<32x1x36xbf16>
    %28 = vector.shape_cast %27 : vector<32x1x36xbf16> to vector<32x36xbf16>
    %cst_18 = arith.constant dense<0.000000e+00> : vector<32x8xf32>
    %29 = tpu.matmul %28, %0, %cst_18 {dimension_numbers = #tpu.dot_dimension_numbers<[1], [0], [0], [1], [0, 0, 1, 1], [], []>} : vector<32x36xbf16>, vector<36x8xbf16>, vector<32x8xf32> -> vector<32x8xf32>
    %30 = vector.broadcast %1 : vector<1x8xf32> to vector<32x8xf32>
    %31 = arith.addf %29, %30 : vector<32x8xf32>
    %cst_19 = arith.constant 0.000000e+00 : f32
    %32 = vector.broadcast %cst_19 : f32 to vector<32x8xf32>
    %33 = arith.maximumf %31, %32 : vector<32x8xf32>
    %34 = arith.addf %26, %33 : vector<32x8xf32>
    %c0_20 = arith.constant 0 : index
    %c4 = arith.constant 4 : index
    %c0_21 = arith.constant 0 : index
    %35 = vector.load %arg1[%c0_20, %c4, %c0_21] : memref<32x16x36xbf16, #tpu.memory_space<vmem>>, vector<32x1x36xbf16>
    %36 = vector.shape_cast %35 : vector<32x1x36xbf16> to vector<32x36xbf16>
    %cst_22 = arith.constant dense<0.000000e+00> : vector<32x8xf32>
    %37 = tpu.matmul %36, %0, %cst_22 {dimension_numbers = #tpu.dot_dimension_numbers<[1], [0], [0], [1], [0, 0, 1, 1], [], []>} : vector<32x36xbf16>, vector<36x8xbf16>, vector<32x8xf32> -> vector<32x8xf32>
    %38 = vector.broadcast %1 : vector<1x8xf32> to vector<32x8xf32>
    %39 = arith.addf %37, %38 : vector<32x8xf32>
    %cst_23 = arith.constant 0.000000e+00 : f32
    %40 = vector.broadcast %cst_23 : f32 to vector<32x8xf32>
    %41 = arith.maximumf %39, %40 : vector<32x8xf32>
    %42 = arith.addf %34, %41 : vector<32x8xf32>
    %c0_24 = arith.constant 0 : index
    %c5 = arith.constant 5 : index
    %c0_25 = arith.constant 0 : index
    %43 = vector.load %arg1[%c0_24, %c5, %c0_25] : memref<32x16x36xbf16, #tpu.memory_space<vmem>>, vector<32x1x36xbf16>
    %44 = vector.shape_cast %43 : vector<32x1x36xbf16> to vector<32x36xbf16>
    %cst_26 = arith.constant dense<0.000000e+00> : vector<32x8xf32>
    %45 = tpu.matmul %44, %0, %cst_26 {dimension_numbers = #tpu.dot_dimension_numbers<[1], [0], [0], [1], [0, 0, 1, 1], [], []>} : vector<32x36xbf16>, vector<36x8xbf16>, vector<32x8xf32> -> vector<32x8xf32>
    %46 = vector.broadcast %1 : vector<1x8xf32> to vector<32x8xf32>
    %47 = arith.addf %45, %46 : vector<32x8xf32>
    %cst_27 = arith.constant 0.000000e+00 : f32
    %48 = vector.broadcast %cst_27 : f32 to vector<32x8xf32>
    %49 = arith.maximumf %47, %48 : vector<32x8xf32>
    %50 = arith.addf %42, %49 : vector<32x8xf32>
    %c0_28 = arith.constant 0 : index
    %c6 = arith.constant 6 : index
    %c0_29 = arith.constant 0 : index
    %51 = vector.load %arg1[%c0_28, %c6, %c0_29] : memref<32x16x36xbf16, #tpu.memory_space<vmem>>, vector<32x1x36xbf16>
    %52 = vector.shape_cast %51 : vector<32x1x36xbf16> to vector<32x36xbf16>
    %cst_30 = arith.constant dense<0.000000e+00> : vector<32x8xf32>
    %53 = tpu.matmul %52, %0, %cst_30 {dimension_numbers = #tpu.dot_dimension_numbers<[1], [0], [0], [1], [0, 0, 1, 1], [], []>} : vector<32x36xbf16>, vector<36x8xbf16>, vector<32x8xf32> -> vector<32x8xf32>
    %54 = vector.broadcast %1 : vector<1x8xf32> to vector<32x8xf32>
    %55 = arith.addf %53, %54 : vector<32x8xf32>
    %cst_31 = arith.constant 0.000000e+00 : f32
    %56 = vector.broadcast %cst_31 : f32 to vector<32x8xf32>
    %57 = arith.maximumf %55, %56 : vector<32x8xf32>
    %58 = arith.addf %50, %57 : vector<32x8xf32>
    %c0_32 = arith.constant 0 : index
    %c7 = arith.constant 7 : index
    %c0_33 = arith.constant 0 : index
    %59 = vector.load %arg1[%c0_32, %c7, %c0_33] : memref<32x16x36xbf16, #tpu.memory_space<vmem>>, vector<32x1x36xbf16>
    %60 = vector.shape_cast %59 : vector<32x1x36xbf16> to vector<32x36xbf16>
    %cst_34 = arith.constant dense<0.000000e+00> : vector<32x8xf32>
    %61 = tpu.matmul %60, %0, %cst_34 {dimension_numbers = #tpu.dot_dimension_numbers<[1], [0], [0], [1], [0, 0, 1, 1], [], []>} : vector<32x36xbf16>, vector<36x8xbf16>, vector<32x8xf32> -> vector<32x8xf32>
    %62 = vector.broadcast %1 : vector<1x8xf32> to vector<32x8xf32>
    %63 = arith.addf %61, %62 : vector<32x8xf32>
    %cst_35 = arith.constant 0.000000e+00 : f32
    %64 = vector.broadcast %cst_35 : f32 to vector<32x8xf32>
    %65 = arith.maximumf %63, %64 : vector<32x8xf32>
    %66 = arith.addf %58, %65 : vector<32x8xf32>
    %c0_36 = arith.constant 0 : index
    %c8 = arith.constant 8 : index
    %c0_37 = arith.constant 0 : index
    %67 = vector.load %arg1[%c0_36, %c8, %c0_37] : memref<32x16x36xbf16, #tpu.memory_space<vmem>>, vector<32x1x36xbf16>
    %68 = vector.shape_cast %67 : vector<32x1x36xbf16> to vector<32x36xbf16>
    %cst_38 = arith.constant dense<0.000000e+00> : vector<32x8xf32>
    %69 = tpu.matmul %68, %0, %cst_38 {dimension_numbers = #tpu.dot_dimension_numbers<[1], [0], [0], [1], [0, 0, 1, 1], [], []>} : vector<32x36xbf16>, vector<36x8xbf16>, vector<32x8xf32> -> vector<32x8xf32>
    %70 = vector.broadcast %1 : vector<1x8xf32> to vector<32x8xf32>
    %71 = arith.addf %69, %70 : vector<32x8xf32>
    %cst_39 = arith.constant 0.000000e+00 : f32
    %72 = vector.broadcast %cst_39 : f32 to vector<32x8xf32>
    %73 = arith.maximumf %71, %72 : vector<32x8xf32>
    %74 = arith.addf %66, %73 : vector<32x8xf32>
    %c0_40 = arith.constant 0 : index
    %c9 = arith.constant 9 : index
    %c0_41 = arith.constant 0 : index
    %75 = vector.load %arg1[%c0_40, %c9, %c0_41] : memref<32x16x36xbf16, #tpu.memory_space<vmem>>, vector<32x1x36xbf16>
    %76 = vector.shape_cast %75 : vector<32x1x36xbf16> to vector<32x36xbf16>
    %cst_42 = arith.constant dense<0.000000e+00> : vector<32x8xf32>
    %77 = tpu.matmul %76, %0, %cst_42 {dimension_numbers = #tpu.dot_dimension_numbers<[1], [0], [0], [1], [0, 0, 1, 1], [], []>} : vector<32x36xbf16>, vector<36x8xbf16>, vector<32x8xf32> -> vector<32x8xf32>
    %78 = vector.broadcast %1 : vector<1x8xf32> to vector<32x8xf32>
    %79 = arith.addf %77, %78 : vector<32x8xf32>
    %cst_43 = arith.constant 0.000000e+00 : f32
    %80 = vector.broadcast %cst_43 : f32 to vector<32x8xf32>
    %81 = arith.maximumf %79, %80 : vector<32x8xf32>
    %82 = arith.addf %74, %81 : vector<32x8xf32>
    %c0_44 = arith.constant 0 : index
    %c10 = arith.constant 10 : index
    %c0_45 = arith.constant 0 : index
    %83 = vector.load %arg1[%c0_44, %c10, %c0_45] : memref<32x16x36xbf16, #tpu.memory_space<vmem>>, vector<32x1x36xbf16>
    %84 = vector.shape_cast %83 : vector<32x1x36xbf16> to vector<32x36xbf16>
    %cst_46 = arith.constant dense<0.000000e+00> : vector<32x8xf32>
    %85 = tpu.matmul %84, %0, %cst_46 {dimension_numbers = #tpu.dot_dimension_numbers<[1], [0], [0], [1], [0, 0, 1, 1], [], []>} : vector<32x36xbf16>, vector<36x8xbf16>, vector<32x8xf32> -> vector<32x8xf32>
    %86 = vector.broadcast %1 : vector<1x8xf32> to vector<32x8xf32>
    %87 = arith.addf %85, %86 : vector<32x8xf32>
    %cst_47 = arith.constant 0.000000e+00 : f32
    %88 = vector.broadcast %cst_47 : f32 to vector<32x8xf32>
    %89 = arith.maximumf %87, %88 : vector<32x8xf32>
    %90 = arith.addf %82, %89 : vector<32x8xf32>
    %c0_48 = arith.constant 0 : index
    %c11 = arith.constant 11 : index
    %c0_49 = arith.constant 0 : index
    %91 = vector.load %arg1[%c0_48, %c11, %c0_49] : memref<32x16x36xbf16, #tpu.memory_space<vmem>>, vector<32x1x36xbf16>
    %92 = vector.shape_cast %91 : vector<32x1x36xbf16> to vector<32x36xbf16>
    %cst_50 = arith.constant dense<0.000000e+00> : vector<32x8xf32>
    %93 = tpu.matmul %92, %0, %cst_50 {dimension_numbers = #tpu.dot_dimension_numbers<[1], [0], [0], [1], [0, 0, 1, 1], [], []>} : vector<32x36xbf16>, vector<36x8xbf16>, vector<32x8xf32> -> vector<32x8xf32>
    %94 = vector.broadcast %1 : vector<1x8xf32> to vector<32x8xf32>
    %95 = arith.addf %93, %94 : vector<32x8xf32>
    %cst_51 = arith.constant 0.000000e+00 : f32
    %96 = vector.broadcast %cst_51 : f32 to vector<32x8xf32>
    %97 = arith.maximumf %95, %96 : vector<32x8xf32>
    %98 = arith.addf %90, %97 : vector<32x8xf32>
    %c0_52 = arith.constant 0 : index
    %c12 = arith.constant 12 : index
    %c0_53 = arith.constant 0 : index
    %99 = vector.load %arg1[%c0_52, %c12, %c0_53] : memref<32x16x36xbf16, #tpu.memory_space<vmem>>, vector<32x1x36xbf16>
    %100 = vector.shape_cast %99 : vector<32x1x36xbf16> to vector<32x36xbf16>
    %cst_54 = arith.constant dense<0.000000e+00> : vector<32x8xf32>
    %101 = tpu.matmul %100, %0, %cst_54 {dimension_numbers = #tpu.dot_dimension_numbers<[1], [0], [0], [1], [0, 0, 1, 1], [], []>} : vector<32x36xbf16>, vector<36x8xbf16>, vector<32x8xf32> -> vector<32x8xf32>
    %102 = vector.broadcast %1 : vector<1x8xf32> to vector<32x8xf32>
    %103 = arith.addf %101, %102 : vector<32x8xf32>
    %cst_55 = arith.constant 0.000000e+00 : f32
    %104 = vector.broadcast %cst_55 : f32 to vector<32x8xf32>
    %105 = arith.maximumf %103, %104 : vector<32x8xf32>
    %106 = arith.addf %98, %105 : vector<32x8xf32>
    %c0_56 = arith.constant 0 : index
    %c13 = arith.constant 13 : index
    %c0_57 = arith.constant 0 : index
    %107 = vector.load %arg1[%c0_56, %c13, %c0_57] : memref<32x16x36xbf16, #tpu.memory_space<vmem>>, vector<32x1x36xbf16>
    %108 = vector.shape_cast %107 : vector<32x1x36xbf16> to vector<32x36xbf16>
    %cst_58 = arith.constant dense<0.000000e+00> : vector<32x8xf32>
    %109 = tpu.matmul %108, %0, %cst_58 {dimension_numbers = #tpu.dot_dimension_numbers<[1], [0], [0], [1], [0, 0, 1, 1], [], []>} : vector<32x36xbf16>, vector<36x8xbf16>, vector<32x8xf32> -> vector<32x8xf32>
    %110 = vector.broadcast %1 : vector<1x8xf32> to vector<32x8xf32>
    %111 = arith.addf %109, %110 : vector<32x8xf32>
    %cst_59 = arith.constant 0.000000e+00 : f32
    %112 = vector.broadcast %cst_59 : f32 to vector<32x8xf32>
    %113 = arith.maximumf %111, %112 : vector<32x8xf32>
    %114 = arith.addf %106, %113 : vector<32x8xf32>
    %c0_60 = arith.constant 0 : index
    %c14 = arith.constant 14 : index
    %c0_61 = arith.constant 0 : index
    %115 = vector.load %arg1[%c0_60, %c14, %c0_61] : memref<32x16x36xbf16, #tpu.memory_space<vmem>>, vector<32x1x36xbf16>
    %116 = vector.shape_cast %115 : vector<32x1x36xbf16> to vector<32x36xbf16>
    %cst_62 = arith.constant dense<0.000000e+00> : vector<32x8xf32>
    %117 = tpu.matmul %116, %0, %cst_62 {dimension_numbers = #tpu.dot_dimension_numbers<[1], [0], [0], [1], [0, 0, 1, 1], [], []>} : vector<32x36xbf16>, vector<36x8xbf16>, vector<32x8xf32> -> vector<32x8xf32>
    %118 = vector.broadcast %1 : vector<1x8xf32> to vector<32x8xf32>
    %119 = arith.addf %117, %118 : vector<32x8xf32>
    %cst_63 = arith.constant 0.000000e+00 : f32
    %120 = vector.broadcast %cst_63 : f32 to vector<32x8xf32>
    %121 = arith.maximumf %119, %120 : vector<32x8xf32>
    %122 = arith.addf %114, %121 : vector<32x8xf32>
    %c0_64 = arith.constant 0 : index
    %c15 = arith.constant 15 : index
    %c0_65 = arith.constant 0 : index
    %123 = vector.load %arg1[%c0_64, %c15, %c0_65] : memref<32x16x36xbf16, #tpu.memory_space<vmem>>, vector<32x1x36xbf16>
    %124 = vector.shape_cast %123 : vector<32x1x36xbf16> to vector<32x36xbf16>
    %cst_66 = arith.constant dense<0.000000e+00> : vector<32x8xf32>
    %125 = tpu.matmul %124, %0, %cst_66 {dimension_numbers = #tpu.dot_dimension_numbers<[1], [0], [0], [1], [0, 0, 1, 1], [], []>} : vector<32x36xbf16>, vector<36x8xbf16>, vector<32x8xf32> -> vector<32x8xf32>
    %126 = vector.broadcast %1 : vector<1x8xf32> to vector<32x8xf32>
    %127 = arith.addf %125, %126 : vector<32x8xf32>
    %cst_67 = arith.constant 0.000000e+00 : f32
    %128 = vector.broadcast %cst_67 : f32 to vector<32x8xf32>
    %129 = arith.maximumf %127, %128 : vector<32x8xf32>
    %130 = arith.addf %122, %129 : vector<32x8xf32>
    %cst_68 = arith.constant 6.250000e-02 : f32
    %131 = vector.broadcast %cst_68 : f32 to vector<32x8xf32>
    %132 = arith.mulf %130, %131 : vector<32x8xf32>
    %c0_69 = arith.constant 0 : index
    %c0_70 = arith.constant 0 : index
    %133 = vector.load %arg4[%c0_69, %c0_70] : memref<8x128xf32, #tpu.memory_space<vmem>>, vector<8x128xf32>
    %cst_71 = arith.constant dense<0.000000e+00> : vector<32x128xf32>
    %134 = tpu.matmul %132, %133, %cst_71 {dimension_numbers = #tpu.dot_dimension_numbers<[1], [0], [0], [1], [0, 0, 1, 1], [], []>} : vector<32x8xf32>, vector<8x128xf32>, vector<32x128xf32> -> vector<32x128xf32>
    %c0_72 = arith.constant 0 : index
    %c0_73 = arith.constant 0 : index
    %135 = vector.load %arg5[%c0_72, %c0_73] : memref<1x128xf32, #tpu.memory_space<vmem>>, vector<1x128xf32>
    %136 = vector.broadcast %135 : vector<1x128xf32> to vector<32x128xf32>
    %137 = arith.addf %134, %136 : vector<32x128xf32>
    %c0_74 = arith.constant 0 : index
    %c0_75 = arith.constant 0 : index
    %138 = vector.load %arg6[%c0_74, %c0_75] : memref<32x128xf32, #tpu.memory_space<vmem>>, vector<32x128xf32>
    tpu.vector_store %arg6[%c0_74, %c0_75], %137 {strides = array<i32>} : memref<32x128xf32, #tpu.memory_space<vmem>>, vector<32x128xf32>,
    return
  }
  func.func @transform_0(%arg0: i32) -> (i32, i32, i32) {
    %c0_i32 = arith.constant 0 : i32
    %c0_i32_0 = arith.constant 0 : i32
    %c0_i32_1 = arith.constant 0 : i32
    return %arg0, %c0_i32, %c0_i32_0 : i32, i32, i32
  }
  func.func @transform_1(%arg0: i32) -> (i32, i32) {
    %c0_i32 = arith.constant 0 : i32
    %c0_i32_0 = arith.constant 0 : i32
    %c0_i32_1 = arith.constant 0 : i32
    return %c0_i32, %c0_i32_0 : i32, i32
  }
  func.func @transform_2(%arg0: i32) -> (i32, i32) {
    %c0_i32 = arith.constant 0 : i32
    %c0_i32_0 = arith.constant 0 : i32
    %c0_i32_1 = arith.constant 0 : i32
    return %c0_i32, %c0_i32_0 : i32, i32
  }
  func.func @transform_3(%arg0: i32) -> (i32, i32) {
    %c0_i32 = arith.constant 0 : i32
    %c0_i32_0 = arith.constant 0 : i32
    %c0_i32_1 = arith.constant 0 : i32
    return %c0_i32, %c0_i32_0 : i32, i32
  }
  func.func @transform_4(%arg0: i32) -> (i32, i32) {
    %c0_i32 = arith.constant 0 : i32
    %c0_i32_0 = arith.constant 0 : i32
    %c0_i32_1 = arith.constant 0 : i32
    return %c0_i32, %c0_i32_0 : i32, i32
  }
  func.func @transform_5(%arg0: i32) -> (i32, i32) {
    %c0_i32 = arith.constant 0 : i32
    %c0_i32_0 = arith.constant 0 : i32
    return %arg0, %c0_i32 : i32, i32
  }
}

module attributes {stable_mosaic.version = 11 : i64} {
  func.func @_rnn_predict_kernel(%arg0: memref<16x2x128xf32, #tpu.memory_space<vmem>>, %arg1: memref<128x128xf32, #tpu.memory_space<vmem>>, %arg2: memref<128x128xf32, #tpu.memory_space<vmem>>, %arg3: memref<1x128xf32, #tpu.memory_space<vmem>>, %arg4: memref<2x128xf32, #tpu.memory_space<vmem>>) attributes {dimension_semantics = [], scalar_prefetch = 0 : i64, scratch_operands = 0 : i64, tpu.core_type = #tpu.core_type<tc>} {
    %c0 = arith.constant 0 : index
    %c0_0 = arith.constant 0 : index
    %0 = vector.load %arg1[%c0, %c0_0] : memref<128x128xf32, #tpu.memory_space<vmem>>, vector<128x128xf32>
    %cst = arith.constant 0.000000e+00 : f32
    %1 = vector.broadcast %cst : f32 to vector<2x128xf32>
    %c0_i32 = arith.constant 0 : i32
    %2 = arith.index_cast %c0_i32 : i32 to index
    %c0_1 = arith.constant 0 : index
    %c0_2 = arith.constant 0 : index
    %3 = vector.load %arg0[%2, %c0_1, %c0_2] : memref<16x2x128xf32, #tpu.memory_space<vmem>>, vector<1x2x128xf32>
    %4 = vector.shape_cast %3 : vector<1x2x128xf32> to vector<2x128xf32>
    %cst_3 = arith.constant dense<0.000000e+00> : vector<2x128xf32>
    %5 = tpu.matmul %1, %0, %cst_3 {dimension_numbers = #tpu.dot_dimension_numbers<[1], [0], [0], [1], [0, 0, 1, 1], [], []>} : vector<2x128xf32>, vector<128x128xf32>, vector<2x128xf32> -> vector<2x128xf32>
    %6 = arith.addf %4, %5 : vector<2x128xf32>
    %7 = math.tanh %6 : vector<2x128xf32>
    %c1_i32 = arith.constant 1 : i32
    %8 = arith.index_cast %c1_i32 : i32 to index
    %c0_4 = arith.constant 0 : index
    %c0_5 = arith.constant 0 : index
    %9 = vector.load %arg0[%8, %c0_4, %c0_5] : memref<16x2x128xf32, #tpu.memory_space<vmem>>, vector<1x2x128xf32>
    %10 = vector.shape_cast %9 : vector<1x2x128xf32> to vector<2x128xf32>
    %cst_6 = arith.constant dense<0.000000e+00> : vector<2x128xf32>
    %11 = tpu.matmul %7, %0, %cst_6 {dimension_numbers = #tpu.dot_dimension_numbers<[1], [0], [0], [1], [0, 0, 1, 1], [], []>} : vector<2x128xf32>, vector<128x128xf32>, vector<2x128xf32> -> vector<2x128xf32>
    %12 = arith.addf %10, %11 : vector<2x128xf32>
    %13 = math.tanh %12 : vector<2x128xf32>
    %c2_i32 = arith.constant 2 : i32
    %14 = arith.index_cast %c2_i32 : i32 to index
    %c0_7 = arith.constant 0 : index
    %c0_8 = arith.constant 0 : index
    %15 = vector.load %arg0[%14, %c0_7, %c0_8] : memref<16x2x128xf32, #tpu.memory_space<vmem>>, vector<1x2x128xf32>
    %16 = vector.shape_cast %15 : vector<1x2x128xf32> to vector<2x128xf32>
    %cst_9 = arith.constant dense<0.000000e+00> : vector<2x128xf32>
    %17 = tpu.matmul %13, %0, %cst_9 {dimension_numbers = #tpu.dot_dimension_numbers<[1], [0], [0], [1], [0, 0, 1, 1], [], []>} : vector<2x128xf32>, vector<128x128xf32>, vector<2x128xf32> -> vector<2x128xf32>
    %18 = arith.addf %16, %17 : vector<2x128xf32>
    %19 = math.tanh %18 : vector<2x128xf32>
    %c3_i32 = arith.constant 3 : i32
    %20 = arith.index_cast %c3_i32 : i32 to index
    %c0_10 = arith.constant 0 : index
    %c0_11 = arith.constant 0 : index
    %21 = vector.load %arg0[%20, %c0_10, %c0_11] : memref<16x2x128xf32, #tpu.memory_space<vmem>>, vector<1x2x128xf32>
    %22 = vector.shape_cast %21 : vector<1x2x128xf32> to vector<2x128xf32>
    %cst_12 = arith.constant dense<0.000000e+00> : vector<2x128xf32>
    %23 = tpu.matmul %19, %0, %cst_12 {dimension_numbers = #tpu.dot_dimension_numbers<[1], [0], [0], [1], [0, 0, 1, 1], [], []>} : vector<2x128xf32>, vector<128x128xf32>, vector<2x128xf32> -> vector<2x128xf32>
    %24 = arith.addf %22, %23 : vector<2x128xf32>
    %25 = math.tanh %24 : vector<2x128xf32>
    %c4_i32 = arith.constant 4 : i32
    %26 = arith.index_cast %c4_i32 : i32 to index
    %c0_13 = arith.constant 0 : index
    %c0_14 = arith.constant 0 : index
    %27 = vector.load %arg0[%26, %c0_13, %c0_14] : memref<16x2x128xf32, #tpu.memory_space<vmem>>, vector<1x2x128xf32>
    %28 = vector.shape_cast %27 : vector<1x2x128xf32> to vector<2x128xf32>
    %cst_15 = arith.constant dense<0.000000e+00> : vector<2x128xf32>
    %29 = tpu.matmul %25, %0, %cst_15 {dimension_numbers = #tpu.dot_dimension_numbers<[1], [0], [0], [1], [0, 0, 1, 1], [], []>} : vector<2x128xf32>, vector<128x128xf32>, vector<2x128xf32> -> vector<2x128xf32>
    %30 = arith.addf %28, %29 : vector<2x128xf32>
    %31 = math.tanh %30 : vector<2x128xf32>
    %c5_i32 = arith.constant 5 : i32
    %32 = arith.index_cast %c5_i32 : i32 to index
    %c0_16 = arith.constant 0 : index
    %c0_17 = arith.constant 0 : index
    %33 = vector.load %arg0[%32, %c0_16, %c0_17] : memref<16x2x128xf32, #tpu.memory_space<vmem>>, vector<1x2x128xf32>
    %34 = vector.shape_cast %33 : vector<1x2x128xf32> to vector<2x128xf32>
    %cst_18 = arith.constant dense<0.000000e+00> : vector<2x128xf32>
    %35 = tpu.matmul %31, %0, %cst_18 {dimension_numbers = #tpu.dot_dimension_numbers<[1], [0], [0], [1], [0, 0, 1, 1], [], []>} : vector<2x128xf32>, vector<128x128xf32>, vector<2x128xf32> -> vector<2x128xf32>
    %36 = arith.addf %34, %35 : vector<2x128xf32>
    %37 = math.tanh %36 : vector<2x128xf32>
    %c6_i32 = arith.constant 6 : i32
    %38 = arith.index_cast %c6_i32 : i32 to index
    %c0_19 = arith.constant 0 : index
    %c0_20 = arith.constant 0 : index
    %39 = vector.load %arg0[%38, %c0_19, %c0_20] : memref<16x2x128xf32, #tpu.memory_space<vmem>>, vector<1x2x128xf32>
    %40 = vector.shape_cast %39 : vector<1x2x128xf32> to vector<2x128xf32>
    %cst_21 = arith.constant dense<0.000000e+00> : vector<2x128xf32>
    %41 = tpu.matmul %37, %0, %cst_21 {dimension_numbers = #tpu.dot_dimension_numbers<[1], [0], [0], [1], [0, 0, 1, 1], [], []>} : vector<2x128xf32>, vector<128x128xf32>, vector<2x128xf32> -> vector<2x128xf32>
    %42 = arith.addf %40, %41 : vector<2x128xf32>
    %43 = math.tanh %42 : vector<2x128xf32>
    %c7_i32 = arith.constant 7 : i32
    %44 = arith.index_cast %c7_i32 : i32 to index
    %c0_22 = arith.constant 0 : index
    %c0_23 = arith.constant 0 : index
    %45 = vector.load %arg0[%44, %c0_22, %c0_23] : memref<16x2x128xf32, #tpu.memory_space<vmem>>, vector<1x2x128xf32>
    %46 = vector.shape_cast %45 : vector<1x2x128xf32> to vector<2x128xf32>
    %cst_24 = arith.constant dense<0.000000e+00> : vector<2x128xf32>
    %47 = tpu.matmul %43, %0, %cst_24 {dimension_numbers = #tpu.dot_dimension_numbers<[1], [0], [0], [1], [0, 0, 1, 1], [], []>} : vector<2x128xf32>, vector<128x128xf32>, vector<2x128xf32> -> vector<2x128xf32>
    %48 = arith.addf %46, %47 : vector<2x128xf32>
    %49 = math.tanh %48 : vector<2x128xf32>
    %c8_i32 = arith.constant 8 : i32
    %50 = arith.index_cast %c8_i32 : i32 to index
    %c0_25 = arith.constant 0 : index
    %c0_26 = arith.constant 0 : index
    %51 = vector.load %arg0[%50, %c0_25, %c0_26] : memref<16x2x128xf32, #tpu.memory_space<vmem>>, vector<1x2x128xf32>
    %52 = vector.shape_cast %51 : vector<1x2x128xf32> to vector<2x128xf32>
    %cst_27 = arith.constant dense<0.000000e+00> : vector<2x128xf32>
    %53 = tpu.matmul %49, %0, %cst_27 {dimension_numbers = #tpu.dot_dimension_numbers<[1], [0], [0], [1], [0, 0, 1, 1], [], []>} : vector<2x128xf32>, vector<128x128xf32>, vector<2x128xf32> -> vector<2x128xf32>
    %54 = arith.addf %52, %53 : vector<2x128xf32>
    %55 = math.tanh %54 : vector<2x128xf32>
    %c9_i32 = arith.constant 9 : i32
    %56 = arith.index_cast %c9_i32 : i32 to index
    %c0_28 = arith.constant 0 : index
    %c0_29 = arith.constant 0 : index
    %57 = vector.load %arg0[%56, %c0_28, %c0_29] : memref<16x2x128xf32, #tpu.memory_space<vmem>>, vector<1x2x128xf32>
    %58 = vector.shape_cast %57 : vector<1x2x128xf32> to vector<2x128xf32>
    %cst_30 = arith.constant dense<0.000000e+00> : vector<2x128xf32>
    %59 = tpu.matmul %55, %0, %cst_30 {dimension_numbers = #tpu.dot_dimension_numbers<[1], [0], [0], [1], [0, 0, 1, 1], [], []>} : vector<2x128xf32>, vector<128x128xf32>, vector<2x128xf32> -> vector<2x128xf32>
    %60 = arith.addf %58, %59 : vector<2x128xf32>
    %61 = math.tanh %60 : vector<2x128xf32>
    %c10_i32 = arith.constant 10 : i32
    %62 = arith.index_cast %c10_i32 : i32 to index
    %c0_31 = arith.constant 0 : index
    %c0_32 = arith.constant 0 : index
    %63 = vector.load %arg0[%62, %c0_31, %c0_32] : memref<16x2x128xf32, #tpu.memory_space<vmem>>, vector<1x2x128xf32>
    %64 = vector.shape_cast %63 : vector<1x2x128xf32> to vector<2x128xf32>
    %cst_33 = arith.constant dense<0.000000e+00> : vector<2x128xf32>
    %65 = tpu.matmul %61, %0, %cst_33 {dimension_numbers = #tpu.dot_dimension_numbers<[1], [0], [0], [1], [0, 0, 1, 1], [], []>} : vector<2x128xf32>, vector<128x128xf32>, vector<2x128xf32> -> vector<2x128xf32>
    %66 = arith.addf %64, %65 : vector<2x128xf32>
    %67 = math.tanh %66 : vector<2x128xf32>
    %c11_i32 = arith.constant 11 : i32
    %68 = arith.index_cast %c11_i32 : i32 to index
    %c0_34 = arith.constant 0 : index
    %c0_35 = arith.constant 0 : index
    %69 = vector.load %arg0[%68, %c0_34, %c0_35] : memref<16x2x128xf32, #tpu.memory_space<vmem>>, vector<1x2x128xf32>
    %70 = vector.shape_cast %69 : vector<1x2x128xf32> to vector<2x128xf32>
    %cst_36 = arith.constant dense<0.000000e+00> : vector<2x128xf32>
    %71 = tpu.matmul %67, %0, %cst_36 {dimension_numbers = #tpu.dot_dimension_numbers<[1], [0], [0], [1], [0, 0, 1, 1], [], []>} : vector<2x128xf32>, vector<128x128xf32>, vector<2x128xf32> -> vector<2x128xf32>
    %72 = arith.addf %70, %71 : vector<2x128xf32>
    %73 = math.tanh %72 : vector<2x128xf32>
    %c12_i32 = arith.constant 12 : i32
    %74 = arith.index_cast %c12_i32 : i32 to index
    %c0_37 = arith.constant 0 : index
    %c0_38 = arith.constant 0 : index
    %75 = vector.load %arg0[%74, %c0_37, %c0_38] : memref<16x2x128xf32, #tpu.memory_space<vmem>>, vector<1x2x128xf32>
    %76 = vector.shape_cast %75 : vector<1x2x128xf32> to vector<2x128xf32>
    %cst_39 = arith.constant dense<0.000000e+00> : vector<2x128xf32>
    %77 = tpu.matmul %73, %0, %cst_39 {dimension_numbers = #tpu.dot_dimension_numbers<[1], [0], [0], [1], [0, 0, 1, 1], [], []>} : vector<2x128xf32>, vector<128x128xf32>, vector<2x128xf32> -> vector<2x128xf32>
    %78 = arith.addf %76, %77 : vector<2x128xf32>
    %79 = math.tanh %78 : vector<2x128xf32>
    %c13_i32 = arith.constant 13 : i32
    %80 = arith.index_cast %c13_i32 : i32 to index
    %c0_40 = arith.constant 0 : index
    %c0_41 = arith.constant 0 : index
    %81 = vector.load %arg0[%80, %c0_40, %c0_41] : memref<16x2x128xf32, #tpu.memory_space<vmem>>, vector<1x2x128xf32>
    %82 = vector.shape_cast %81 : vector<1x2x128xf32> to vector<2x128xf32>
    %cst_42 = arith.constant dense<0.000000e+00> : vector<2x128xf32>
    %83 = tpu.matmul %79, %0, %cst_42 {dimension_numbers = #tpu.dot_dimension_numbers<[1], [0], [0], [1], [0, 0, 1, 1], [], []>} : vector<2x128xf32>, vector<128x128xf32>, vector<2x128xf32> -> vector<2x128xf32>
    %84 = arith.addf %82, %83 : vector<2x128xf32>
    %85 = math.tanh %84 : vector<2x128xf32>
    %c14_i32 = arith.constant 14 : i32
    %86 = arith.index_cast %c14_i32 : i32 to index
    %c0_43 = arith.constant 0 : index
    %c0_44 = arith.constant 0 : index
    %87 = vector.load %arg0[%86, %c0_43, %c0_44] : memref<16x2x128xf32, #tpu.memory_space<vmem>>, vector<1x2x128xf32>
    %88 = vector.shape_cast %87 : vector<1x2x128xf32> to vector<2x128xf32>
    %cst_45 = arith.constant dense<0.000000e+00> : vector<2x128xf32>
    %89 = tpu.matmul %85, %0, %cst_45 {dimension_numbers = #tpu.dot_dimension_numbers<[1], [0], [0], [1], [0, 0, 1, 1], [], []>} : vector<2x128xf32>, vector<128x128xf32>, vector<2x128xf32> -> vector<2x128xf32>
    %90 = arith.addf %88, %89 : vector<2x128xf32>
    %91 = math.tanh %90 : vector<2x128xf32>
    %c15_i32 = arith.constant 15 : i32
    %92 = arith.index_cast %c15_i32 : i32 to index
    %c0_46 = arith.constant 0 : index
    %c0_47 = arith.constant 0 : index
    %93 = vector.load %arg0[%92, %c0_46, %c0_47] : memref<16x2x128xf32, #tpu.memory_space<vmem>>, vector<1x2x128xf32>
    %94 = vector.shape_cast %93 : vector<1x2x128xf32> to vector<2x128xf32>
    %cst_48 = arith.constant dense<0.000000e+00> : vector<2x128xf32>
    %95 = tpu.matmul %91, %0, %cst_48 {dimension_numbers = #tpu.dot_dimension_numbers<[1], [0], [0], [1], [0, 0, 1, 1], [], []>} : vector<2x128xf32>, vector<128x128xf32>, vector<2x128xf32> -> vector<2x128xf32>
    %96 = arith.addf %94, %95 : vector<2x128xf32>
    %97 = math.tanh %96 : vector<2x128xf32>
    %c16_i32 = arith.constant 16 : i32
    %c0_49 = arith.constant 0 : index
    %c0_50 = arith.constant 0 : index
    %98 = vector.load %arg2[%c0_49, %c0_50] : memref<128x128xf32, #tpu.memory_space<vmem>>, vector<128x128xf32>
    %cst_51 = arith.constant dense<0.000000e+00> : vector<2x128xf32>
    %99 = tpu.matmul %97, %98, %cst_51 {dimension_numbers = #tpu.dot_dimension_numbers<[1], [0], [0], [1], [0, 0, 1, 1], [], []>} : vector<2x128xf32>, vector<128x128xf32>, vector<2x128xf32> -> vector<2x128xf32>
    %c0_52 = arith.constant 0 : index
    %c0_53 = arith.constant 0 : index
    %100 = vector.load %arg3[%c0_52, %c0_53] : memref<1x128xf32, #tpu.memory_space<vmem>>, vector<1x128xf32>
    %101 = vector.broadcast %100 : vector<1x128xf32> to vector<2x128xf32>
    %102 = arith.addf %99, %101 : vector<2x128xf32>
    %c0_54 = arith.constant 0 : index
    %c0_55 = arith.constant 0 : index
    %103 = vector.load %arg4[%c0_54, %c0_55] : memref<2x128xf32, #tpu.memory_space<vmem>>, vector<2x128xf32>
    tpu.vector_store %arg4[%c0_54, %c0_55], %102 {strides = array<i32>} : memref<2x128xf32, #tpu.memory_space<vmem>>, vector<2x128xf32>,
    return
  }
}

</mosaic_0001>

<bundles_post_ra>
// kernel: stacked_nn_forward.3
= control target key start
LH: loop header
LB: loop body
LE: loop exit
PB: predicated region body
PF: predicated region fallthrough
CT: control target
= control target key end

     0   :  { %v2693_v3 = vmov 0.0|0.0   ;;  %vm2694_vm0 = vmmov 0   ;;  %v2695_v6 = vmov 0.0   ;;  %s3196_s0 = inlined_call_operand.vmem [shape: f32[16,2,128], index: 0, kind: input, shape index: {}]   ;;  %s3197_s1 = inlined_call_operand.vmem [shape: f32[128,128], index: 1, kind: input, shape index: {}]   ;;  %s3198_s2 = inlined_call_operand.vmem [shape: f32[128,128], index: 2, kind: input, shape index: {}]   ;;  %s3199_s3 = inlined_call_operand.vmem [shape: f32[1,128], index: 3, kind: input, shape index: {}]   ;;  %s3200_s4 = inlined_call_operand.hbm [shape: f32[2,128], index: 4, kind: output, shape index: {}]  }
   0x1   :  { %v18_v0 = vld [vmem:[%s3197_s1] sm:$0xff]  ;;  %v19_v1 = vld [vmem:[%s3197_s1 + $0x8] sm:$0xff]  ;;  %v20_v2 = vld [vmem:[%s3197_s1 + $0x10] sm:$0xff]  ;;  %2225 = vmatprep.subr.bf16.mxu0 %v2693_v3  ;;  %1662 = vmatprep.mubr.msk.f32.mxu0 %vm2694_vm0, %v2695_v6 }
   0x2   :  { %v2732_v4 = vpack.c.bf16 %v19_v1, %v18_v0  ;;  %v21_v5 = vld [vmem:[%s3197_s1 + $0x18] sm:$0xff]  ;;  %2249 = vmatprep.subr.bf16.mxu1 %v2693_v3  ;;  %1697 = vmatprep.mubr.msk.f32.mxu1 %vm2694_vm0, %v2695_v6  ;;  %v22_v8 = vld [vmem:[%s3197_s1 + $0x20] sm:$0xff]  ;;  %v23_v9 = vld [vmem:[%s3197_s1 + $0x28] sm:$0xff] }
   0x3   :  { %v2743_v7 = vpack.c.bf16 %v21_v5, %v20_v2 }
   0x4   :  { %2227 = vmatpush3.bf16.msra.mxu0 %v2732_v4  ;;  %2251 = vmatpush3.bf16.msra.mxu1 %v2732_v4 }
   0x5   :  { %2228 = vmatprep.subr.bf16.mxu0 %v2693_v3  ;;  %2252 = vmatprep.subr.bf16.mxu1 %v2693_v3 }
   0x6   :  { %9 = vsyncpa [#allocation3], 0  ;;  %v2755_v10 = vpack.c.bf16 %v23_v9, %v22_v8  ;;  %v24_v11 = vld [vmem:[%s3197_s1 + $0x30] sm:$0xff]  ;;  %v25_v12 = vld [vmem:[%s3197_s1 + $0x38] sm:$0xff] }
   0x7   :  { %v2767_v13 = vpack.c.bf16 %v25_v12, %v24_v11  ;;  %v26_v14 = vld [vmem:[%s3197_s1 + $0x40] sm:$0xff]  ;;  %v27_v15 = vld [vmem:[%s3197_s1 + $0x48] sm:$0xff]  ;;  %v28_v17 = vld [vmem:[%s3197_s1 + $0x50] sm:$0xff] }
   0x8   :  { %2230 = vmatpush3.bf16.msra.mxu0 %v2743_v7  ;;  %2254 = vmatpush3.bf16.msra.mxu1 %v2743_v7  ;;  %v2779_v16 = vpack.c.bf16 %v27_v15, %v26_v14  ;;  %v29_v18 = vld [vmem:[%s3197_s1 + $0x58] sm:$0xff]  ;;  %v30_v20 = vld [vmem:[%s3197_s1 + $0x60] sm:$0xff]  ;;  %v31_v21 = vld [vmem:[%s3197_s1 + $0x68] sm:$0xff] }
   0x9   :  { %2231 = vmatprep.subr.bf16.mxu0 %v2693_v3  ;;  %2255 = vmatprep.subr.bf16.mxu1 %v2693_v3  ;;  %v2791_v19 = vpack.c.bf16 %v29_v18, %v28_v17  ;;  %v2803_v22 = vpack.c.bf16 %v31_v21, %v30_v20  ;;  %v32_v23 = vld [vmem:[%s3197_s1 + $0x70] sm:$0xff]  ;;  %v33_v24 = vld [vmem:[%s3197_s1 + $0x78] sm:$0xff]  ;;  %v34_v26 = vld [vmem:[%s3196_s0] sm:$0x3] }
   0xa   :  { %v2815_v25 = vpack.c.bf16 %v33_v24, %v32_v23  ;;  %v1325_v31 = vld [vmem:[%s3196_s0 + $0x2] sm:$0x3]  ;;  %v1326_v36 = vld [vmem:[%s3196_s0 + $0x4] sm:$0x3]  ;;  %v1327_v41 = vld [vmem:[%s3196_s0 + $0x6] sm:$0x3] }
   0xb   :  { %v1328_v46 = vld [vmem:[%s3196_s0 + $0x8] sm:$0x3]  ;;  %v1329_v51 = vld [vmem:[%s3196_s0 + $0xa] sm:$0x3]  ;;  %v1330_v56 = vld [vmem:[%s3196_s0 + $0xc] sm:$0x3] }
   0xc   :  { %2233 = vmatpush3.bf16.msra.mxu0 %v2755_v10  ;;  %2257 = vmatpush3.bf16.msra.mxu1 %v2755_v10  ;;  %v1331_v61 = vld [vmem:[%s3196_s0 + $0xe] sm:$0x3]  ;;  %v1332_v2 = vld [vmem:[%s3196_s0 + $0x10] sm:$0x3]  ;;  %v1333_v12 = vld [vmem:[%s3196_s0 + $0x12] sm:$0x3] }
   0xd   :  { %2234 = vmatprep.subr.bf16.mxu0 %v2693_v3  ;;  %2258 = vmatprep.subr.bf16.mxu1 %v2693_v3  ;;  %v1334_v20 = vld [vmem:[%s3196_s0 + $0x14] sm:$0x3] }
  0x10   :  { %2236 = vmatpush3.bf16.msra.mxu0 %v2767_v13  ;;  %2260 = vmatpush3.bf16.msra.mxu1 %v2767_v13 }
  0x11   :  { %2237 = vmatprep.subr.bf16.mxu0 %v2693_v3  ;;  %2261 = vmatprep.subr.bf16.mxu1 %v2693_v3 }
  0x14   :  { %2239 = vmatpush3.bf16.msra.mxu0 %v2779_v16  ;;  %2263 = vmatpush3.bf16.msra.mxu1 %v2779_v16 }
  0x15   :  { %2240 = vmatprep.subr.bf16.mxu0 %v2693_v3  ;;  %2264 = vmatprep.subr.bf16.mxu1 %v2693_v3 }
  0x18   :  { %2242 = vmatpush3.bf16.msra.mxu0 %v2791_v19  ;;  %2266 = vmatpush3.bf16.msra.mxu1 %v2791_v19 }
  0x19   :  { %2243 = vmatprep.subr.bf16.mxu0 %v2693_v3  ;;  %2267 = vmatprep.subr.bf16.mxu1 %v2693_v3 }
  0x1c   :  { %2245 = vmatpush3.bf16.msra.mxu0 %v2803_v22  ;;  %2269 = vmatpush3.bf16.msra.mxu1 %v2803_v22 }
  0x1d   :  { %2246 = vmatprep.subr.bf16.mxu0 %v2693_v3  ;;  %2270 = vmatprep.subr.bf16.mxu1 %v2693_v3 }
  0x20   :  { %2248 = vmatpush3.bf16.msra.mxu0 %v2815_v25  ;;  %2272 = vmatpush3.bf16.msra.mxu1 %v2815_v25 }
  0x21   :  { %2273 = vmatprep.subr.bf16.mxu0 %v2693_v3  ;;  %2297 = vmatprep.subr.bf16.mxu1 %v2693_v3 }
  0x23   :  { %1663 = vmatmul.mubr.f32.vlgmr.msra.gmra.mrb[0].mxu0 %v2695_v6 }
  0x24   :  { %2275 = vmatpush3.bf16.msra.mxu0 %v2732_v4  ;;  %1732 = vmatprep.mubr.msk.f32.mxu0 %vm2694_vm0, %v2695_v6 }
  0x25   :  { %2276 = vmatprep.subr.bf16.mxu0 %v2693_v3 }
  0x28   :  { %2278 = vmatpush3.bf16.msra.mxu0 %v2743_v7 }
  0x29   :  { %2279 = vmatprep.subr.bf16.mxu0 %v2693_v3 }
  0x2c   :  { %2281 = vmatpush3.bf16.msra.mxu0 %v2755_v10 }
  0x2d   :  { %2282 = vmatprep.subr.bf16.mxu0 %v2693_v3 }
  0x30   :  { %2284 = vmatpush3.bf16.msra.mxu0 %v2767_v13 }
  0x31   :  { %2285 = vmatprep.subr.bf16.mxu0 %v2693_v3 }
  0x34   :  { %2287 = vmatpush3.bf16.msra.mxu0 %v2779_v16 }
  0x35   :  { %2288 = vmatprep.subr.bf16.mxu0 %v2693_v3 }
  0x38   :  { %2290 = vmatpush3.bf16.msra.mxu0 %v2791_v19 }
  0x39   :  { %2291 = vmatprep.subr.bf16.mxu0 %v2693_v3 }
  0x3c   :  { %2293 = vmatpush3.bf16.msra.mxu0 %v2803_v22 }
  0x3d   :  { %2294 = vmatprep.subr.bf16.mxu0 %v2693_v3 }
  0x40   :  { %2296 = vmatpush3.bf16.msra.mxu0 %v2815_v25 }
  0x41   :  { %2321 = vmatprep.subr.bf16.mxu0 %v2693_v3 }
  0xf6   :  { %v101_v27 = vpop.f32.mrb[0].mxu0 }
  0xf7   :  { %v105_v28 = vadd.f32 %v101_v27, %v34_v26  ;;  %v1664_v29 = vpop.f32.mrb[1].mxu0  ;;  %v1335_v27 = vld [vmem:[%s3196_s0 + $0x16] sm:$0x3] }
  0xf9   :  { %2637 = vtanh.f32 %v105_v28 }
 0x103   :  { %v2638_v30 = vpop.eup %2637 }
 0x104   :  { %1698 = vmatmul.mubr.f32.vlgmr.msra.gmra.mrb[0].mxu1 %v2638_v30 }
 0x105   :  { %2299 = vmatpush3.bf16.msra.mxu1 %v2732_v4  ;;  %1767 = vmatprep.mubr.msk.f32.mxu1 %vm2694_vm0, %v2695_v6 }
 0x106   :  { %2300 = vmatprep.subr.bf16.mxu1 %v2693_v3 }
 0x109   :  { %2302 = vmatpush3.bf16.msra.mxu1 %v2743_v7 }
 0x10a   :  { %2303 = vmatprep.subr.bf16.mxu1 %v2693_v3 }
 0x10d   :  { %2305 = vmatpush3.bf16.msra.mxu1 %v2755_v10 }
 0x10e   :  { %2306 = vmatprep.subr.bf16.mxu1 %v2693_v3 }
 0x111   :  { %2308 = vmatpush3.bf16.msra.mxu1 %v2767_v13 }
 0x112   :  { %2309 = vmatprep.subr.bf16.mxu1 %v2693_v3 }
 0x115   :  { %2311 = vmatpush3.bf16.msra.mxu1 %v2779_v16 }
 0x116   :  { %2312 = vmatprep.subr.bf16.mxu1 %v2693_v3 }
 0x119   :  { %2314 = vmatpush3.bf16.msra.mxu1 %v2791_v19 }
 0x11a   :  { %2315 = vmatprep.subr.bf16.mxu1 %v2693_v3 }
 0x11d   :  { %2317 = vmatpush3.bf16.msra.mxu1 %v2803_v22 }
 0x11e   :  { %2318 = vmatprep.subr.bf16.mxu1 %v2693_v3 }
 0x121   :  { %2320 = vmatpush3.bf16.msra.mxu1 %v2815_v25 }
 0x122   :  { %2345 = vmatprep.subr.bf16.mxu1 %v2693_v3 }
 0x1d7   :  { %v175_v32 = vpop.f32.mrb[0].mxu1 }
 0x1d8   :  { %v179_v33 = vadd.f32 %v1325_v31, %v175_v32  ;;  %v1699_v34 = vpop.f32.mrb[1].mxu1  ;;  %v1336_v32 = vld [vmem:[%s3196_s0 + $0x18] sm:$0x3] }
 0x1da   :  { %2639 = vtanh.f32 %v179_v33 }
 0x1e4   :  { %v2640_v35 = vpop.eup %2639 }
 0x1e5   :  { %1733 = vmatmul.mubr.f32.vlgmr.msra.gmra.mrb[2].mxu0 %v2640_v35 }
 0x1e6   :  { %2323 = vmatpush3.bf16.msra.mxu0 %v2732_v4  ;;  %1802 = vmatprep.mubr.msk.f32.mxu0 %vm2694_vm0, %v2695_v6 }
 0x1e7   :  { %2324 = vmatprep.subr.bf16.mxu0 %v2693_v3 }
 0x1ea   :  { %2326 = vmatpush3.bf16.msra.mxu0 %v2743_v7 }
 0x1eb   :  { %2327 = vmatprep.subr.bf16.mxu0 %v2693_v3 }
 0x1ee   :  { %2329 = vmatpush3.bf16.msra.mxu0 %v2755_v10 }
 0x1ef   :  { %2330 = vmatprep.subr.bf16.mxu0 %v2693_v3 }
 0x1f2   :  { %2332 = vmatpush3.bf16.msra.mxu0 %v2767_v13 }
 0x1f3   :  { %2333 = vmatprep.subr.bf16.mxu0 %v2693_v3 }
 0x1f6   :  { %2335 = vmatpush3.bf16.msra.mxu0 %v2779_v16 }
 0x1f7   :  { %2336 = vmatprep.subr.bf16.mxu0 %v2693_v3 }
 0x1fa   :  { %2338 = vmatpush3.bf16.msra.mxu0 %v2791_v19 }
 0x1fb   :  { %2339 = vmatprep.subr.bf16.mxu0 %v2693_v3 }
 0x1fe   :  { %2341 = vmatpush3.bf16.msra.mxu0 %v2803_v22 }
 0x1ff   :  { %2342 = vmatprep.subr.bf16.mxu0 %v2693_v3 }
 0x202   :  { %2344 = vmatpush3.bf16.msra.mxu0 %v2815_v25 }
 0x203   :  { %2369 = vmatprep.subr.bf16.mxu0 %v2693_v3 }
 0x2b8   :  { %v249_v37 = vpop.f32.mrb[2].mxu0 }
 0x2b9   :  { %v253_v38 = vadd.f32 %v1326_v36, %v249_v37  ;;  %v1734_v39 = vpop.f32.mrb[3].mxu0 }
 0x2bb   :  { %2641 = vtanh.f32 %v253_v38  ;;  %v1220_v38 = vld [vmem:[%s3198_s2 + $0x18] sm:$0xff] }
 0x2c5   :  { %v2642_v40 = vpop.eup %2641 }
 0x2c6   :  { %1768 = vmatmul.mubr.f32.vlgmr.msra.gmra.mrb[2].mxu1 %v2642_v40  ;;  %v1222_v40 = vld [vmem:[%s3198_s2 + $0x28] sm:$0xff] }
 0x2c7   :  { %2347 = vmatpush3.bf16.msra.mxu1 %v2732_v4  ;;  %1837 = vmatprep.mubr.msk.f32.mxu1 %vm2694_vm0, %v2695_v6 }
 0x2c8   :  { %2348 = vmatprep.subr.bf16.mxu1 %v2693_v3 }
 0x2cb   :  { %2350 = vmatpush3.bf16.msra.mxu1 %v2743_v7 }
 0x2cc   :  { %2351 = vmatprep.subr.bf16.mxu1 %v2693_v3 }
 0x2cf   :  { %2353 = vmatpush3.bf16.msra.mxu1 %v2755_v10 }
 0x2d0   :  { %2354 = vmatprep.subr.bf16.mxu1 %v2693_v3 }
 0x2d3   :  { %2356 = vmatpush3.bf16.msra.mxu1 %v2767_v13 }
 0x2d4   :  { %2357 = vmatprep.subr.bf16.mxu1 %v2693_v3 }
 0x2d7   :  { %2359 = vmatpush3.bf16.msra.mxu1 %v2779_v16 }
 0x2d8   :  { %2360 = vmatprep.subr.bf16.mxu1 %v2693_v3 }
 0x2db   :  { %2362 = vmatpush3.bf16.msra.mxu1 %v2791_v19 }
 0x2dc   :  { %2363 = vmatprep.subr.bf16.mxu1 %v2693_v3 }
 0x2df   :  { %2365 = vmatpush3.bf16.msra.mxu1 %v2803_v22 }
 0x2e0   :  { %2366 = vmatprep.subr.bf16.mxu1 %v2693_v3 }
 0x2e3   :  { %2368 = vmatpush3.bf16.msra.mxu1 %v2815_v25 }
 0x2e4   :  { %2393 = vmatprep.subr.bf16.mxu1 %v2693_v3 }
 0x399   :  { %v323_v42 = vpop.f32.mrb[2].mxu1 }
 0x39a   :  { %v327_v43 = vadd.f32 %v1327_v41, %v323_v42  ;;  %v1769_v44 = vpop.f32.mrb[3].mxu1  ;;  %v1223_v42 = vld [vmem:[%s3198_s2 + $0x30] sm:$0xff] }
 0x39c   :  { %2643 = vtanh.f32 %v327_v43  ;;  %v1224_v43 = vld [vmem:[%s3198_s2 + $0x38] sm:$0xff] }
 0x39d   :  { %v2619_v44 = vpack.c.bf16 %v1224_v43, %v1223_v42 }
 0x3a6   :  { %v2644_v45 = vpop.eup %2643 }
 0x3a7   :  { %1803 = vmatmul.mubr.f32.vlgmr.msra.gmra.mrb[4].mxu0 %v2644_v45  ;;  %v1225_v45 = vld [vmem:[%s3198_s2 + $0x40] sm:$0xff] }
 0x3a8   :  { %2371 = vmatpush3.bf16.msra.mxu0 %v2732_v4  ;;  %1872 = vmatprep.mubr.msk.f32.mxu0 %vm2694_vm0, %v2695_v6 }
 0x3a9   :  { %2372 = vmatprep.subr.bf16.mxu0 %v2693_v3 }
 0x3ac   :  { %2374 = vmatpush3.bf16.msra.mxu0 %v2743_v7 }
 0x3ad   :  { %2375 = vmatprep.subr.bf16.mxu0 %v2693_v3 }
 0x3b0   :  { %2377 = vmatpush3.bf16.msra.mxu0 %v2755_v10 }
 0x3b1   :  { %2378 = vmatprep.subr.bf16.mxu0 %v2693_v3 }
 0x3b4   :  { %2380 = vmatpush3.bf16.msra.mxu0 %v2767_v13 }
 0x3b5   :  { %2381 = vmatprep.subr.bf16.mxu0 %v2693_v3 }
 0x3b8   :  { %2383 = vmatpush3.bf16.msra.mxu0 %v2779_v16 }
 0x3b9   :  { %2384 = vmatprep.subr.bf16.mxu0 %v2693_v3 }
 0x3bc   :  { %2386 = vmatpush3.bf16.msra.mxu0 %v2791_v19 }
 0x3bd   :  { %2387 = vmatprep.subr.bf16.mxu0 %v2693_v3 }
 0x3c0   :  { %2389 = vmatpush3.bf16.msra.mxu0 %v2803_v22 }
 0x3c1   :  { %2390 = vmatprep.subr.bf16.mxu0 %v2693_v3 }
 0x3c4   :  { %2392 = vmatpush3.bf16.msra.mxu0 %v2815_v25 }
 0x3c5   :  { %2417 = vmatprep.subr.bf16.mxu0 %v2693_v3 }
 0x47a   :  { %v397_v47 = vpop.f32.mrb[4].mxu0 }
 0x47b   :  { %v401_v48 = vadd.f32 %v1328_v46, %v397_v47  ;;  %v1804_v49 = vpop.f32.mrb[5].mxu0  ;;  %v1226_v46 = vld [vmem:[%s3198_s2 + $0x48] sm:$0xff] }
 0x47c   :  { %v2622_v47 = vpack.c.bf16 %v1226_v46, %v1225_v45 }
 0x47d   :  { %2645 = vtanh.f32 %v401_v48  ;;  %v1338_v48 = vld [vmem:[%s3196_s0 + $0x1c] sm:$0x3] }
 0x487   :  { %v2646_v50 = vpop.eup %2645 }
 0x488   :  { %1838 = vmatmul.mubr.f32.vlgmr.msra.gmra.mrb[4].mxu1 %v2646_v50 }
 0x489   :  { %2395 = vmatpush3.bf16.msra.mxu1 %v2732_v4  ;;  %1907 = vmatprep.mubr.msk.f32.mxu1 %vm2694_vm0, %v2695_v6 }
 0x48a   :  { %2396 = vmatprep.subr.bf16.mxu1 %v2693_v3 }
 0x48d   :  { %2398 = vmatpush3.bf16.msra.mxu1 %v2743_v7 }
 0x48e   :  { %2399 = vmatprep.subr.bf16.mxu1 %v2693_v3 }
 0x491   :  { %2401 = vmatpush3.bf16.msra.mxu1 %v2755_v10 }
 0x492   :  { %2402 = vmatprep.subr.bf16.mxu1 %v2693_v3 }
 0x495   :  { %2404 = vmatpush3.bf16.msra.mxu1 %v2767_v13 }
 0x496   :  { %2405 = vmatprep.subr.bf16.mxu1 %v2693_v3 }
 0x499   :  { %2407 = vmatpush3.bf16.msra.mxu1 %v2779_v16 }
 0x49a   :  { %2408 = vmatprep.subr.bf16.mxu1 %v2693_v3 }
 0x49d   :  { %2410 = vmatpush3.bf16.msra.mxu1 %v2791_v19 }
 0x49e   :  { %2411 = vmatprep.subr.bf16.mxu1 %v2693_v3 }
 0x4a1   :  { %2413 = vmatpush3.bf16.msra.mxu1 %v2803_v22 }
 0x4a2   :  { %2414 = vmatprep.subr.bf16.mxu1 %v2693_v3 }
 0x4a5   :  { %2416 = vmatpush3.bf16.msra.mxu1 %v2815_v25 }
 0x4a6   :  { %2441 = vmatprep.subr.bf16.mxu1 %v2693_v3 }
 0x55b   :  { %v471_v52 = vpop.f32.mrb[4].mxu1 }
 0x55c   :  { %v475_v53 = vadd.f32 %v1329_v51, %v471_v52  ;;  %v1839_v54 = vpop.f32.mrb[5].mxu1 }
 0x55d   :  { %v1228_v54 = vld [vmem:[%s3198_s2 + $0x58] sm:$0xff] }
 0x55e   :  { %2647 = vtanh.f32 %v475_v53  ;;  %v1227_v53 = vld [vmem:[%s3198_s2 + $0x50] sm:$0xff] }
 0x568   :  { %v2648_v55 = vpop.eup %2647 }
 0x569   :  { %1873 = vmatmul.mubr.f32.vlgmr.msra.gmra.mrb[6].mxu0 %v2648_v55  ;;  %v2625_v55 = vpack.c.bf16 %v1228_v54, %v1227_v53 }
 0x56a   :  { %2419 = vmatpush3.bf16.msra.mxu0 %v2732_v4  ;;  %1942 = vmatprep.mubr.msk.f32.mxu0 %vm2694_vm0, %v2695_v6 }
 0x56b   :  { %2420 = vmatprep.subr.bf16.mxu0 %v2693_v3 }
 0x56e   :  { %2422 = vmatpush3.bf16.msra.mxu0 %v2743_v7 }
 0x56f   :  { %2423 = vmatprep.subr.bf16.mxu0 %v2693_v3 }
 0x572   :  { %2425 = vmatpush3.bf16.msra.mxu0 %v2755_v10 }
 0x573   :  { %2426 = vmatprep.subr.bf16.mxu0 %v2693_v3 }
 0x576   :  { %2428 = vmatpush3.bf16.msra.mxu0 %v2767_v13 }
 0x577   :  { %2429 = vmatprep.subr.bf16.mxu0 %v2693_v3 }
 0x57a   :  { %2431 = vmatpush3.bf16.msra.mxu0 %v2779_v16 }
 0x57b   :  { %2432 = vmatprep.subr.bf16.mxu0 %v2693_v3 }
 0x57e   :  { %2434 = vmatpush3.bf16.msra.mxu0 %v2791_v19 }
 0x57f   :  { %2435 = vmatprep.subr.bf16.mxu0 %v2693_v3 }
 0x582   :  { %2437 = vmatpush3.bf16.msra.mxu0 %v2803_v22 }
 0x583   :  { %2438 = vmatprep.subr.bf16.mxu0 %v2693_v3 }
 0x586   :  { %2440 = vmatpush3.bf16.msra.mxu0 %v2815_v25 }
 0x587   :  { %2465 = vmatprep.subr.bf16.mxu0 %v2693_v3 }
 0x63c   :  { %v545_v57 = vpop.f32.mrb[6].mxu0 }
 0x63d   :  { %v549_v58 = vadd.f32 %v1330_v56, %v545_v57  ;;  %v1874_v59 = vpop.f32.mrb[7].mxu0  ;;  %v1229_v56 = vld [vmem:[%s3198_s2 + $0x60] sm:$0xff]  ;;  %v1230_v57 = vld [vmem:[%s3198_s2 + $0x68] sm:$0xff] }
 0x63e   :  { %v1231_v59 = vld [vmem:[%s3198_s2 + $0x70] sm:$0xff] }
 0x63f   :  { %2649 = vtanh.f32 %v549_v58  ;;  %v2628_v58 = vpack.c.bf16 %v1230_v57, %v1229_v56 }
 0x649   :  { %v2650_v60 = vpop.eup %2649 }
 0x64a   :  { %1908 = vmatmul.mubr.f32.vlgmr.msra.gmra.mrb[6].mxu1 %v2650_v60  ;;  %v1232_v60 = vld [vmem:[%s3198_s2 + $0x78] sm:$0xff] }
 0x64b   :  { %2443 = vmatpush3.bf16.msra.mxu1 %v2732_v4  ;;  %1977 = vmatprep.mubr.msk.f32.mxu1 %vm2694_vm0, %v2695_v6 }
 0x64c   :  { %2444 = vmatprep.subr.bf16.mxu1 %v2693_v3 }
 0x64f   :  { %2446 = vmatpush3.bf16.msra.mxu1 %v2743_v7 }
 0x650   :  { %2447 = vmatprep.subr.bf16.mxu1 %v2693_v3 }
 0x653   :  { %2449 = vmatpush3.bf16.msra.mxu1 %v2755_v10 }
 0x654   :  { %2450 = vmatprep.subr.bf16.mxu1 %v2693_v3 }
 0x657   :  { %2452 = vmatpush3.bf16.msra.mxu1 %v2767_v13 }
 0x658   :  { %2453 = vmatprep.subr.bf16.mxu1 %v2693_v3 }
 0x65b   :  { %2455 = vmatpush3.bf16.msra.mxu1 %v2779_v16 }
 0x65c   :  { %2456 = vmatprep.subr.bf16.mxu1 %v2693_v3 }
 0x65f   :  { %2458 = vmatpush3.bf16.msra.mxu1 %v2791_v19 }
 0x660   :  { %2459 = vmatprep.subr.bf16.mxu1 %v2693_v3 }
 0x663   :  { %2461 = vmatpush3.bf16.msra.mxu1 %v2803_v22 }
 0x664   :  { %2462 = vmatprep.subr.bf16.mxu1 %v2693_v3 }
 0x667   :  { %2464 = vmatpush3.bf16.msra.mxu1 %v2815_v25 }
 0x668   :  { %2489 = vmatprep.subr.bf16.mxu1 %v2693_v3 }
 0x71d   :  { %v619_v62 = vpop.f32.mrb[6].mxu1 }
 0x71e   :  { %v623_v63 = vadd.f32 %v1331_v61, %v619_v62  ;;  %v1909_v0 = vpop.f32.mrb[7].mxu1  ;;  %v2631_v61 = vpack.c.bf16 %v1232_v60, %v1231_v59  ;;  %v1339_v62 = vld [vmem:[%s3196_s0 + $0x1e] sm:$0x3] }
 0x720   :  { %2651 = vtanh.f32 %v623_v63 }
 0x72a   :  { %v2652_v1 = vpop.eup %2651 }
 0x72b   :  { %1943 = vmatmul.mubr.f32.vlgmr.msra.gmra.mrb[8].mxu0 %v2652_v1 }
 0x72c   :  { %2467 = vmatpush3.bf16.msra.mxu0 %v2732_v4  ;;  %2012 = vmatprep.mubr.msk.f32.mxu0 %vm2694_vm0, %v2695_v6 }
 0x72d   :  { %2468 = vmatprep.subr.bf16.mxu0 %v2693_v3 }
 0x730   :  { %2470 = vmatpush3.bf16.msra.mxu0 %v2743_v7 }
 0x731   :  { %2471 = vmatprep.subr.bf16.mxu0 %v2693_v3 }
 0x734   :  { %2473 = vmatpush3.bf16.msra.mxu0 %v2755_v10 }
 0x735   :  { %2474 = vmatprep.subr.bf16.mxu0 %v2693_v3 }
 0x738   :  { %2476 = vmatpush3.bf16.msra.mxu0 %v2767_v13 }
 0x739   :  { %2477 = vmatprep.subr.bf16.mxu0 %v2693_v3 }
 0x73c   :  { %2479 = vmatpush3.bf16.msra.mxu0 %v2779_v16 }
 0x73d   :  { %2480 = vmatprep.subr.bf16.mxu0 %v2693_v3 }
 0x740   :  { %2482 = vmatpush3.bf16.msra.mxu0 %v2791_v19 }
 0x741   :  { %2483 = vmatprep.subr.bf16.mxu0 %v2693_v3 }
 0x744   :  { %2485 = vmatpush3.bf16.msra.mxu0 %v2803_v22 }
 0x745   :  { %2486 = vmatprep.subr.bf16.mxu0 %v2693_v3 }
 0x748   :  { %2488 = vmatpush3.bf16.msra.mxu0 %v2815_v25 }
 0x749   :  { %2513 = vmatprep.subr.bf16.mxu0 %v2693_v3 }
 0x7fe   :  { %v693_v5 = vpop.f32.mrb[8].mxu0 }
 0x7ff   :  { %v697_v8 = vadd.f32 %v1332_v2, %v693_v5  ;;  %v1944_v9 = vpop.f32.mrb[9].mxu0  ;;  %v1340_v5 = vld [vmem:[%s3199_s3] ss:$0 sm:$0xff] }
 0x801   :  { %2653 = vtanh.f32 %v697_v8 }
 0x80b   :  { %v2654_v11 = vpop.eup %2653 }
 0x80c   :  { %1978 = vmatmul.mubr.f32.vlgmr.msra.gmra.mrb[8].mxu1 %v2654_v11 }
 0x80d   :  { %2491 = vmatpush3.bf16.msra.mxu1 %v2732_v4  ;;  %2047 = vmatprep.mubr.msk.f32.mxu1 %vm2694_vm0, %v2695_v6 }
 0x80e   :  { %2492 = vmatprep.subr.bf16.mxu1 %v2693_v3 }
 0x811   :  { %2494 = vmatpush3.bf16.msra.mxu1 %v2743_v7 }
 0x812   :  { %2495 = vmatprep.subr.bf16.mxu1 %v2693_v3 }
 0x815   :  { %2497 = vmatpush3.bf16.msra.mxu1 %v2755_v10 }
 0x816   :  { %2498 = vmatprep.subr.bf16.mxu1 %v2693_v3 }
 0x819   :  { %2500 = vmatpush3.bf16.msra.mxu1 %v2767_v13 }
 0x81a   :  { %2501 = vmatprep.subr.bf16.mxu1 %v2693_v3 }
 0x81d   :  { %2503 = vmatpush3.bf16.msra.mxu1 %v2779_v16 }
 0x81e   :  { %2504 = vmatprep.subr.bf16.mxu1 %v2693_v3 }
 0x821   :  { %2506 = vmatpush3.bf16.msra.mxu1 %v2791_v19 }
 0x822   :  { %2507 = vmatprep.subr.bf16.mxu1 %v2693_v3 }
 0x825   :  { %2509 = vmatpush3.bf16.msra.mxu1 %v2803_v22 }
 0x826   :  { %2510 = vmatprep.subr.bf16.mxu1 %v2693_v3 }
 0x829   :  { %2512 = vmatpush3.bf16.msra.mxu1 %v2815_v25 }
 0x82a   :  { %2537 = vmatprep.subr.bf16.mxu1 %v2693_v3 }
 0x8df   :  { %v767_v14 = vpop.f32.mrb[8].mxu1 }
 0x8e0   :  { %v771_v15 = vadd.f32 %v1333_v12, %v767_v14  ;;  %v1979_v17 = vpop.f32.mrb[9].mxu1 }
 0x8e2   :  { %2655 = vtanh.f32 %v771_v15 }
 0x8ec   :  { %v2656_v18 = vpop.eup %2655 }
 0x8ed   :  { %2013 = vmatmul.mubr.f32.vlgmr.msra.gmra.mrb[10].mxu0 %v2656_v18 }
 0x8ee   :  { %2515 = vmatpush3.bf16.msra.mxu0 %v2732_v4  ;;  %2082 = vmatprep.mubr.msk.f32.mxu0 %vm2694_vm0, %v2695_v6 }
 0x8ef   :  { %2516 = vmatprep.subr.bf16.mxu0 %v2693_v3 }
 0x8f2   :  { %2518 = vmatpush3.bf16.msra.mxu0 %v2743_v7 }
 0x8f3   :  { %2519 = vmatprep.subr.bf16.mxu0 %v2693_v3 }
 0x8f6   :  { %2521 = vmatpush3.bf16.msra.mxu0 %v2755_v10 }
 0x8f7   :  { %2522 = vmatprep.subr.bf16.mxu0 %v2693_v3 }
 0x8fa   :  { %2524 = vmatpush3.bf16.msra.mxu0 %v2767_v13 }
 0x8fb   :  { %2525 = vmatprep.subr.bf16.mxu0 %v2693_v3 }
 0x8fe   :  { %2527 = vmatpush3.bf16.msra.mxu0 %v2779_v16 }
 0x8ff   :  { %2528 = vmatprep.subr.bf16.mxu0 %v2693_v3 }
 0x902   :  { %2530 = vmatpush3.bf16.msra.mxu0 %v2791_v19 }
 0x903   :  { %2531 = vmatprep.subr.bf16.mxu0 %v2693_v3 }
 0x906   :  { %2533 = vmatpush3.bf16.msra.mxu0 %v2803_v22 }
 0x907   :  { %2534 = vmatprep.subr.bf16.mxu0 %v2693_v3 }
 0x90a   :  { %2536 = vmatpush3.bf16.msra.mxu0 %v2815_v25 }
 0x90b   :  { %2561 = vmatprep.subr.bf16.mxu0 %v2693_v3 }
 0x9c0   :  { %v841_v21 = vpop.f32.mrb[10].mxu0 }
 0x9c1   :  { %v845_v23 = vadd.f32 %v1334_v20, %v841_v21  ;;  %v2014_v24 = vpop.f32.mrb[11].mxu0 }
 0x9c3   :  { %2657 = vtanh.f32 %v845_v23 }
 0x9cd   :  { %v2658_v26 = vpop.eup %2657 }
 0x9ce   :  { %2048 = vmatmul.mubr.f32.vlgmr.msra.gmra.mrb[10].mxu1 %v2658_v26 }
 0x9cf   :  { %2539 = vmatpush3.bf16.msra.mxu1 %v2732_v4  ;;  %2117 = vmatprep.mubr.msk.f32.mxu1 %vm2694_vm0, %v2695_v6 }
 0x9d0   :  { %2540 = vmatprep.subr.bf16.mxu1 %v2693_v3 }
 0x9d3   :  { %2542 = vmatpush3.bf16.msra.mxu1 %v2743_v7 }
 0x9d4   :  { %2543 = vmatprep.subr.bf16.mxu1 %v2693_v3 }
 0x9d7   :  { %2545 = vmatpush3.bf16.msra.mxu1 %v2755_v10 }
 0x9d8   :  { %2546 = vmatprep.subr.bf16.mxu1 %v2693_v3 }
 0x9db   :  { %2548 = vmatpush3.bf16.msra.mxu1 %v2767_v13 }
 0x9dc   :  { %2549 = vmatprep.subr.bf16.mxu1 %v2693_v3 }
 0x9df   :  { %2551 = vmatpush3.bf16.msra.mxu1 %v2779_v16 }
 0x9e0   :  { %2552 = vmatprep.subr.bf16.mxu1 %v2693_v3 }
 0x9e3   :  { %2554 = vmatpush3.bf16.msra.mxu1 %v2791_v19 }
 0x9e4   :  { %2555 = vmatprep.subr.bf16.mxu1 %v2693_v3 }
 0x9e7   :  { %2557 = vmatpush3.bf16.msra.mxu1 %v2803_v22 }
 0x9e8   :  { %2558 = vmatprep.subr.bf16.mxu1 %v2693_v3 }
 0x9eb   :  { %2560 = vmatpush3.bf16.msra.mxu1 %v2815_v25 }
 0x9ec   :  { %2585 = vmatprep.subr.bf16.mxu1 %v2693_v3 }
 0xaa1   :  { %v915_v28 = vpop.f32.mrb[10].mxu1 }
 0xaa2   :  { %v919_v29 = vadd.f32 %v1335_v27, %v915_v28  ;;  %v2049_v30 = vpop.f32.mrb[11].mxu1 }
 0xaa4   :  { %2659 = vtanh.f32 %v919_v29 }
 0xaae   :  { %v2660_v31 = vpop.eup %2659 }
 0xaaf   :  { %2083 = vmatmul.mubr.f32.vlgmr.msra.gmra.mrb[12].mxu0 %v2660_v31 }
 0xab0   :  { %2563 = vmatpush3.bf16.msra.mxu0 %v2732_v4  ;;  %2152 = vmatprep.mubr.msk.f32.mxu0 %vm2694_vm0, %v2695_v6 }
 0xab1   :  { %2564 = vmatprep.subr.bf16.mxu0 %v2693_v3 }
 0xab4   :  { %2566 = vmatpush3.bf16.msra.mxu0 %v2743_v7 }
 0xab5   :  { %2567 = vmatprep.subr.bf16.mxu0 %v2693_v3 }
 0xab8   :  { %2569 = vmatpush3.bf16.msra.mxu0 %v2755_v10 }
 0xab9   :  { %2570 = vmatprep.subr.bf16.mxu0 %v2693_v3 }
 0xabc   :  { %2572 = vmatpush3.bf16.msra.mxu0 %v2767_v13 }
 0xabd   :  { %2573 = vmatprep.subr.bf16.mxu0 %v2693_v3 }
 0xac0   :  { %2575 = vmatpush3.bf16.msra.mxu0 %v2779_v16 }
 0xac1   :  { %2576 = vmatprep.subr.bf16.mxu0 %v2693_v3 }
 0xac4   :  { %2578 = vmatpush3.bf16.msra.mxu0 %v2791_v19 }
 0xac5   :  { %2579 = vmatprep.subr.bf16.mxu0 %v2693_v3 }
 0xac8   :  { %2581 = vmatpush3.bf16.msra.mxu0 %v2803_v22 }
 0xac9   :  { %2582 = vmatprep.subr.bf16.mxu0 %v2693_v3 }
 0xacc   :  { %2584 = vmatpush3.bf16.msra.mxu0 %v2815_v25 }
 0xacd   :  { %2609 = vmatprep.subr.bf16.mxu0 %v2693_v3 }
 0xb82   :  { %v989_v33 = vpop.f32.mrb[12].mxu0 }
 0xb83   :  { %v993_v34 = vadd.f32 %v1336_v32, %v989_v33  ;;  %v2084_v35 = vpop.f32.mrb[13].mxu0 }
 0xb85   :  { %2661 = vtanh.f32 %v993_v34 }
 0xb8f   :  { %v2662_v36 = vpop.eup %2661 }
 0xb90   :  { %2118 = vmatmul.mubr.f32.vlgmr.msra.gmra.mrb[12].mxu1 %v2662_v36 }
 0xb91   :  { %2587 = vmatpush3.bf16.msra.mxu1 %v2732_v4  ;;  %2187 = vmatprep.mubr.msk.f32.mxu1 %vm2694_vm0, %v2695_v6  ;;  %v1337_v4 = vld [vmem:[%s3196_s0 + $0x1a] sm:$0x3] }
 0xb92   :  { %2588 = vmatprep.subr.bf16.mxu1 %v2693_v3 }
 0xb95   :  { %2590 = vmatpush3.bf16.msra.mxu1 %v2743_v7 }
 0xb96   :  { %2591 = vmatprep.subr.bf16.mxu1 %v2693_v3 }
 0xb99   :  { %2593 = vmatpush3.bf16.msra.mxu1 %v2755_v10 }
 0xb9a   :  { %2594 = vmatprep.subr.bf16.mxu1 %v2693_v3 }
 0xb9d   :  { %2596 = vmatpush3.bf16.msra.mxu1 %v2767_v13 }
 0xb9e   :  { %2597 = vmatprep.subr.bf16.mxu1 %v2693_v3 }
 0xba1   :  { %2599 = vmatpush3.bf16.msra.mxu1 %v2779_v16 }
 0xba2   :  { %2600 = vmatprep.subr.bf16.mxu1 %v2693_v3 }
 0xba5   :  { %2602 = vmatpush3.bf16.msra.mxu1 %v2791_v19  ;;  %v1217_v19 = vld [vmem:[%s3198_s2] sm:$0xff] }
 0xba6   :  { %2603 = vmatprep.subr.bf16.mxu1 %v2693_v3 }
 0xba9   :  { %2605 = vmatpush3.bf16.msra.mxu1 %v2803_v22  ;;  %v1218_v22 = vld [vmem:[%s3198_s2 + $0x8] sm:$0xff] }
 0xbaa   :  { %2606 = vmatprep.subr.bf16.mxu1 %v2693_v3  ;;  %v2610_v37 = vpack.c.bf16 %v1218_v22, %v1217_v19 }
 0xbad   :  { %2608 = vmatpush3.bf16.msra.mxu1 %v2815_v25  ;;  %v1219_v25 = vld [vmem:[%s3198_s2 + $0x10] sm:$0xff] }
 0xbae   :  { %v2613_v39 = vpack.c.bf16 %v1220_v38, %v1219_v25 }
 0xc63   :  { %v1063_v7 = vpop.f32.mrb[12].mxu1 }
 0xc64   :  { %v1067_v10 = vadd.f32 %v1337_v4, %v1063_v7  ;;  %v2119_v13 = vpop.f32.mrb[13].mxu1 }
 0xc66   :  { %2663 = vtanh.f32 %v1067_v10 }
 0xc70   :  { %v2664_v16 = vpop.eup %2663 }
 0xc71   :  { %2153 = vmatmul.mubr.f32.vlgmr.msra.gmra.mrb[14].mxu0 %v2664_v16 }
 0xc72   :  { %2222 = vmatprep.mubr.msk.f32.mxu0 %vm2694_vm0, %v2695_v6  ;;  %2611 = vmatpush3.bf16.msra.mxu0 %v2610_v37  ;;  %v1221_v6 = vld [vmem:[%s3198_s2 + $0x20] sm:$0xff]  ;;  %s2696_s2 = smov [#allocation2]  }
 0xc73   :  { %2612 = vmatprep.subr.bf16.mxu0 %v2693_v3  ;;  %v2616_v41 = vpack.c.bf16 %v1222_v40, %v1221_v6  ;;  %s1317_s6 = sshll.u32 %s2696_s2, 4  ;;  %s1318_s6 = int_to_ptr.vmem [resolvable:$true] %s1317_s6 }
 0xc74   :  { %s2669_s7 = scalar_lea.vmem %s1318_s6, 32  ;;  %p2674_p1 = scmp.lt.s32.totalorder %s1318_s6, %s1318_s6 }
 0xc75   :  { %p2670_p0 = scmp.ne.s32.totalorder %s1318_s6, %s2669_s7  ;;  %p2675_p2 = scmp.lt.s32.totalorder %s2669_s7, %s2669_s7 }
 0xc76   :  { %2614 = vmatpush3.bf16.msra.mxu0 %v2613_v39 }
 0xc77   :  { %2615 = vmatprep.subr.bf16.mxu0 %v2693_v3  ;;  %p2676_p3 = por %p2675_p2, %p2674_p1 }
 0xc79   :  { %p2677_p4 = pnand %p2676_p3, %p2670_p0 }
 0xc7a   :  { %2617 = vmatpush3.bf16.msra.mxu0 %v2616_v41 }
 0xc7b   :  { %2618 = vmatprep.subr.bf16.mxu0 %v2693_v3 }
 0xc7e   :  { %2620 = vmatpush3.bf16.msra.mxu0 %v2619_v44 }
 0xc7f   :  { %2621 = vmatprep.subr.bf16.mxu0 %v2693_v3 }
 0xc82   :  { %2623 = vmatpush3.bf16.msra.mxu0 %v2622_v47 }
 0xc83   :  { %2624 = vmatprep.subr.bf16.mxu0 %v2693_v3 }
 0xc86   :  { %2626 = vmatpush3.bf16.msra.mxu0 %v2625_v55 }
 0xc87   :  { %2627 = vmatprep.subr.bf16.mxu0 %v2693_v3 }
 0xc8a   :  { %2629 = vmatpush3.bf16.msra.mxu0 %v2628_v58 }
 0xc8b   :  { %2630 = vmatprep.subr.bf16.mxu0 %v2693_v3 }
 0xc8e   :  { %2632 = vmatpush3.bf16.msra.mxu0 %v2631_v61 }
 0xd44   :  { %v1137_v49 = vpop.f32.mrb[14].mxu0 }
 0xd45   :  { %v1141_v50 = vadd.f32 %v1338_v48, %v1137_v49  ;;  %v2154_v51 = vpop.f32.mrb[15].mxu0 }
 0xd47   :  { %2665 = vtanh.f32 %v1141_v50 }
 0xd51   :  { %v2666_v52 = vpop.eup %2665 }
 0xd52   :  { %2188 = vmatmul.mubr.f32.vlgmr.msra.gmra.mrb[14].mxu1 %v2666_v52 }
 0xe25   :  { %v1211_v63 = vpop.f32.mrb[14].mxu1 }
 0xe26   :  { %v1215_v0 = vadd.f32 %v1339_v62, %v1211_v63  ;;  %v2189_v1 = vpop.f32.mrb[15].mxu1 }
 0xe28   :  { %2667 = vtanh.f32 %v1215_v0 }
 0xe32   :  { %v2668_v2 = vpop.eup %2667 }
 0xe33   :  { %2223 = vmatmul.mubr.f32.vlgmr.msra.gmra.mrb[16].mxu0 %v2668_v2 }
 0xf06   :  { %v1306_v8 = vpop.f32.mrb[16].mxu0 }
 0xf07   :  { %v1307_v9 = vadd.f32 %v1340_v5, %v1306_v8  ;;  %v2224_v3 = vpop.f32.mrb[17].mxu0 }
 0xf09   :  { %1310 = vst [vmem:[#allocation2] sm:$0x3] %v1307_v9 }
 0xf0a   :  { %2680 = shalt.err (!%p2677_p4)
}
 0xf0b   :  { %s2681_s9 = scalar_lea.hbm %s3200_s4, 32 }
 0xf0c   :  { %p2682_p5 = scmp.ne.s32.totalorder %s3200_s4, %s2681_s9  ;;  %p2685_p6 = scmp.lt.u32.totalorder %s2681_s9, %s3200_s4 }
 0xf0e   :  { %p2687_p7 = pnand %p2685_p6, %p2682_p5 }
 0xf10   :  { %2690 = shalt.err (!%p2687_p7)
}
 0xf11   :  { %1320 = dma.vmem_to_hbm [thread:$0]  %s1318_s6, 32, %s3200_s4, [#allocation3]  }
 0xf12   :  { %2691 = dma.done.wait [#allocation3], 32  }
 0xf13   :  { %2692 = vsyncadd [#allocation3], 4294967264 }
 0xf14   :  { %1324 = vsyncpa [#allocation3], 1 }

// kernel: stacked_nn_forward.2
= control target key start
LH: loop header
LB: loop body
LE: loop exit
PB: predicated region body
PF: predicated region fallthrough
CT: control target
= control target key end

     0   :  { %vm280_vm0 = vcmask 1041408   ;;  %vm194_vm1 = vcmask 1041409   ;;  %vm197_vm2 = vcmask 1042434   ;;  %vm200_vm3 = vcmask 1043459   ;;  %s6721_s1 = inlined_call_operand.vmem [shape: bf16[36,8], index: 1, kind: input, shape index: {}]   ;;  %s6722_s0 = inlined_call_operand.vmem [shape: bf16[32,16,36], index: 0, kind: input, shape index: {}]   ;;  %s6723_s2 = inlined_call_operand.vmem [shape: f32[1,8], index: 2, kind: input, shape index: {}]   ;;  %s6724_s3 = inlined_call_operand.vmem [shape: f32[8,128], index: 3, kind: input, shape index: {}]   ;;  %s6725_s4 = inlined_call_operand.vmem [shape: f32[1,128], index: 4, kind: input, shape index: {}]   ;;  %s6726_s5 = inlined_call_operand.vmem [shape: f32[32,128], index: 5, kind: output, shape index: {}]  }
   0x1   :  { %v4262_v0 = vld [vmem:[%s6721_s1] sm:$0xff]   ;;  %v4267_v1 = vld [vmem:[%s6721_s1 + $0x8] sm:$0xff]   ;;  %v4274_v2 = vld [vmem:[%s6721_s1 + $0x10] ss:$0 sps:$4 sm:$0x33]   ;;  %vm203_vm4 = vcmask 1044484  }
   0x2   :  { %3776 = vmatprep.subr.bf16.mxu0 %v4262_v0  ;;  %3786 = vmatprep.subr.bf16.mxu1 %v4262_v0  ;;  %v4288_v3 = vsel %vm280_vm0, %v4274_v2, 0  ;;  %v3965_v4 = vld [vmem:[%s6722_s0] ss:$0 sps:$4 sm:$0x11]   ;;  %vm206_vm5 = vcmask 1045509   ;;  %vm209_vm6 = vcmask 1046534  }
   0x3   :  { %3777 = vmatpush3.bf16.msra.mxu0 %v4262_v0  ;;  %3787 = vmatpush3.bf16.msra.mxu1 %v4262_v0  ;;  %v4296_v5 = vld [vmem:[%s6722_s0 + $0x8] ss:$0 sps:$4 sm:$0x11]   ;;  %v4301_v6 = vld [vmem:[%s6722_s0 + $0x10] ss:$0 sps:$4 sm:$0x11]   ;;  %v161_v22 = vunpack.c.l.b16 %v3965_v4 }
   0x4   :  { %3778 = vmatprep.subr.bf16.mxu0 %v4267_v1  ;;  %3788 = vmatprep.subr.bf16.mxu1 %v4267_v1  ;;  %v3968_v7 = vld [vmem:[%s6722_s0 + $0x18] ss:$0 sps:$4 sm:$0x11]   ;;  %v4311_v8 = vld [vmem:[%s6722_s0 + $0x20] ss:$0 sps:$4 sm:$0x11]   ;;  %v162_v14 = vunpack.c.l.b16 %v4296_v5  ;;  %v163_v15 = vunpack.c.l.b16 %v4301_v6 }
   0x5   :  { %v4316_v9 = vld [vmem:[%s6722_s0 + $0x28] ss:$0 sps:$4 sm:$0x11]   ;;  %v4321_v10 = vld [vmem:[%s6722_s0 + $0x30] ss:$0 sps:$4 sm:$0x11]   ;;  %v164_v18 = vunpack.c.l.b16 %v3968_v7  ;;  %v165_v19 = vunpack.c.l.b16 %v4311_v8 }
   0x6   :  { %v4326_v11 = vld [vmem:[%s6722_s0 + $0x38] ss:$0 sps:$4 sm:$0x11]   ;;  %v4333_v12 = vld [vmem:[%s6722_s0 + $0x40] ss:$0 sps:$4 sm:$0x11]   ;;  %v166_v23 = vunpack.c.l.b16 %v4316_v9  ;;  %v167_v24 = vunpack.c.l.b16 %v4321_v10 }
   0x7   :  { %3779 = vmatpush3.bf16.msra.mxu0 %v4267_v1  ;;  %3789 = vmatpush3.bf16.msra.mxu1 %v4267_v1  ;;  %v4338_v13 = vld [vmem:[%s6722_s0 + $0x48] ss:$0 sps:$4 sm:$0x11]   ;;  %v3975_v16 = vld [vmem:[%s6722_s0 + $0x50] ss:$0 sps:$4 sm:$0x11]   ;;  %v168_v25 = vunpack.c.l.b16 %v4326_v11  ;;  %v169_v28 = vunpack.c.l.b16 %v4333_v12 }
   0x8   :  { %3946 = vmatprep.subr.msk.bf16.mxu0 %vm280_vm0, %v4274_v2  ;;  %3947 = vmatprep.subr.msk.bf16.mxu1 %vm280_vm0, %v4274_v2  ;;  %v4348_v17 = vld [vmem:[%s6722_s0 + $0x58] ss:$0 sps:$4 sm:$0x11]   ;;  %vm212_vm7 = vcmask 1047559   ;;  %v170_v29 = vunpack.c.l.b16 %v4338_v13  ;;  %v171_v30 = vunpack.c.l.b16 %v3975_v16  ;;  %v193_v34 = vrot.slane %v162_v14, 7 }
   0x9   :  { %v3977_v20 = vld [vmem:[%s6722_s0 + $0x60] ss:$0 sps:$4 sm:$0x11]   ;;  %v4357_v21 = vld [vmem:[%s6722_s0 + $0x68] ss:$0 sps:$4 sm:$0x11]   ;;  %v172_v31 = vunpack.c.l.b16 %v4348_v17 }
   0xa   :  { %v4365_v26 = vld [vmem:[%s6722_s0 + $0x70] ss:$0 sps:$4 sm:$0x11]   ;;  %v4370_v27 = vld [vmem:[%s6722_s0 + $0x78] ss:$0 sps:$4 sm:$0x11]   ;;  %v173_v32 = vunpack.c.l.b16 %v3977_v20  ;;  %v174_v33 = vunpack.c.l.b16 %v4357_v21  ;;  %v195_v40 = vsel %vm194_vm1, %v193_v34, %v161_v22 }
   0xb   :  { %3781 = vmatpush3.bf16.msra.mxu0 %v4288_v3  ;;  %3791 = vmatpush3.bf16.msra.mxu1 %v4288_v3  ;;  %v196_v35 = vrot.slane %v163_v15, 6  ;;  %v175_v36 = vunpack.c.l.b16 %v4365_v26  ;;  %v176_v37 = vunpack.c.l.b16 %v4370_v27  ;;  %v199_v38 = vrot.slane %v164_v18, 5  ;;  %v4398_v16 = vld [vmem:[%s6722_s0 + $0x80] ss:$0 sps:$4 sm:$0x11]  }
   0xc   :  { %3796 = vmatprep.subr.bf16.mxu0 %v4262_v0  ;;  %3806 = vmatprep.subr.bf16.mxu1 %v4262_v0  ;;  %v202_v39 = vrot.slane %v165_v19, 4  ;;  %v205_v41 = vrot.slane %v166_v23, 3  ;;  %v208_v42 = vrot.slane %v167_v24, 2  ;;  %v211_v43 = vrot.slane %v168_v25, 1 }
   0xd   :  { %v198_v44 = vsel %vm197_vm2, %v196_v35, %v195_v40  ;;  %v214_v45 = vrot.slane %v170_v29, 7  ;;  %v216_v46 = vrot.slane %v171_v30, 6  ;;  %v218_v47 = vrot.slane %v172_v31, 5  ;;  %v4405_v21 = vld [vmem:[%s6722_s0 + $0x88] ss:$0 sps:$4 sm:$0x11]  }
   0xe   :  { %vm273_vm8 = vcmask 293888   ;;  %v201_v48 = vsel %vm200_vm3, %v199_v38, %v198_v44  ;;  %v220_v49 = vrot.slane %v173_v32, 4  ;;  %v222_v50 = vrot.slane %v174_v33, 3  ;;  %v4412_v26 = vld [vmem:[%s6722_s0 + $0x90] ss:$0 sps:$4 sm:$0x11]  }
   0xf   :  { %v224_v51 = vrot.slane %v175_v36, 2  ;;  %v204_v52 = vsel %vm203_vm4, %v202_v39, %v201_v48  ;;  %v215_v53 = vsel %vm194_vm1, %v214_v45, %v169_v28  ;;  %v226_v54 = vrot.slane %v176_v37, 1  ;;  %v4446_v39 = vld [vmem:[%s6722_s0 + $0xc0] ss:$0 sps:$4 sm:$0x11]  }
  0x10   :  { %v341_v55 = vrot.slane %v161_v22, 1  ;;  %v207_v56 = vsel %vm206_vm5, %v205_v41, %v204_v52  ;;  %v217_v57 = vsel %vm197_vm2, %v216_v46, %v215_v53  ;;  %v343_v58 = vrot.slane %v163_v15, 7  ;;  %v4451_v40 = vld [vmem:[%s6722_s0 + $0xc8] ss:$0 sps:$4 sm:$0x11]  }
  0x11   :  { %v345_v59 = vrot.slane %v164_v18, 6  ;;  %v210_v60 = vsel %vm209_vm6, %v208_v42, %v207_v56  ;;  %v219_v61 = vsel %vm200_vm3, %v218_v47, %v217_v57  ;;  %v347_v63 = vrot.slane %v165_v19, 5  ;;  %v4460_v45 = vld [vmem:[%s6722_s0 + $0xd0] ss:$0 sps:$4 sm:$0x11]  }
  0x12   :  { %v342_v62 = vsel %vm194_vm1, %v162_v14, %v341_v55  ;;  %v213_v4 = vsel %vm212_vm7, %v211_v43, %v210_v60  ;;  %v221_v5 = vsel %vm203_vm4, %v220_v49, %v219_v61  ;;  %v349_v7 = vrot.slane %v166_v23, 4  ;;  %v4465_v46 = vld [vmem:[%s6722_s0 + $0xd8] ss:$0 sps:$4 sm:$0x11]  }
  0x13   :  { %v344_v6 = vsel %vm197_vm2, %v343_v58, %v342_v62  ;;  %v223_v8 = vsel %vm206_vm5, %v222_v50, %v221_v5  ;;  %v351_v10 = vrot.slane %v167_v24, 3  ;;  %v353_v11 = vrot.slane %v168_v25, 2  ;;  %v4476_v52 = vld [vmem:[%s6722_s0 + $0xe8] ss:$0 sps:$4 sm:$0x11]  }
  0x14   :  { %v346_v9 = vsel %vm200_vm3, %v345_v59, %v344_v6  ;;  %v225_v12 = vsel %vm209_vm6, %v224_v51, %v223_v8  ;;  %v355_v15 = vrot.slane %v169_v28, 1  ;;  %v357_v14 = vrot.slane %v171_v30, 7  ;;  %v3993_v51 = vld [vmem:[%s6722_s0 + $0xe0] ss:$0 sps:$4 sm:$0x11]  }
  0x15   :  { %v348_v13 = vsel %vm203_vm4, %v347_v63, %v346_v9  ;;  %v227_v17 = vsel %vm212_vm7, %v226_v54, %v225_v12  ;;  %v359_v19 = vrot.slane %v172_v31, 6  ;;  %v361_v20 = vrot.slane %v173_v32, 5  ;;  %v3984_v31 = vld [vmem:[%s6722_s0 + $0x98] ss:$0 sps:$4 sm:$0x11]  }
  0x16   :  { %v350_v18 = vsel %vm206_vm5, %v349_v7, %v348_v13  ;;  %v256_v22 = vpack.c.b16 %v227_v17, %v213_v4  ;;  %v356_v24 = vsel %vm194_vm1, %v170_v29, %v355_v15  ;;  %v363_v25 = vrot.slane %v174_v33, 4  ;;  %v4423_v29 = vld [vmem:[%s6722_s0 + $0xa0] ss:$0 sps:$4 sm:$0x11]  }
  0x17   :  { %v352_v23 = vsel %vm209_vm6, %v351_v10, %v350_v18  ;;  %v358_v27 = vsel %vm197_vm2, %v357_v14, %v356_v24  ;;  %v365_v28 = vrot.slane %v175_v36, 3  ;;  %v367_v30 = vrot.slane %v176_v37, 2  ;;  %v4428_v33 = vld [vmem:[%s6722_s0 + $0xa8] ss:$0 sps:$4 sm:$0x11]  }
  0x18   :  { %3782 = vmatprep.mubr.msk.bf16.mxu0 %vm273_vm8, %v256_v22  ;;  %v360_v32 = vsel %vm200_vm3, %v359_v19, %v358_v27  ;;  %v354_v34 = vsel %vm212_vm7, %v353_v11, %v352_v23  ;;  %v4435_v36 = vld [vmem:[%s6722_s0 + $0xb0] ss:$0 sps:$4 sm:$0x11]   ;;  %v4440_v37 = vld [vmem:[%s6722_s0 + $0xb8] ss:$0 sps:$4 sm:$0x11]   ;;  %v177_v41 = vunpack.c.l.b16 %v4398_v16  ;;  %v178_v42 = vunpack.c.l.b16 %v4405_v21 }
  0x19   :  { %v362_v35 = vsel %vm203_vm4, %v361_v20, %v360_v32  ;;  %v179_v43 = vunpack.c.l.b16 %v4412_v26  ;;  %v180_v47 = vunpack.c.l.b16 %v3984_v31  ;;  %v181_v48 = vunpack.c.l.b16 %v4423_v29  ;;  %v4484_v57 = vld [vmem:[%s6722_s0 + $0xf0] ss:$0 sps:$4 sm:$0x11]   ;;  %v4489_v58 = vld [vmem:[%s6722_s0 + $0xf8] ss:$0 sps:$4 sm:$0x11]  }
  0x1a   :  { %v364_v38 = vsel %vm206_vm5, %v363_v25, %v362_v35  ;;  %v182_v49 = vunpack.c.l.b16 %v4428_v33  ;;  %v183_v53 = vunpack.c.l.b16 %v4435_v36  ;;  %v184_v54 = vunpack.c.l.b16 %v4440_v37 }
  0x1b   :  { %v366_v44 = vsel %vm209_vm6, %v365_v28, %v364_v38  ;;  %v185_v55 = vunpack.c.l.b16 %v4446_v39  ;;  %v186_v59 = vunpack.c.l.b16 %v4451_v40  ;;  %v187_v60 = vunpack.c.l.b16 %v4460_v45 }
  0x1c   :  { %v368_v50 = vsel %vm212_vm7, %v367_v30, %v366_v44  ;;  %v188_v61 = vunpack.c.l.b16 %v4465_v46  ;;  %v189_v62 = vunpack.c.l.b16 %v3993_v51  ;;  %v190_v63 = vunpack.c.l.b16 %v4476_v52 }
  0x1d   :  { %v397_v56 = vpack.c.b16 %v368_v50, %v354_v34  ;;  %v228_v4 = vrot.slane %v178_v42, 7  ;;  %v230_v5 = vrot.slane %v179_v43, 6  ;;  %v191_v6 = vunpack.c.l.b16 %v4484_v57 }
  0x1e   :  { %v192_v7 = vunpack.c.l.b16 %v4489_v58  ;;  %v232_v8 = vrot.slane %v180_v47, 5  ;;  %v234_v9 = vrot.slane %v181_v48, 4  ;;  %v236_v11 = vrot.slane %v182_v49, 3  ;;  %v4542_v58 = vld [vmem:[%s6722_s0 + $0x20] ss:$0 sps:$4 sm:$0x22]  }
  0x1f   :  { %3792 = vmatprep.mubr.msk.bf16.mxu1 %vm273_vm8, %v397_v56  ;;  %v229_v10 = vsel %vm194_vm1, %v228_v4, %v177_v41  ;;  %v238_v12 = vrot.slane %v183_v53, 2  ;;  %v240_v13 = vrot.slane %v184_v54, 1  ;;  %v242_v14 = vrot.slane %v186_v59, 7  ;;  %v4548_v4 = vld [vmem:[%s6722_s0 + $0x28] ss:$0 sps:$4 sm:$0x22]  }
  0x20   :  { %v231_v15 = vsel %vm197_vm2, %v230_v5, %v229_v10  ;;  %v244_v16 = vrot.slane %v187_v60, 6  ;;  %v246_v17 = vrot.slane %v188_v61, 5  ;;  %v248_v19 = vrot.slane %v189_v62, 4 }
  0x21   :  { %v233_v18 = vsel %vm200_vm3, %v232_v8, %v231_v15  ;;  %v250_v20 = vrot.slane %v190_v63, 3  ;;  %v252_v21 = vrot.slane %v191_v6, 2  ;;  %v243_v23 = vsel %vm194_vm1, %v242_v14, %v185_v55  ;;  %v4568_v8 = vld [vmem:[%s6722_s0 + $0x40] ss:$0 sps:$4 sm:$0x22]  }
  0x22   :  { %v235_v22 = vsel %vm203_vm4, %v234_v9, %v233_v18  ;;  %v254_v24 = vrot.slane %v192_v7, 1  ;;  %v369_v25 = vrot.slane %v177_v41, 1  ;;  %v245_v27 = vsel %vm197_vm2, %v244_v16, %v243_v23  ;;  %v4573_v9 = vld [vmem:[%s6722_s0 + $0x48] ss:$0 sps:$4 sm:$0x22]  }
  0x23   :  { %v237_v26 = vsel %vm206_vm5, %v236_v11, %v235_v22  ;;  %v371_v28 = vrot.slane %v179_v43, 7  ;;  %v373_v30 = vrot.slane %v180_v47, 6  ;;  %v247_v32 = vsel %vm200_vm3, %v246_v17, %v245_v27  ;;  %v4516_v43 = vld [vmem:[%s6722_s0] ss:$0 sps:$4 sm:$0x22]  }
  0x24   :  { %v239_v31 = vsel %vm209_vm6, %v238_v12, %v237_v26  ;;  %v370_v29 = vsel %vm194_vm1, %v178_v42, %v369_v25  ;;  %v375_v33 = vrot.slane %v181_v48, 5  ;;  %v249_v35 = vsel %vm203_vm4, %v248_v19, %v247_v32  ;;  %v4521_v42 = vld [vmem:[%s6722_s0 + $0x8] ss:$0 sps:$4 sm:$0x22]  }
  0x25   :  { %v241_v34 = vsel %vm212_vm7, %v240_v13, %v239_v31  ;;  %v372_v36 = vsel %vm197_vm2, %v371_v28, %v370_v29  ;;  %v377_v37 = vrot.slane %v182_v49, 4  ;;  %v251_v38 = vsel %vm206_vm5, %v250_v20, %v249_v35  ;;  %v4528_v48 = vld [vmem:[%s6722_s0 + $0x10] ss:$0 sps:$4 sm:$0x22]  }
  0x26   :  { %v374_v39 = vsel %vm200_vm3, %v373_v30, %v372_v36  ;;  %v379_v40 = vrot.slane %v183_v53, 3  ;;  %v381_v41 = vrot.slane %v184_v54, 2  ;;  %v253_v44 = vsel %vm209_vm6, %v252_v21, %v251_v38  ;;  %v4535_v53 = vld [vmem:[%s6722_s0 + $0x18] ss:$0 sps:$4 sm:$0x22]  }
  0x27   :  { %v376_v45 = vsel %vm203_vm4, %v375_v33, %v374_v39  ;;  %v383_v46 = vrot.slane %v185_v55, 1  ;;  %v385_v47 = vrot.slane %v187_v60, 7  ;;  %v255_v49 = vsel %vm212_vm7, %v254_v24, %v253_v44  ;;  %v4583_v15 = vld [vmem:[%s6722_s0 + $0x50] ss:$0 sps:$4 sm:$0x22]  }
  0x28   :  { %v378_v50 = vsel %vm206_vm5, %v377_v37, %v376_v45  ;;  %v387_v51 = vrot.slane %v188_v61, 6  ;;  %v389_v52 = vrot.slane %v189_v62, 5  ;;  %v257_v54 = vpack.c.b16 %v255_v49, %v241_v34  ;;  %v4588_v14 = vld [vmem:[%s6722_s0 + $0x58] ss:$0 sps:$4 sm:$0x22]  }
  0x29   :  { %v380_v55 = vsel %vm209_vm6, %v379_v40, %v378_v50  ;;  %v384_v56 = vsel %vm194_vm1, %v186_v59, %v383_v46  ;;  %v391_v57 = vrot.slane %v190_v63, 4  ;;  %v393_v61 = vrot.slane %v191_v6, 3  ;;  %v4556_v63 = vld [vmem:[%s6722_s0 + $0x30] ss:$0 sps:$4 sm:$0x22]  }
  0x2a   :  { %v386_v60 = vsel %vm197_vm2, %v385_v47, %v384_v56  ;;  %v395_v62 = vrot.slane %v192_v7, 2  ;;  %3783 = vmatmul.mubr.msk.bf16.vlgmr.msra.gmra.mrb[0].mxu0 %vm273_vm8, %v257_v54  ;;  %v382_v5 = vsel %vm212_vm7, %v381_v41, %v380_v55  ;;  %v4561_v6 = vld [vmem:[%s6722_s0 + $0x38] ss:$0 sps:$4 sm:$0x22]   ;;  %v590_v10 = vunpack.c.l.b16 %v4516_v43 }
  0x2b   :  { %v388_v59 = vsel %vm200_vm3, %v387_v51, %v386_v60  ;;  %3797 = vmatpush3.bf16.msra.mxu0 %v4262_v0  ;;  %v591_v11 = vunpack.c.l.b16 %v4521_v42  ;;  %v592_v12 = vunpack.c.l.b16 %v4528_v48  ;;  %v593_v16 = vunpack.c.l.b16 %v4535_v53  ;;  %v4597_v20 = vld [vmem:[%s6722_s0 + $0x60] ss:$0 sps:$4 sm:$0x22]   ;;  %v4602_v21 = vld [vmem:[%s6722_s0 + $0x68] ss:$0 sps:$4 sm:$0x22]  }
  0x2c   :  { %v390_v7 = vsel %vm203_vm4, %v389_v52, %v388_v59  ;;  %3798 = vmatprep.subr.bf16.mxu0 %v4267_v1  ;;  %v594_v17 = vunpack.c.l.b16 %v4542_v58  ;;  %v595_v18 = vunpack.c.l.b16 %v4548_v4  ;;  %v596_v22 = vunpack.c.l.b16 %v4556_v63  ;;  %v4611_v26 = vld [vmem:[%s6722_s0 + $0x70] ss:$0 sps:$4 sm:$0x22]   ;;  %v4616_v27 = vld [vmem:[%s6722_s0 + $0x78] ss:$0 sps:$4 sm:$0x22]  }
  0x2d   :  { %v392_v13 = vsel %vm206_vm5, %v391_v57, %v390_v7  ;;  %v597_v23 = vunpack.c.l.b16 %v4561_v6  ;;  %v598_v24 = vunpack.c.l.b16 %v4568_v8  ;;  %v599_v28 = vunpack.c.l.b16 %v4573_v9  ;;  %v4678_v53 = vld [vmem:[%s6722_s0 + $0x90] ss:$0 sps:$4 sm:$0x22]  }
  0x2e   :  { %v394_v19 = vsel %vm209_vm6, %v393_v61, %v392_v13  ;;  %v600_v30 = vunpack.c.l.b16 %v4583_v15  ;;  %v601_v31 = vunpack.c.l.b16 %v4588_v14  ;;  %v602_v29 = vunpack.c.l.b16 %v4597_v20  ;;  %v4716_v14 = vld [vmem:[%s6722_s0 + $0xb8] ss:$0 sps:$4 sm:$0x22]  }
  0x2f   :  { %v396_v25 = vsel %vm212_vm7, %v395_v62, %v394_v19  ;;  %3799 = vmatpush3.bf16.msra.mxu0 %v4267_v1  ;;  %v603_v33 = vunpack.c.l.b16 %v4602_v21  ;;  %v622_v34 = vrot.slane %v590_v10, 2  ;;  %v604_v35 = vunpack.c.l.b16 %v4611_v26  ;;  %v4709_v26 = vld [vmem:[%s6722_s0 + $0xb0] ss:$0 sps:$4 sm:$0x22]  }
  0x30   :  { %v398_v32 = vpack.c.b16 %v396_v25, %v382_v5  ;;  %3948 = vmatprep.subr.msk.bf16.mxu0 %vm280_vm0, %v4274_v2  ;;  %v605_v36 = vunpack.c.l.b16 %v4616_v27  ;;  %v623_v37 = vrot.slane %v591_v11, 1  ;;  %v626_v38 = vrot.slane %v593_v16, 7 }
  0x31   :  { %v628_v39 = vrot.slane %v594_v17, 6  ;;  %v630_v40 = vrot.slane %v595_v18, 5  ;;  %v632_v41 = vrot.slane %v596_v22, 4  ;;  %v634_v43 = vrot.slane %v597_v23, 3 }
  0x32   :  { %3793 = vmatmul.mubr.msk.bf16.vlgmr.msra.gmra.mrb[0].mxu1 %vm273_vm8, %v398_v32  ;;  %v624_v42 = vsel %vm194_vm1, %v623_v37, %v622_v34  ;;  %v636_v44 = vrot.slane %v598_v24, 2  ;;  %v637_v45 = vrot.slane %v599_v28, 1  ;;  %v640_v46 = vrot.slane %v601_v31, 7 }
  0x33   :  { %3807 = vmatpush3.bf16.msra.mxu1 %v4262_v0  ;;  %3801 = vmatpush3.bf16.msra.mxu0 %v4288_v3  ;;  %v625_v47 = vsel %vm197_vm2, %v592_v12, %v624_v42  ;;  %v642_v48 = vrot.slane %v602_v29, 6  ;;  %v644_v49 = vrot.slane %v603_v33, 5  ;;  %v646_v50 = vrot.slane %v604_v35, 4 }
  0x34   :  { %3808 = vmatprep.subr.bf16.mxu1 %v4267_v1  ;;  %v627_v51 = vsel %vm200_vm3, %v626_v38, %v625_v47  ;;  %v638_v52 = vsel %vm194_vm1, %v637_v45, %v636_v44  ;;  %v648_v54 = vrot.slane %v605_v36, 3  ;;  %v743_v55 = vrot.slane %v590_v10, 3  ;;  %3816 = vmatprep.subr.bf16.mxu0 %v4262_v0  ;;  %v4704_v38 = vld [vmem:[%s6722_s0 + $0xa8] ss:$0 sps:$4 sm:$0x22]  }
  0x35   :  { %v629_v56 = vsel %vm203_vm4, %v628_v39, %v627_v51  ;;  %v639_v57 = vsel %vm197_vm2, %v600_v30, %v638_v52  ;;  %v744_v58 = vrot.slane %v591_v11, 2  ;;  %v746_v60 = vrot.slane %v592_v12, 1  ;;  %v4661_v12 = vld [vmem:[%s6722_s0 + $0x80] ss:$0 sps:$4 sm:$0x22]  }
  0x36   :  { %v631_v61 = vsel %vm206_vm5, %v630_v40, %v629_v56  ;;  %v641_v62 = vsel %vm200_vm3, %v640_v46, %v639_v57  ;;  %v749_v4 = vrot.slane %v594_v17, 7  ;;  %v751_v5 = vrot.slane %v595_v18, 6  ;;  %v4670_v18 = vld [vmem:[%s6722_s0 + $0x88] ss:$0 sps:$4 sm:$0x22]  }
  0x37   :  { %3809 = vmatpush3.bf16.msra.mxu1 %v4267_v1  ;;  %v633_v59 = vsel %vm209_vm6, %v632_v41, %v631_v61  ;;  %v643_v63 = vsel %vm203_vm4, %v642_v48, %v641_v62  ;;  %v745_v6 = vsel %vm194_vm1, %v744_v58, %v743_v55  ;;  %v753_v7 = vrot.slane %v596_v22, 5  ;;  %v4729_v41 = vld [vmem:[%s6722_s0 + $0xc8] ss:$0 sps:$4 sm:$0x22]  }
  0x38   :  { %3949 = vmatprep.subr.msk.bf16.mxu1 %vm280_vm0, %v4274_v2  ;;  %v635_v8 = vsel %vm212_vm7, %v634_v43, %v633_v59  ;;  %v645_v9 = vsel %vm206_vm5, %v644_v49, %v643_v63  ;;  %v747_v10 = vsel %vm197_vm2, %v746_v60, %v745_v6  ;;  %v755_v11 = vrot.slane %v597_v23, 4  ;;  %v4734_v43 = vld [vmem:[%s6722_s0 + $0xd0] ss:$0 sps:$4 sm:$0x22]  }
  0x39   :  { %v647_v2 = vsel %vm209_vm6, %v646_v50, %v645_v9  ;;  %v748_v13 = vsel %vm200_vm3, %v593_v16, %v747_v10  ;;  %v757_v15 = vrot.slane %v598_v24, 3  ;;  %v758_v17 = vrot.slane %v599_v28, 2  ;;  %v4685_v28 = vld [vmem:[%s6722_s0 + $0x98] ss:$0 sps:$4 sm:$0x22]  }
  0x3a   :  { %v649_v19 = vsel %vm212_vm7, %v648_v54, %v647_v2  ;;  %v750_v20 = vsel %vm203_vm4, %v749_v4, %v748_v13  ;;  %v760_v21 = vrot.slane %v600_v30, 1  ;;  %v763_v22 = vrot.slane %v602_v29, 7  ;;  %v4742_v47 = vld [vmem:[%s6722_s0 + $0xd8] ss:$0 sps:$4 sm:$0x22]  }
  0x3b   :  { %3811 = vmatpush3.bf16.msra.mxu1 %v4288_v3  ;;  %v678_v16 = vpack.c.b16 %v649_v19, %v635_v8  ;;  %v752_v23 = vsel %vm206_vm5, %v751_v5, %v750_v20  ;;  %v759_v24 = vsel %vm194_vm1, %v758_v17, %v757_v15  ;;  %v765_v25 = vrot.slane %v603_v33, 6  ;;  %v4017_v33 = vld [vmem:[%s6722_s0 + $0xa0] ss:$0 sps:$4 sm:$0x22]  }
  0x3c   :  { %3826 = vmatprep.subr.bf16.mxu1 %v4262_v0  ;;  %v754_v30 = vsel %vm209_vm6, %v753_v7, %v752_v23  ;;  %v761_v32 = vsel %vm197_vm2, %v760_v21, %v759_v24  ;;  %v767_v29 = vrot.slane %v604_v35, 5  ;;  %v769_v34 = vrot.slane %v605_v36, 4  ;;  %v4747_v48 = vld [vmem:[%s6722_s0 + $0xe0] ss:$0 sps:$4 sm:$0x22]  }
  0x3d   :  { %3802 = vmatprep.mubr.msk.bf16.mxu0 %vm273_vm8, %v678_v16  ;;  %v762_v37 = vsel %vm200_vm3, %v601_v31, %v761_v32  ;;  %v756_v27 = vsel %vm212_vm7, %v755_v11, %v754_v30  ;;  %v4721_v31 = vld [vmem:[%s6722_s0 + $0xc0] ss:$0 sps:$4 sm:$0x22]   ;;  %v606_v36 = vunpack.c.l.b16 %v4661_v12  ;;  %v607_v39 = vunpack.c.l.b16 %v4670_v18  ;;  %v4026_v54 = vld [vmem:[%s6722_s0 + $0xe8] ss:$0 sps:$4 sm:$0x22]  }
  0x3e   :  { %v764_v35 = vsel %vm203_vm4, %v763_v22, %v762_v37  ;;  %v608_v42 = vunpack.c.l.b16 %v4678_v53  ;;  %v609_v44 = vunpack.c.l.b16 %v4685_v28  ;;  %v610_v45 = vunpack.c.l.b16 %v4017_v33  ;;  %v4759_v55 = vld [vmem:[%s6722_s0 + $0xf0] ss:$0 sps:$4 sm:$0x22]   ;;  %v4028_v61 = vld [vmem:[%s6722_s0 + $0xf8] ss:$0 sps:$4 sm:$0x22]  }
  0x3f   :  { %v766_v40 = vsel %vm206_vm5, %v765_v25, %v764_v35  ;;  %v611_v49 = vunpack.c.l.b16 %v4704_v38  ;;  %v612_v50 = vunpack.c.l.b16 %v4709_v26  ;;  %v613_v51 = vunpack.c.l.b16 %v4716_v14 }
  0x40   :  { %v768_v46 = vsel %vm209_vm6, %v767_v29, %v766_v40  ;;  %v614_v56 = vunpack.c.l.b16 %v4721_v31  ;;  %v615_v57 = vunpack.c.l.b16 %v4729_v41  ;;  %v616_v58 = vunpack.c.l.b16 %v4734_v43 }
  0x41   :  { %v770_v52 = vsel %vm212_vm7, %v769_v34, %v768_v46  ;;  %v617_v62 = vunpack.c.l.b16 %v4742_v47  ;;  %v618_v4 = vunpack.c.l.b16 %v4747_v48  ;;  %v650_v5 = vrot.slane %v606_v36, 2 }
  0x42   :  { %v799_v60 = vpack.c.b16 %v770_v52, %v756_v27  ;;  %v619_v59 = vunpack.c.l.b16 %v4026_v54  ;;  %v620_v63 = vunpack.c.l.b16 %v4759_v55  ;;  %v651_v6 = vrot.slane %v607_v39, 1  ;;  %v4810_v55 = vld [vmem:[%s6722_s0 + $0x18] ss:$0 sps:$4 sm:$0x44]  }
  0x43   :  { %v654_v7 = vrot.slane %v609_v44, 7  ;;  %v621_v8 = vunpack.c.l.b16 %v4028_v61  ;;  %v656_v9 = vrot.slane %v610_v45, 6  ;;  %v658_v10 = vrot.slane %v611_v49, 5  ;;  %v4817_v61 = vld [vmem:[%s6722_s0 + $0x20] ss:$0 sps:$4 sm:$0x44]  }
  0x44   :  { %3812 = vmatprep.mubr.msk.bf16.mxu1 %vm273_vm8, %v799_v60  ;;  %v660_v11 = vrot.slane %v612_v50, 4  ;;  %v652_v12 = vsel %vm194_vm1, %v651_v6, %v650_v5  ;;  %v662_v2 = vrot.slane %v613_v51, 3  ;;  %v664_v13 = vrot.slane %v614_v56, 2  ;;  %v4824_v5 = vld [vmem:[%s6722_s0 + $0x28] ss:$0 sps:$4 sm:$0x44]  }
  0x45   :  { %v665_v15 = vrot.slane %v615_v57, 1  ;;  %v653_v17 = vsel %vm197_vm2, %v608_v42, %v652_v12  ;;  %v668_v18 = vrot.slane %v617_v62, 7  ;;  %v670_v19 = vrot.slane %v618_v4, 6 }
  0x46   :  { %v672_v20 = vrot.slane %v619_v59, 5  ;;  %v655_v21 = vsel %vm200_vm3, %v654_v7, %v653_v17  ;;  %v674_v53 = vrot.slane %v620_v63, 4  ;;  %v676_v16 = vrot.slane %v621_v8, 3  ;;  %v4839_v7 = vld [vmem:[%s6722_s0 + $0x38] ss:$0 sps:$4 sm:$0x44]  }
  0x47   :  { %v666_v22 = vsel %vm194_vm1, %v665_v15, %v664_v13  ;;  %v657_v23 = vsel %vm203_vm4, %v656_v9, %v655_v21  ;;  %v771_v25 = vrot.slane %v606_v36, 3  ;;  %v772_v28 = vrot.slane %v607_v39, 2  ;;  %v4790_v36 = vld [vmem:[%s6722_s0] ss:$0 sps:$4 sm:$0x44]  }
  0x48   :  { %v667_v24 = vsel %vm197_vm2, %v616_v58, %v666_v22  ;;  %v659_v30 = vsel %vm206_vm5, %v658_v10, %v657_v23  ;;  %v774_v29 = vrot.slane %v608_v42, 1  ;;  %v777_v34 = vrot.slane %v610_v45, 7  ;;  %v4797_v42 = vld [vmem:[%s6722_s0 + $0x8] ss:$0 sps:$4 sm:$0x44]  }
  0x49   :  { %v669_v32 = vsel %vm200_vm3, %v668_v18, %v667_v24  ;;  %v661_v33 = vsel %vm209_vm6, %v660_v11, %v659_v30  ;;  %v773_v38 = vsel %vm194_vm1, %v772_v28, %v771_v25  ;;  %v779_v26 = vrot.slane %v611_v49, 6  ;;  %v4872_v15 = vld [vmem:[%s6722_s0 + $0x60] ss:$0 sps:$4 sm:$0x44]   ;;  %v4895_v25 = vld [vmem:[%s6721_s1 + $0x8] sm:$0xff]  }
  0x4a   :  { %v671_v37 = vsel %vm203_vm4, %v670_v19, %v669_v32  ;;  %v663_v27 = vsel %vm212_vm7, %v662_v2, %v661_v33  ;;  %v775_v14 = vsel %vm197_vm2, %v774_v29, %v773_v38  ;;  %v781_v31 = vrot.slane %v612_v50, 5  ;;  %v4804_v50 = vld [vmem:[%s6722_s0 + $0x10] ss:$0 sps:$4 sm:$0x44]  }
  0x4b   :  { %v673_v35 = vsel %vm206_vm5, %v672_v20, %v671_v37  ;;  %v776_v40 = vsel %vm200_vm3, %v609_v44, %v775_v14  ;;  %v783_v41 = vrot.slane %v613_v51, 4  ;;  %v785_v43 = vrot.slane %v614_v56, 3  ;;  %v4881_v21 = vld [vmem:[%s6722_s0 + $0x68] ss:$0 sps:$4 sm:$0x44]  }
  0x4c   :  { %v675_v39 = vsel %vm209_vm6, %v674_v53, %v673_v35  ;;  %v778_v46 = vsel %vm203_vm4, %v777_v34, %v776_v40  ;;  %v786_v48 = vrot.slane %v615_v57, 2  ;;  %v788_v49 = vrot.slane %v616_v58, 1  ;;  %v4886_v22 = vld [vmem:[%s6722_s0 + $0x70] ss:$0 sps:$4 sm:$0x44]  }
  0x4d   :  { %v677_v45 = vsel %vm212_vm7, %v676_v16, %v675_v39  ;;  %v780_v44 = vsel %vm206_vm5, %v779_v26, %v778_v46  ;;  %v791_v51 = vrot.slane %v618_v4, 7  ;;  %v793_v54 = vrot.slane %v619_v59, 6  ;;  %v4829_v59 = vld [vmem:[%s6722_s0 + $0x30] ss:$0 sps:$4 sm:$0x44]  }
  0x4e   :  { %v679_v52 = vpack.c.b16 %v677_v45, %v663_v27  ;;  %v782_v56 = vsel %vm209_vm6, %v781_v31, %v780_v44  ;;  %v787_v57 = vsel %vm194_vm1, %v786_v48, %v785_v43  ;;  %v795_v58 = vrot.slane %v620_v63, 5  ;;  %v4901_v28 = vld [vmem:[%s6722_s0 + $0x78] ss:$0 sps:$4 sm:$0x44]   ;;  %v4924_v43 = vld [vmem:[%s6721_s1] sm:$0xff]  }
  0x4f   :  { %v797_v60 = vrot.slane %v621_v8, 4  ;;  %v789_v4 = vsel %vm197_vm2, %v788_v49, %v787_v57  ;;  %v784_v63 = vsel %vm212_vm7, %v783_v41, %v782_v56  ;;  %v4844_v8 = vld [vmem:[%s6722_s0 + $0x40] ss:$0 sps:$4 sm:$0x44]   ;;  %v992_v9 = vunpack.c.l.b16 %v4790_v36 }
  0x50   :  { %3803 = vmatmul.mubr.msk.bf16.vlgmr.msra.gmra.mrb[4].mxu0 %vm273_vm8, %v679_v52  ;;  %v790_v6 = vsel %vm200_vm3, %v617_v62, %v789_v4  ;;  %v993_v10 = vunpack.c.l.b16 %v4797_v42  ;;  %v4858_v62 = vld [vmem:[%s6722_s0 + $0x50] ss:$0 sps:$4 sm:$0x44]   ;;  %v994_v11 = vunpack.c.l.b16 %v4804_v50  ;;  %v995_v12 = vunpack.c.l.b16 %v4810_v55 }
  0x51   :  { %3817 = vmatpush3.bf16.msra.mxu0 %v4262_v0  ;;  %v792_v47 = vsel %vm203_vm4, %v791_v51, %v790_v6  ;;  %v4853_v0 = vld [vmem:[%s6722_s0 + $0x48] ss:$0 sps:$4 sm:$0x44]   ;;  %v996_v2 = vunpack.c.l.b16 %v4817_v61  ;;  %v997_v17 = vunpack.c.l.b16 %v4824_v5  ;;  %v998_v18 = vunpack.c.l.b16 %v4829_v59  ;;  %v4908_v33 = vld [vmem:[%s6721_s1 + $0x10] ss:$0 sps:$4 sm:$0x33]  }
  0x52   :  { %3818 = vmatprep.subr.bf16.mxu0 %v4267_v1  ;;  %v794_v13 = vsel %vm206_vm5, %v793_v54, %v792_v47  ;;  %v4867_v1 = vld [vmem:[%s6722_s0 + $0x58] ss:$0 sps:$4 sm:$0x44]   ;;  %v999_v19 = vunpack.c.l.b16 %v4839_v7  ;;  %v1000_v53 = vunpack.c.l.b16 %v4844_v8  ;;  %v1001_v16 = vunpack.c.l.b16 %v4853_v0  ;;  %v4981_v0 = vld [vmem:[%s6722_s0 + $0x90] ss:$0 sps:$4 sm:$0x44]  }
  0x53   :  { %v796_v20 = vsel %vm209_vm6, %v795_v58, %v794_v13  ;;  %v1002_v23 = vunpack.c.l.b16 %v4858_v62  ;;  %v1003_v30 = vunpack.c.l.b16 %v4867_v1  ;;  %v1004_v32 = vunpack.c.l.b16 %v4872_v15  ;;  %v4988_v5 = vld [vmem:[%s6722_s0 + $0x98] ss:$0 sps:$4 sm:$0x44]  }
  0x54   :  { %v798_v24 = vsel %vm212_vm7, %v797_v60, %v796_v20  ;;  %v1024_v29 = vrot.slane %v992_v9, 4  ;;  %v1005_v37 = vunpack.c.l.b16 %v4881_v21  ;;  %v1006_v38 = vunpack.c.l.b16 %v4886_v22 }
  0x55   :  { %3819 = vmatpush3.bf16.msra.mxu0 %v4895_v25  ;;  %v800_v34 = vpack.c.b16 %v798_v24, %v784_v63  ;;  %v1025_v26 = vrot.slane %v993_v10, 3  ;;  %v1007_v27 = vunpack.c.l.b16 %v4901_v28  ;;  %v1027_v35 = vrot.slane %v994_v11, 2  ;;  %v4969_v24 = vld [vmem:[%s6722_s0 + $0x88] ss:$0 sps:$4 sm:$0x44]  }
  0x56   :  { %3950 = vmatprep.subr.msk.bf16.mxu0 %vm280_vm0, %v4908_v33  ;;  %v1029_v14 = vrot.slane %v995_v12, 1  ;;  %v1032_v31 = vrot.slane %v997_v17, 7  ;;  %v1034_v39 = vrot.slane %v998_v18, 6  ;;  %v1036_v40 = vrot.slane %v999_v19, 5 }
  0x57   :  { %3813 = vmatmul.mubr.msk.bf16.vlgmr.msra.gmra.mrb[4].mxu1 %vm273_vm8, %v800_v34  ;;  %v1026_v36 = vsel %vm194_vm1, %v1025_v26, %v1024_v29  ;;  %v1038_v41 = vrot.slane %v1000_v53, 4  ;;  %v1039_v45 = vrot.slane %v1001_v16, 3  ;;  %v1041_v46 = vrot.slane %v1002_v23, 2 }
  0x58   :  { %3827 = vmatpush3.bf16.msra.mxu1 %v4924_v43  ;;  %v1028_v42 = vsel %vm197_vm2, %v1027_v35, %v1026_v36  ;;  %v1043_v48 = vrot.slane %v1003_v30, 1  ;;  %v1046_v50 = vrot.slane %v1005_v37, 7  ;;  %v1048_v52 = vrot.slane %v1006_v38, 6  ;;  %v5009_v35 = vld [vmem:[%s6722_s0 + $0xb0] ss:$0 sps:$4 sm:$0x44]  }
  0x59   :  { %3821 = vmatpush3.bf16.msra.mxu0 %v4288_v3  ;;  %3828 = vmatprep.subr.bf16.mxu1 %v4895_v25  ;;  %v1030_v49 = vsel %vm200_vm3, %v1029_v14, %v1028_v42  ;;  %v1050_v44 = vrot.slane %v1007_v27, 5  ;;  %v1040_v54 = vsel %vm194_vm1, %v1039_v45, %v1038_v41  ;;  %v1145_v55 = vrot.slane %v992_v9, 5  ;;  %v5016_v14 = vld [vmem:[%s6722_s0 + $0xb8] ss:$0 sps:$4 sm:$0x44]  }
  0x5a   :  { %3836 = vmatprep.subr.bf16.mxu0 %v4924_v43  ;;  %v1031_v51 = vsel %vm203_vm4, %v996_v2, %v1030_v49  ;;  %v1146_v56 = vrot.slane %v993_v10, 4  ;;  %v1042_v58 = vsel %vm197_vm2, %v1041_v46, %v1040_v54  ;;  %v1148_v60 = vrot.slane %v994_v11, 3  ;;  %v5031_v41 = vld [vmem:[%s6722_s0 + $0xc8] ss:$0 sps:$4 sm:$0x44]  }
  0x5b   :  { %v1033_v57 = vsel %vm206_vm5, %v1032_v31, %v1031_v51  ;;  %v1150_v61 = vrot.slane %v995_v12, 2  ;;  %v1044_v59 = vsel %vm200_vm3, %v1043_v48, %v1042_v58  ;;  %v1152_v6 = vrot.slane %v996_v2, 1  ;;  %v4960_v2 = vld [vmem:[%s6722_s0 + $0x80] ss:$0 sps:$4 sm:$0x44]  }
  0x5c   :  { %3829 = vmatpush3.bf16.msra.mxu1 %v4895_v25  ;;  %v1035_v4 = vsel %vm209_vm6, %v1034_v39, %v1033_v57  ;;  %v1147_v63 = vsel %vm194_vm1, %v1146_v56, %v1145_v55  ;;  %v1045_v9 = vsel %vm203_vm4, %v1004_v32, %v1044_v59  ;;  %v1155_v47 = vrot.slane %v998_v18, 7  ;;  %v5021_v31 = vld [vmem:[%s6722_s0 + $0xc0] ss:$0 sps:$4 sm:$0x44]  }
  0x5d   :  { %3951 = vmatprep.subr.msk.bf16.mxu1 %vm280_vm0, %v4908_v33  ;;  %v1037_v8 = vsel %vm212_vm7, %v1036_v40, %v1035_v4  ;;  %v1149_v10 = vsel %vm197_vm2, %v1148_v60, %v1147_v63  ;;  %v1047_v62 = vsel %vm206_vm5, %v1046_v50, %v1045_v9  ;;  %v1157_v12 = vrot.slane %v999_v19, 6  ;;  %v5036_v42 = vld [vmem:[%s6722_s0 + $0xd0] ss:$0 sps:$4 sm:$0x44]  }
  0x5e   :  { %v1151_v11 = vsel %vm200_vm3, %v1150_v61, %v1149_v10  ;;  %v1159_v13 = vrot.slane %v1000_v53, 5  ;;  %v1049_v15 = vsel %vm209_vm6, %v1048_v52, %v1047_v62  ;;  %v1160_v18 = vrot.slane %v1001_v16, 4  ;;  %v5050_v49 = vld [vmem:[%s6722_s0 + $0xe0] ss:$0 sps:$4 sm:$0x44]  }
  0x5f   :  { %v1153_v20 = vsel %vm203_vm4, %v1152_v6, %v1151_v11  ;;  %v1162_v22 = vrot.slane %v1002_v23, 3  ;;  %v1051_v7 = vsel %vm212_vm7, %v1050_v44, %v1049_v15  ;;  %v1164_v53 = vrot.slane %v1003_v30, 2  ;;  %v4997_v30 = vld [vmem:[%s6722_s0 + $0xa0] ss:$0 sps:$4 sm:$0x44]  }
  0x60   :  { %3831 = vmatpush3.bf16.msra.mxu1 %v4288_v3  ;;  %v1154_v19 = vsel %vm206_vm5, %v997_v17, %v1153_v20  ;;  %v1166_v29 = vrot.slane %v1004_v32, 1  ;;  %v1080_v16 = vpack.c.b16 %v1051_v7, %v1037_v8  ;;  %v1161_v34 = vsel %vm194_vm1, %v1160_v18, %v1159_v13  ;;  %v5059_v54 = vld [vmem:[%s6722_s0 + $0xe8] ss:$0 sps:$4 sm:$0x44]  }
  0x61   :  { %v1156_v23 = vsel %vm209_vm6, %v1155_v47, %v1154_v19  ;;  %v1169_v26 = vrot.slane %v1006_v38, 7  ;;  %3846 = vmatprep.subr.bf16.mxu1 %v4924_v43  ;;  %v1163_v1 = vsel %vm197_vm2, %v1162_v22, %v1161_v34  ;;  %v1171_v17 = vrot.slane %v1007_v27, 6  ;;  %v5004_v38 = vld [vmem:[%s6722_s0 + $0xa8] ss:$0 sps:$4 sm:$0x44]  }
  0x62   :  { %3822 = vmatprep.mubr.msk.bf16.mxu0 %vm273_vm8, %v1080_v16  ;;  %v1165_v32 = vsel %vm200_vm3, %v1164_v53, %v1163_v1  ;;  %v1158_v28 = vsel %vm212_vm7, %v1157_v12, %v1156_v23  ;;  %v1008_v36 = vunpack.c.l.b16 %v4960_v2  ;;  %v1009_v39 = vunpack.c.l.b16 %v4969_v24  ;;  %v5064_v55 = vld [vmem:[%s6722_s0 + $0xf0] ss:$0 sps:$4 sm:$0x44]   ;;  %v4060_v61 = vld [vmem:[%s6722_s0 + $0xf8] ss:$0 sps:$4 sm:$0x44]  }
  0x63   :  { %v1167_v27 = vsel %vm203_vm4, %v1166_v29, %v1165_v32  ;;  %v1010_v45 = vunpack.c.l.b16 %v4981_v0  ;;  %v1011_v46 = vunpack.c.l.b16 %v4988_v5  ;;  %v1012_v48 = vunpack.c.l.b16 %v4997_v30 }
  0x64   :  { %v1168_v40 = vsel %vm206_vm5, %v1005_v37, %v1167_v27  ;;  %v5045_v37 = vld [vmem:[%s6722_s0 + $0xd8] ss:$0 sps:$4 sm:$0x44]   ;;  %v1013_v50 = vunpack.c.l.b16 %v5004_v38  ;;  %v1014_v52 = vunpack.c.l.b16 %v5009_v35  ;;  %v1015_v44 = vunpack.c.l.b16 %v5016_v14 }
  0x65   :  { %v1170_v21 = vsel %vm209_vm6, %v1169_v26, %v1168_v40  ;;  %v1016_v56 = vunpack.c.l.b16 %v5021_v31  ;;  %v1017_v57 = vunpack.c.l.b16 %v5031_v41  ;;  %v1018_v58 = vunpack.c.l.b16 %v5036_v42  ;;  %v5098_v40 = vld [vmem:[%s6722_s0] ss:$0 sps:$4 sm:$0x88]  }
  0x66   :  { %v1172_v51 = vsel %vm212_vm7, %v1171_v17, %v1170_v21  ;;  %v1019_v4 = vunpack.c.l.b16 %v5045_v37  ;;  %v1020_v59 = vunpack.c.l.b16 %v5050_v49  ;;  %v1052_v63 = vrot.slane %v1008_v36, 4 }
  0x67   :  { %v1201_v60 = vpack.c.b16 %v1172_v51, %v1158_v28  ;;  %v1021_v6 = vunpack.c.l.b16 %v5059_v54  ;;  %v1022_v8 = vunpack.c.l.b16 %v5064_v55  ;;  %v1053_v9 = vrot.slane %v1009_v39, 3  ;;  %v5112_v51 = vld [vmem:[%s6722_s0 + $0x10] ss:$0 sps:$4 sm:$0x88]  }
  0x68   :  { %v1055_v10 = vrot.slane %v1010_v45, 2  ;;  %v1023_v47 = vunpack.c.l.b16 %v4060_v61  ;;  %v1057_v62 = vrot.slane %v1011_v46, 1  ;;  %v1060_v11 = vrot.slane %v1013_v50, 7  ;;  %v5120_v61 = vld [vmem:[%s6722_s0 + $0x18] ss:$0 sps:$4 sm:$0x88]  }
  0x69   :  { %3832 = vmatprep.mubr.msk.bf16.mxu1 %vm273_vm8, %v1201_v60  ;;  %v1062_v12 = vrot.slane %v1014_v52, 6  ;;  %v1054_v13 = vsel %vm194_vm1, %v1053_v9, %v1052_v63  ;;  %v1064_v2 = vrot.slane %v1015_v44, 5  ;;  %v1066_v15 = vrot.slane %v1016_v56, 4 }
  0x6a   :  { %v1067_v20 = vrot.slane %v1017_v57, 3  ;;  %v1056_v18 = vsel %vm197_vm2, %v1055_v10, %v1054_v13  ;;  %v1069_v22 = vrot.slane %v1018_v58, 2  ;;  %v1071_v24 = vrot.slane %v1019_v4, 1  ;;  %v5127_v10 = vld [vmem:[%s6722_s0 + $0x20] ss:$0 sps:$4 sm:$0x88]  }
  0x6b   :  { %v1074_v7 = vrot.slane %v1021_v6, 7  ;;  %v1058_v19 = vsel %vm200_vm3, %v1057_v62, %v1056_v18  ;;  %v1076_v29 = vrot.slane %v1022_v8, 6  ;;  %v1078_v0 = vrot.slane %v1023_v47, 5  ;;  %v5152_v62 = vld [vmem:[%s6722_s0 + $0x40] ss:$0 sps:$4 sm:$0x88]  }
  0x6c   :  { %v1068_v53 = vsel %vm194_vm1, %v1067_v20, %v1066_v15  ;;  %v1059_v16 = vsel %vm203_vm4, %v1012_v48, %v1058_v19  ;;  %v1173_v34 = vrot.slane %v1008_v36, 5  ;;  %v1174_v26 = vrot.slane %v1009_v39, 4  ;;  %v5166_v15 = vld [vmem:[%s6722_s0 + $0x50] ss:$0 sps:$4 sm:$0x88]  }
  0x6d   :  { %v1070_v23 = vsel %vm197_vm2, %v1069_v22, %v1068_v53  ;;  %v1061_v5 = vsel %vm206_vm5, %v1060_v11, %v1059_v16  ;;  %v1176_v17 = vrot.slane %v1010_v45, 3  ;;  %v1178_v30 = vrot.slane %v1011_v46, 2  ;;  %v5182_v19 = vld [vmem:[%s6722_s0 + $0x60] ss:$0 sps:$4 sm:$0x88]  }
  0x6e   :  { %v1072_v1 = vsel %vm200_vm3, %v1071_v24, %v1070_v23  ;;  %v1063_v32 = vsel %vm209_vm6, %v1062_v12, %v1061_v5  ;;  %v1175_v28 = vsel %vm194_vm1, %v1174_v26, %v1173_v34  ;;  %v1180_v27 = vrot.slane %v1012_v48, 1  ;;  %v5105_v48 = vld [vmem:[%s6722_s0 + $0x8] ss:$0 sps:$4 sm:$0x88]  }
  0x6f   :  { %v1073_v35 = vsel %vm203_vm4, %v1020_v59, %v1072_v1  ;;  %v1065_v14 = vsel %vm212_vm7, %v1064_v2, %v1063_v32  ;;  %v1177_v36 = vsel %vm197_vm2, %v1176_v17, %v1175_v28  ;;  %v1183_v39 = vrot.slane %v1014_v52, 7  ;;  %v5161_v2 = vld [vmem:[%s6722_s0 + $0x48] ss:$0 sps:$4 sm:$0x88]  }
  0x70   :  { %v1075_v31 = vsel %vm206_vm5, %v1074_v7, %v1073_v35  ;;  %v1179_v42 = vsel %vm200_vm3, %v1178_v30, %v1177_v36  ;;  %v1185_v45 = vrot.slane %v1015_v44, 6  ;;  %v1187_v46 = vrot.slane %v1016_v56, 5  ;;  %v5177_v7 = vld [vmem:[%s6722_s0 + $0x58] ss:$0 sps:$4 sm:$0x88]  }
  0x71   :  { %v1077_v41 = vsel %vm209_vm6, %v1076_v29, %v1075_v31  ;;  %v1181_v37 = vsel %vm203_vm4, %v1180_v27, %v1179_v42  ;;  %v1188_v49 = vrot.slane %v1017_v57, 4  ;;  %v1190_v52 = vrot.slane %v1018_v58, 3  ;;  %v5196_v16 = vld [vmem:[%s6722_s0 + $0x70] ss:$0 sps:$4 sm:$0x88]  }
  0x72   :  { %v1079_v21 = vsel %vm212_vm7, %v1078_v0, %v1077_v41  ;;  %v1182_v44 = vsel %vm206_vm5, %v1013_v50, %v1181_v37  ;;  %v1192_v56 = vrot.slane %v1019_v4, 2  ;;  %v1194_v60 = vrot.slane %v1020_v59, 1  ;;  %v5134_v50 = vld [vmem:[%s6722_s0 + $0x28] ss:$0 sps:$4 sm:$0x88]  }
  0x73   :  { %v1081_v55 = vpack.c.b16 %v1079_v21, %v1065_v14  ;;  %v1184_v57 = vsel %vm209_vm6, %v1183_v39, %v1182_v44  ;;  %v1189_v58 = vsel %vm194_vm1, %v1188_v49, %v1187_v46  ;;  %v1197_v63 = vrot.slane %v1022_v8, 7  ;;  %v5139_v4 = vld [vmem:[%s6722_s0 + $0x30] ss:$0 sps:$4 sm:$0x88]  }
  0x74   :  { %v1199_v9 = vrot.slane %v1023_v47, 6  ;;  %v1191_v38 = vsel %vm197_vm2, %v1190_v52, %v1189_v58  ;;  %v1186_v59 = vsel %vm212_vm7, %v1185_v45, %v1184_v57  ;;  %v5147_v47 = vld [vmem:[%s6722_s0 + $0x38] ss:$0 sps:$4 sm:$0x88]   ;;  %v1394_v11 = vunpack.c.l.b16 %v5098_v40 }
  0x75   :  { %3823 = vmatmul.mubr.msk.bf16.vlgmr.msra.gmra.mrb[8].mxu0 %vm273_vm8, %v1081_v55  ;;  %v1193_v8 = vsel %vm200_vm3, %v1192_v56, %v1191_v38  ;;  %v1395_v12 = vunpack.c.l.b16 %v5105_v48  ;;  %v1396_v20 = vunpack.c.l.b16 %v5112_v51  ;;  %v1397_v18 = vunpack.c.l.b16 %v5120_v61  ;;  %v5206_v1 = vld [vmem:[%s6722_s0 + $0x78] ss:$0 sps:$4 sm:$0x88]  }
  0x76   :  { %3837 = vmatpush3.bf16.msra.mxu0 %v4924_v43  ;;  %v1195_v13 = vsel %vm203_vm4, %v1194_v60, %v1193_v8  ;;  %v1398_v22 = vunpack.c.l.b16 %v5127_v10  ;;  %v1399_v53 = vunpack.c.l.b16 %v5134_v50  ;;  %v1400_v29 = vunpack.c.l.b16 %v5139_v4 }
  0x77   :  { %3838 = vmatprep.subr.bf16.mxu0 %v4895_v25  ;;  %v1196_v24 = vsel %vm206_vm5, %v1021_v6, %v1195_v13  ;;  %v1401_v0 = vunpack.c.l.b16 %v5147_v47  ;;  %v5191_v6 = vld [vmem:[%s6722_s0 + $0x68] ss:$0 sps:$4 sm:$0x88]   ;;  %v1402_v23 = vunpack.c.l.b16 %v5152_v62  ;;  %v1403_v34 = vunpack.c.l.b16 %v5161_v2 }
  0x78   :  { %v1198_v54 = vsel %vm209_vm6, %v1197_v63, %v1196_v24  ;;  %v1404_v26 = vunpack.c.l.b16 %v5166_v15  ;;  %v1405_v17 = vunpack.c.l.b16 %v5177_v7  ;;  %v1406_v30 = vunpack.c.l.b16 %v5182_v19 }
  0x79   :  { %v1200_v5 = vsel %vm212_vm7, %v1199_v9, %v1198_v54  ;;  %v1426_v32 = vrot.slane %v1394_v11, 6  ;;  %v1407_v28 = vunpack.c.l.b16 %v5191_v6  ;;  %v1408_v27 = vunpack.c.l.b16 %v5196_v16 }
  0x7a   :  { %3839 = vmatpush3.bf16.msra.mxu0 %v4895_v25  ;;  %v1202_v35 = vpack.c.b16 %v1200_v5, %v1186_v59  ;;  %v1427_v14 = vrot.slane %v1395_v12, 5  ;;  %v1409_v31 = vunpack.c.l.b16 %v5206_v1  ;;  %v1429_v36 = vrot.slane %v1396_v20, 4  ;;  %v5262_v5 = vld [vmem:[%s6722_s0 + $0x90] ss:$0 sps:$4 sm:$0x88]  }
  0x7b   :  { %3952 = vmatprep.subr.msk.bf16.mxu0 %vm280_vm0, %v4908_v33  ;;  %v1431_v39 = vrot.slane %v1397_v18, 3  ;;  %v1433_v40 = vrot.slane %v1398_v22, 2  ;;  %v1435_v42 = vrot.slane %v1399_v53, 1  ;;  %v1438_v45 = vrot.slane %v1401_v0, 7 }
  0x7c   :  { %3833 = vmatmul.mubr.msk.bf16.vlgmr.msra.gmra.mrb[8].mxu1 %vm273_vm8, %v1202_v35  ;;  %v1428_v41 = vsel %vm194_vm1, %v1427_v14, %v1426_v32  ;;  %v1440_v46 = vrot.slane %v1402_v23, 6  ;;  %v1441_v21 = vrot.slane %v1403_v34, 5  ;;  %v1443_v37 = vrot.slane %v1404_v26, 4  ;;  %v5269_v14 = vld [vmem:[%s6722_s0 + $0x98] ss:$0 sps:$4 sm:$0x88]  }
  0x7d   :  { %3847 = vmatpush3.bf16.msra.mxu1 %v4924_v43  ;;  %v1430_v48 = vsel %vm197_vm2, %v1429_v36, %v1428_v41  ;;  %v1445_v49 = vrot.slane %v1405_v17, 3  ;;  %v1447_v51 = vrot.slane %v1406_v30, 2  ;;  %v1449_v55 = vrot.slane %v1407_v28, 1  ;;  %v5278_v36 = vld [vmem:[%s6722_s0 + $0xa0] ss:$0 sps:$4 sm:$0x88]  }
  0x7e   :  { %3841 = vmatpush3.bf16.msra.mxu0 %v4288_v3  ;;  %3848 = vmatprep.subr.bf16.mxu1 %v4895_v25  ;;  %v1432_v52 = vsel %vm200_vm3, %v1431_v39, %v1430_v48  ;;  %v1452_v44 = vrot.slane %v1409_v31, 7  ;;  %v1442_v60 = vsel %vm194_vm1, %v1441_v21, %v1440_v46  ;;  %v1547_v61 = vrot.slane %v1394_v11, 7  ;;  %v5285_v39 = vld [vmem:[%s6722_s0 + $0xa8] ss:$0 sps:$4 sm:$0x88]  }
  0x7f   :  { %3856 = vmatprep.subr.bf16.mxu0 %v4924_v43  ;;  %v1434_v56 = vsel %vm203_vm4, %v1433_v40, %v1432_v52  ;;  %v1548_v57 = vrot.slane %v1395_v12, 6  ;;  %v1444_v63 = vsel %vm197_vm2, %v1443_v37, %v1442_v60  ;;  %v1550_v9 = vrot.slane %v1396_v20, 5  ;;  %v5290_v40 = vld [vmem:[%s6722_s0 + $0xb0] ss:$0 sps:$4 sm:$0x88]  }
  0x80   :  { %v1436_v58 = vsel %vm206_vm5, %v1435_v42, %v1434_v56  ;;  %v1552_v10 = vrot.slane %v1397_v18, 4  ;;  %v1446_v50 = vsel %vm200_vm3, %v1445_v49, %v1444_v63  ;;  %v1554_v59 = vrot.slane %v1398_v22, 3  ;;  %v5245_v18 = vld [vmem:[%s6722_s0 + $0x80] ss:$0 sps:$4 sm:$0x88]  }
  0x81   :  { %3849 = vmatpush3.bf16.msra.mxu1 %v4895_v25  ;;  %v1437_v38 = vsel %vm209_vm6, %v1400_v29, %v1436_v58  ;;  %v1549_v4 = vsel %vm194_vm1, %v1548_v57, %v1547_v61  ;;  %v1448_v62 = vsel %vm203_vm4, %v1447_v51, %v1446_v50  ;;  %v1556_v12 = vrot.slane %v1399_v53, 2  ;;  %v5254_v53 = vld [vmem:[%s6722_s0 + $0x88] ss:$0 sps:$4 sm:$0x88]  }
  0x82   :  { %3953 = vmatprep.subr.msk.bf16.mxu1 %vm280_vm0, %v4908_v33  ;;  %v1439_v8 = vsel %vm212_vm7, %v1438_v45, %v1437_v38  ;;  %v1551_v11 = vsel %vm197_vm2, %v1550_v9, %v1549_v4  ;;  %v1450_v13 = vsel %vm206_vm5, %v1449_v55, %v1448_v62  ;;  %v1558_v15 = vrot.slane %v1400_v29, 1  ;;  %v5299_v41 = vld [vmem:[%s6722_s0 + $0xb8] ss:$0 sps:$4 sm:$0x88]  }
  0x83   :  { %v1553_v2 = vsel %vm200_vm3, %v1552_v10, %v1551_v11  ;;  %v1561_v20 = vrot.slane %v1402_v23, 7  ;;  %v1451_v22 = vsel %vm209_vm6, %v1408_v27, %v1450_v13  ;;  %v1562_v7 = vrot.slane %v1403_v34, 6  ;;  %v5304_v42 = vld [vmem:[%s6722_s0 + $0xc0] ss:$0 sps:$4 sm:$0x88]  }
  0x84   :  { %v1555_v24 = vsel %vm203_vm4, %v1554_v59, %v1553_v2  ;;  %v1564_v19 = vrot.slane %v1404_v26, 5  ;;  %v1453_v29 = vsel %vm212_vm7, %v1452_v44, %v1451_v22  ;;  %v1566_v6 = vrot.slane %v1405_v17, 4  ;;  %v5317_v48 = vld [vmem:[%s6722_s0 + $0xd0] ss:$0 sps:$4 sm:$0x88]  }
  0x85   :  { %3851 = vmatpush3.bf16.msra.mxu1 %v4288_v3  ;;  %v1557_v54 = vsel %vm206_vm5, %v1556_v12, %v1555_v24  ;;  %v1568_v23 = vrot.slane %v1406_v30, 3  ;;  %v1482_v34 = vpack.c.b16 %v1453_v29, %v1439_v8  ;;  %v1563_v32 = vsel %vm194_vm1, %v1562_v7, %v1561_v20  ;;  %v5326_v51 = vld [vmem:[%s6722_s0 + $0xd8] ss:$0 sps:$4 sm:$0x88]  }
  0x86   :  { %v1559_v26 = vsel %vm209_vm6, %v1558_v15, %v1557_v54  ;;  %v1570_v35 = vrot.slane %v1407_v28, 2  ;;  %3866 = vmatprep.subr.bf16.mxu1 %v4924_v43  ;;  %v1565_v17 = vsel %vm197_vm2, %v1564_v19, %v1563_v32  ;;  %v1572_v30 = vrot.slane %v1408_v27, 1  ;;  %v5331_v55 = vld [vmem:[%s6722_s0 + $0xe0] ss:$0 sps:$4 sm:$0x88]  }
  0x87   :  { %3842 = vmatprep.mubr.msk.bf16.mxu0 %vm273_vm8, %v1482_v34  ;;  %v1567_v28 = vsel %vm200_vm3, %v1566_v6, %v1565_v17  ;;  %v1560_v16 = vsel %vm212_vm7, %v1401_v0, %v1559_v26  ;;  %v1410_v45 = vunpack.c.l.b16 %v5245_v18  ;;  %v1411_v46 = vunpack.c.l.b16 %v5254_v53  ;;  %v5312_v0 = vld [vmem:[%s6722_s0 + $0xc8] ss:$0 sps:$4 sm:$0x88]   ;;  %v5347_v58 = vld [vmem:[%s6722_s0 + $0xf0] ss:$0 sps:$4 sm:$0x88]  }
  0x88   :  { %v1569_v27 = vsel %vm203_vm4, %v1568_v23, %v1567_v28  ;;  %v1412_v21 = vunpack.c.l.b16 %v5262_v5  ;;  %v1413_v37 = vunpack.c.l.b16 %v5269_v14  ;;  %v1414_v49 = vunpack.c.l.b16 %v5278_v36  ;;  %v5342_v57 = vld [vmem:[%s6722_s0 + $0xe8] ss:$0 sps:$4 sm:$0x88]   ;;  %v5355_v1 = vld [vmem:[%s6722_s0 + $0xf8] ss:$0 sps:$4 sm:$0x88]  }
  0x89   :  { %v1571_v47 = vsel %vm206_vm5, %v1570_v35, %v1569_v27  ;;  %v1415_v44 = vunpack.c.l.b16 %v5285_v39  ;;  %v1416_v56 = vunpack.c.l.b16 %v5290_v40  ;;  %v1417_v60 = vunpack.c.l.b16 %v5299_v41 }
  0x8a   :  { %v1573_v52 = vsel %vm209_vm6, %v1572_v30, %v1571_v47  ;;  %v1418_v63 = vunpack.c.l.b16 %v5304_v42  ;;  %v1419_v9 = vunpack.c.l.b16 %v5312_v0  ;;  %v1420_v10 = vunpack.c.l.b16 %v5317_v48  ;;  %v5384_v47 = vld [vmem:[%s6722_s0 + $0x4] ss:$0 sps:$4 sm:$0x11]  }
  0x8b   :  { %v1574_v61 = vsel %vm212_vm7, %v1409_v31, %v1573_v52  ;;  %v1421_v31 = vunpack.c.l.b16 %v5326_v51  ;;  %v1422_v50 = vunpack.c.l.b16 %v5331_v55  ;;  %v1454_v4 = vrot.slane %v1410_v45, 6 }
  0x8c   :  { %v1603_v38 = vpack.c.b16 %v1574_v61, %v1560_v16  ;;  %v1423_v59 = vunpack.c.l.b16 %v5342_v57  ;;  %v1424_v8 = vunpack.c.l.b16 %v5347_v58  ;;  %v1455_v62 = vrot.slane %v1411_v46, 5  ;;  %v5398_v61 = vld [vmem:[%s6722_s0 + $0x14] ss:$0 sps:$4 sm:$0x11]  }
  0x8d   :  { %v1457_v11 = vrot.slane %v1412_v21, 4  ;;  %v1425_v12 = vunpack.c.l.b16 %v5355_v1  ;;  %v1459_v13 = vrot.slane %v1413_v37, 3  ;;  %v1461_v2 = vrot.slane %v1414_v49, 2 }
  0x8e   :  { %3852 = vmatprep.mubr.msk.bf16.mxu1 %vm273_vm8, %v1603_v38  ;;  %v1463_v15 = vrot.slane %v1415_v44, 1  ;;  %v1456_v20 = vsel %vm194_vm1, %v1455_v62, %v1454_v4  ;;  %v1466_v18 = vrot.slane %v1417_v60, 7  ;;  %v1468_v22 = vrot.slane %v1418_v63, 6  ;;  %v5404_v38 = vld [vmem:[%s6722_s0 + $0x1c] ss:$0 sps:$4 sm:$0x11]  }
  0x8f   :  { %v1469_v24 = vrot.slane %v1419_v9, 5  ;;  %v1458_v7 = vsel %vm197_vm2, %v1457_v11, %v1456_v20  ;;  %v1471_v19 = vrot.slane %v1420_v10, 4  ;;  %v1473_v53 = vrot.slane %v1421_v31, 3  ;;  %v5411_v11 = vld [vmem:[%s6722_s0 + $0x24] ss:$0 sps:$4 sm:$0x11]  }
  0x90   :  { %v1475_v29 = vrot.slane %v1422_v50, 2  ;;  %v1460_v54 = vsel %vm200_vm3, %v1459_v13, %v1458_v7  ;;  %v1477_v23 = vrot.slane %v1423_v59, 1  ;;  %v1480_v5 = vrot.slane %v1425_v12, 7  ;;  %v5423_v13 = vld [vmem:[%s6722_s0 + $0x34] ss:$0 sps:$4 sm:$0x11]  }
  0x91   :  { %v1470_v6 = vsel %vm194_vm1, %v1469_v24, %v1468_v22  ;;  %v1462_v34 = vsel %vm203_vm4, %v1461_v2, %v1460_v54  ;;  %v1575_v32 = vrot.slane %v1410_v45, 7  ;;  %v1576_v35 = vrot.slane %v1411_v46, 6  ;;  %v5433_v2 = vld [vmem:[%s6722_s0 + $0x3c] ss:$0 sps:$4 sm:$0x11]  }
  0x92   :  { %v1472_v26 = vsel %vm197_vm2, %v1471_v19, %v1470_v6  ;;  %v1464_v14 = vsel %vm206_vm5, %v1463_v15, %v1462_v34  ;;  %v1578_v30 = vrot.slane %v1412_v21, 5  ;;  %v1580_v36 = vrot.slane %v1413_v37, 4  ;;  %v5438_v15 = vld [vmem:[%s6722_s0 + $0x44] ss:$0 sps:$4 sm:$0x11]  }
  0x93   :  { %v1474_v17 = vsel %vm200_vm3, %v1473_v53, %v1472_v26  ;;  %v1465_v28 = vsel %vm209_vm6, %v1416_v56, %v1464_v14  ;;  %v1577_v40 = vsel %vm194_vm1, %v1576_v35, %v1575_v32  ;;  %v1582_v16 = vrot.slane %v1414_v49, 3  ;;  %v5391_v49 = vld [vmem:[%s6722_s0 + $0xc] ss:$0 sps:$4 sm:$0x11]  }
  0x94   :  { %v1476_v39 = vsel %vm203_vm4, %v1475_v29, %v1474_v17  ;;  %v1467_v27 = vsel %vm212_vm7, %v1466_v18, %v1465_v28  ;;  %v1579_v45 = vsel %vm197_vm2, %v1578_v30, %v1577_v40  ;;  %v1584_v46 = vrot.slane %v1415_v44, 2  ;;  %v5447_v18 = vld [vmem:[%s6722_s0 + $0x4c] ss:$0 sps:$4 sm:$0x11]  }
  0x95   :  { %v1478_v42 = vsel %vm206_vm5, %v1477_v23, %v1476_v39  ;;  %v1581_v48 = vsel %vm200_vm3, %v1580_v36, %v1579_v45  ;;  %v1586_v21 = vrot.slane %v1416_v56, 1  ;;  %v1589_v37 = vrot.slane %v1418_v63, 7  ;;  %v5452_v22 = vld [vmem:[%s6722_s0 + $0x54] ss:$0 sps:$4 sm:$0x11]  }
  0x96   :  { %v1479_v0 = vsel %vm209_vm6, %v1424_v8, %v1478_v42  ;;  %v1583_v51 = vsel %vm203_vm4, %v1582_v16, %v1581_v48  ;;  %v1590_v55 = vrot.slane %v1419_v9, 6  ;;  %v1592_v44 = vrot.slane %v1420_v10, 5  ;;  %v5461_v29 = vld [vmem:[%s6722_s0 + $0x5c] ss:$0 sps:$4 sm:$0x11]  }
  0x97   :  { %v1481_v52 = vsel %vm212_vm7, %v1480_v5, %v1479_v0  ;;  %v1585_v56 = vsel %vm206_vm5, %v1584_v46, %v1583_v51  ;;  %v1594_v58 = vrot.slane %v1421_v31, 4  ;;  %v1596_v63 = vrot.slane %v1422_v50, 3  ;;  %v5418_v50 = vld [vmem:[%s6722_s0 + $0x2c] ss:$0 sps:$4 sm:$0x11]  }
  0x98   :  { %v1483_v57 = vpack.c.b16 %v1481_v52, %v1467_v27  ;;  %v1587_v4 = vsel %vm209_vm6, %v1586_v21, %v1585_v56  ;;  %v1591_v9 = vsel %vm194_vm1, %v1590_v55, %v1589_v37  ;;  %v1598_v10 = vrot.slane %v1423_v59, 2  ;;  %v5466_v54 = vld [vmem:[%s6722_s0 + $0x64] ss:$0 sps:$4 sm:$0x11]  }
  0x99   :  { %v1600_v62 = vrot.slane %v1424_v8, 1  ;;  %v1593_v31 = vsel %vm197_vm2, %v1592_v44, %v1591_v9  ;;  %v1588_v59 = vsel %vm212_vm7, %v1417_v60, %v1587_v4  ;;  %v1796_v20 = vunpack.c.l.b16 %v5384_v47  ;;  %v5475_v26 = vld [vmem:[%s6722_s0 + $0x6c] ss:$0 sps:$4 sm:$0x11]  }
  0x9a   :  { %3843 = vmatmul.mubr.msk.bf16.vlgmr.msra.gmra.mrb[12].mxu0 %vm273_vm8, %v1483_v57  ;;  %v1595_v8 = vsel %vm200_vm3, %v1594_v58, %v1593_v31  ;;  %v1797_v41 = vunpack.c.l.b16 %v5391_v49  ;;  %v1798_v24 = vunpack.c.l.b16 %v5398_v61  ;;  %v1799_v7 = vunpack.c.l.b16 %v5404_v38  ;;  %v5480_v32 = vld [vmem:[%s6722_s0 + $0x74] ss:$0 sps:$4 sm:$0x11]   ;;  %v5492_v36 = vld [vmem:[%s6722_s0 + $0x7c] ss:$0 sps:$4 sm:$0x11]  }
  0x9b   :  { %3857 = vmatpush3.bf16.msra.mxu0 %v4924_v43  ;;  %v1597_v60 = vsel %vm203_vm4, %v1596_v63, %v1595_v8  ;;  %v1800_v19 = vunpack.c.l.b16 %v5411_v11  ;;  %v1801_v6 = vunpack.c.l.b16 %v5418_v50  ;;  %v1802_v23 = vunpack.c.l.b16 %v5423_v13 }
  0x9c   :  { %3858 = vmatprep.subr.bf16.mxu0 %v4895_v25  ;;  %v1599_v53 = vsel %vm206_vm5, %v1598_v10, %v1597_v60  ;;  %v1803_v5 = vunpack.c.l.b16 %v5433_v2  ;;  %v1804_v35 = vunpack.c.l.b16 %v5438_v15  ;;  %v1805_v14 = vunpack.c.l.b16 %v5447_v18  ;;  %v5567_v18 = vld [vmem:[%s6721_s1] sm:$0xff]  }
  0x9d   :  { %v1601_v34 = vsel %vm209_vm6, %v1600_v62, %v1599_v53  ;;  %v1806_v17 = vunpack.c.l.b16 %v5452_v22  ;;  %v1807_v28 = vunpack.c.l.b16 %v5461_v29  ;;  %v1808_v39 = vunpack.c.l.b16 %v5466_v54  ;;  %v5544_v53 = vld [vmem:[%s6722_s0 + $0x8c] ss:$0 sps:$4 sm:$0x11]  }
  0x9e   :  { %v1602_v30 = vsel %vm212_vm7, %v1425_v12, %v1601_v34  ;;  %v1828_v40 = vrot.slane %v1797_v41, 7  ;;  %v1809_v1 = vunpack.c.l.b16 %v5475_v26  ;;  %v1810_v12 = vunpack.c.l.b16 %v5480_v32  ;;  %v5588_v32 = vld [vmem:[%s6722_s0 + $0xb4] ss:$0 sps:$4 sm:$0x11]  }
  0x9f   :  { %3859 = vmatpush3.bf16.msra.mxu0 %v4895_v25  ;;  %v1604_v16 = vpack.c.b16 %v1602_v30, %v1588_v59  ;;  %v1830_v27 = vrot.slane %v1798_v24, 6  ;;  %v1811_v42 = vunpack.c.l.b16 %v5492_v36  ;;  %v1832_v46 = vrot.slane %v1799_v7, 5  ;;  %v5562_v30 = vld [vmem:[%s6722_s0 + $0x9c] ss:$0 sps:$4 sm:$0x11]  }
  0xa0   :  { %3954 = vmatprep.subr.msk.bf16.mxu0 %vm280_vm0, %v4908_v33  ;;  %v1829_v45 = vsel %vm194_vm1, %v1828_v40, %v1796_v20  ;;  %v1834_v47 = vrot.slane %v1800_v19, 4  ;;  %v1836_v48 = vrot.slane %v1801_v6, 3  ;;  %v1838_v21 = vrot.slane %v1802_v23, 2  ;;  %v4113_v40 = vld [vmem:[%s6722_s0 + $0xa4] ss:$0 sps:$4 sm:$0x11]  }
  0xa1   :  { %3853 = vmatmul.mubr.msk.bf16.vlgmr.msra.gmra.mrb[12].mxu1 %vm273_vm8, %v1604_v16  ;;  %v1831_v0 = vsel %vm197_vm2, %v1830_v27, %v1829_v45  ;;  %v1840_v37 = vrot.slane %v1803_v5, 1  ;;  %v1842_v51 = vrot.slane %v1805_v14, 7  ;;  %v1844_v55 = vrot.slane %v1806_v17, 6  ;;  %v5595_v27 = vld [vmem:[%s6722_s0 + $0xbc] ss:$0 sps:$4 sm:$0x11]  }
  0xa2   :  { %3867 = vmatpush3.bf16.msra.mxu1 %v4924_v43  ;;  %v1833_v52 = vsel %vm200_vm3, %v1832_v46, %v1831_v0  ;;  %v1846_v44 = vrot.slane %v1807_v28, 5  ;;  %v1848_v57 = vrot.slane %v1808_v39, 4  ;;  %v1850_v56 = vrot.slane %v1809_v1, 3  ;;  %v5608_v0 = vld [vmem:[%s6722_s0 + $0xcc] ss:$0 sps:$4 sm:$0x11]  }
  0xa3   :  { %3861 = vmatpush3.bf16.msra.mxu0 %v4288_v3  ;;  %3868 = vmatprep.subr.bf16.mxu1 %v4895_v25  ;;  %v1835_v61 = vsel %vm203_vm4, %v1834_v47, %v1833_v52  ;;  %v1852_v58 = vrot.slane %v1810_v12, 2  ;;  %v1843_v38 = vsel %vm194_vm1, %v1842_v51, %v1804_v35  ;;  %v1854_v4 = vrot.slane %v1811_v42, 1 }
  0xa4   :  { %3876 = vmatprep.subr.bf16.mxu0 %v4924_v43  ;;  %v1837_v63 = vsel %vm206_vm5, %v1836_v48, %v1835_v61  ;;  %v1949_v9 = vrot.slane %v1796_v20, 1  ;;  %v1845_v62 = vsel %vm197_vm2, %v1844_v55, %v1843_v38  ;;  %v1951_v11 = vrot.slane %v1798_v24, 7  ;;  %v5613_v48 = vld [vmem:[%s6722_s0 + $0xd4] ss:$0 sps:$4 sm:$0x11]  }
  0xa5   :  { %v1839_v10 = vsel %vm209_vm6, %v1838_v21, %v1837_v63  ;;  %v1953_v31 = vrot.slane %v1799_v7, 6  ;;  %v1847_v43 = vsel %vm200_vm3, %v1846_v44, %v1845_v62  ;;  %v1955_v59 = vrot.slane %v1800_v19, 5  ;;  %v5621_v55 = vld [vmem:[%s6722_s0 + $0xdc] ss:$0 sps:$4 sm:$0x11]  }
  0xa6   :  { %3869 = vmatpush3.bf16.msra.mxu1 %v4895_v25  ;;  %v1841_v50 = vsel %vm212_vm7, %v1840_v37, %v1839_v10  ;;  %v1950_v13 = vsel %vm194_vm1, %v1797_v41, %v1949_v9  ;;  %v1849_v8 = vsel %vm203_vm4, %v1848_v57, %v1847_v43  ;;  %v1957_v15 = vrot.slane %v1801_v6, 4  ;;  %v4121_v44 = vld [vmem:[%s6722_s0 + $0xe4] ss:$0 sps:$4 sm:$0x11]  }
  0xa7   :  { %3955 = vmatprep.subr.msk.bf16.mxu1 %vm280_vm0, %v4908_v33  ;;  %v1952_v2 = vsel %vm197_vm2, %v1951_v11, %v1950_v13  ;;  %v1959_v20 = vrot.slane %v1802_v23, 3  ;;  %v1851_v25 = vsel %vm206_vm5, %v1850_v56, %v1849_v8  ;;  %v1961_v22 = vrot.slane %v1803_v5, 2  ;;  %v5539_v33 = vld [vmem:[%s6722_s0 + $0x84] ss:$0 sps:$4 sm:$0x11]  }
  0xa8   :  { %v1954_v60 = vsel %vm200_vm3, %v1953_v31, %v1952_v2  ;;  %v1963_v24 = vrot.slane %v1804_v35, 1  ;;  %v1853_v49 = vsel %vm209_vm6, %v1852_v58, %v1851_v25  ;;  %v1965_v7 = vrot.slane %v1806_v17, 7  ;;  %v5555_v5 = vld [vmem:[%s6722_s0 + $0x94] ss:$0 sps:$4 sm:$0x11]  }
  0xa9   :  { %v1956_v41 = vsel %vm203_vm4, %v1955_v59, %v1954_v60  ;;  %v1967_v19 = vrot.slane %v1807_v28, 6  ;;  %v1855_v29 = vsel %vm212_vm7, %v1854_v4, %v1853_v49  ;;  %v1969_v23 = vrot.slane %v1808_v39, 5  ;;  %v5632_v63 = vld [vmem:[%s6722_s0 + $0xec] ss:$0 sps:$4 sm:$0x11]  }
  0xaa   :  { %3871 = vmatpush3.bf16.msra.mxu1 %v4288_v3  ;;  %v1958_v54 = vsel %vm206_vm5, %v1957_v15, %v1956_v41  ;;  %v1964_v6 = vsel %vm194_vm1, %v1805_v14, %v1963_v24  ;;  %v1884_v34 = vpack.c.b16 %v1855_v29, %v1841_v50  ;;  %v1971_v17 = vrot.slane %v1809_v1, 4  ;;  %v5583_v1 = vld [vmem:[%s6722_s0 + $0xac] ss:$0 sps:$4 sm:$0x11]  }
  0xab   :  { %v1960_v26 = vsel %vm209_vm6, %v1959_v20, %v1958_v54  ;;  %v1966_v35 = vsel %vm197_vm2, %v1965_v7, %v1964_v6  ;;  %3886 = vmatprep.subr.bf16.mxu1 %v5567_v18  ;;  %v1973_v28 = vrot.slane %v1810_v12, 3  ;;  %v1975_v39 = vrot.slane %v1811_v42, 2  ;;  %v5600_v42 = vld [vmem:[%s6722_s0 + $0xc4] ss:$0 sps:$4 sm:$0x11]  }
  0xac   :  { %v1968_v14 = vsel %vm200_vm3, %v1967_v19, %v1966_v35  ;;  %3862 = vmatprep.mubr.msk.bf16.mxu0 %vm273_vm8, %v1884_v34  ;;  %v1962_v36 = vsel %vm212_vm7, %v1961_v22, %v1960_v26  ;;  %v1813_v45 = vunpack.c.l.b16 %v5544_v53  ;;  %v1814_v46 = vunpack.c.l.b16 %v5555_v5  ;;  %v5637_v38 = vld [vmem:[%s6722_s0 + $0xf4] ss:$0 sps:$4 sm:$0x11]   ;;  %v4124_v62 = vld [vmem:[%s6722_s0 + $0xfc] ss:$0 sps:$4 sm:$0x11]  }
  0xad   :  { %v1970_v16 = vsel %vm203_vm4, %v1969_v23, %v1968_v14  ;;  %v1812_v21 = vunpack.c.l.b16 %v5539_v33  ;;  %v1815_v37 = vunpack.c.l.b16 %v5562_v30  ;;  %v1816_v52 = vunpack.c.l.b16 %v4113_v40 }
  0xae   :  { %v1972_v12 = vsel %vm206_vm5, %v1971_v17, %v1970_v16  ;;  %v1817_v61 = vunpack.c.l.b16 %v5583_v1  ;;  %v1818_v57 = vunpack.c.l.b16 %v5588_v32  ;;  %v1819_v56 = vunpack.c.l.b16 %v5595_v27 }
  0xaf   :  { %v1974_v47 = vsel %vm209_vm6, %v1973_v28, %v1972_v12  ;;  %v1820_v4 = vunpack.c.l.b16 %v5600_v42  ;;  %v1821_v9 = vunpack.c.l.b16 %v5608_v0  ;;  %v1822_v10 = vunpack.c.l.b16 %v5613_v48  ;;  %v5666_v42 = vld [vmem:[%s6722_s0 + $0x4] ss:$0 sps:$4 sm:$0x22]  }
  0xb0   :  { %v1976_v51 = vsel %vm212_vm7, %v1975_v39, %v1974_v47  ;;  %v1823_v11 = vunpack.c.l.b16 %v5621_v55  ;;  %v1824_v31 = vunpack.c.l.b16 %v4121_v44  ;;  %v1856_v50 = vrot.slane %v1813_v45, 7  ;;  %v5685_v44 = vld [vmem:[%s6722_s0 + $0x1c] ss:$0 sps:$4 sm:$0x22]  }
  0xb1   :  { %v2005_v58 = vpack.c.b16 %v1976_v51, %v1962_v36  ;;  %v1858_v43 = vrot.slane %v1814_v46, 6  ;;  %v1825_v13 = vunpack.c.l.b16 %v5632_v63  ;;  %v1826_v59 = vunpack.c.l.b16 %v5637_v38  ;;  %v5692_v63 = vld [vmem:[%s6722_s0 + $0x24] ss:$0 sps:$4 sm:$0x22]  }
  0xb2   :  { %v1860_v8 = vrot.slane %v1815_v37, 5  ;;  %v1862_v2 = vrot.slane %v1816_v52, 4  ;;  %v1827_v15 = vunpack.c.l.b16 %v4124_v62  ;;  %v1857_v20 = vsel %vm194_vm1, %v1856_v50, %v1812_v21  ;;  %v5707_v50 = vld [vmem:[%s6722_s0 + $0x34] ss:$0 sps:$4 sm:$0x22]  }
  0xb3   :  { %3872 = vmatprep.mubr.msk.bf16.mxu1 %vm273_vm8, %v2005_v58  ;;  %v1864_v25 = vrot.slane %v1817_v61, 3  ;;  %v1866_v60 = vrot.slane %v1818_v57, 2  ;;  %v1859_v22 = vsel %vm197_vm2, %v1858_v43, %v1857_v20  ;;  %v1868_v24 = vrot.slane %v1819_v56, 1  ;;  %v5712_v43 = vld [vmem:[%s6722_s0 + $0x3c] ss:$0 sps:$4 sm:$0x22]  }
  0xb4   :  { %v1870_v49 = vrot.slane %v1821_v9, 7  ;;  %v1872_v41 = vrot.slane %v1822_v10, 6  ;;  %v1861_v7 = vsel %vm200_vm3, %v1860_v8, %v1859_v22  ;;  %v1874_v19 = vrot.slane %v1823_v11, 5  ;;  %v5724_v8 = vld [vmem:[%s6722_s0 + $0x4c] ss:$0 sps:$4 sm:$0x22]  }
  0xb5   :  { %v1876_v33 = vrot.slane %v1824_v31, 4  ;;  %v1878_v53 = vrot.slane %v1825_v13, 3  ;;  %v1863_v29 = vsel %vm203_vm4, %v1862_v2, %v1861_v7  ;;  %v1880_v6 = vrot.slane %v1826_v59, 2  ;;  %v5739_v22 = vld [vmem:[%s6722_s0 + $0x54] ss:$0 sps:$4 sm:$0x22]  }
  0xb6   :  { %v1871_v54 = vsel %vm194_vm1, %v1870_v49, %v1820_v4  ;;  %v1882_v23 = vrot.slane %v1827_v15, 1  ;;  %v1865_v5 = vsel %vm206_vm5, %v1864_v25, %v1863_v29  ;;  %v1977_v26 = vrot.slane %v1812_v21, 1  ;;  %v5678_v21 = vld [vmem:[%s6722_s0 + $0x14] ss:$0 sps:$4 sm:$0x22]  }
  0xb7   :  { %v1873_v34 = vsel %vm197_vm2, %v1872_v41, %v1871_v54  ;;  %v1979_v35 = vrot.slane %v1814_v46, 7  ;;  %v1867_v17 = vsel %vm209_vm6, %v1866_v60, %v1865_v5  ;;  %v1981_v14 = vrot.slane %v1815_v37, 6  ;;  %v5671_v46 = vld [vmem:[%s6722_s0 + $0xc] ss:$0 sps:$4 sm:$0x22]  }
  0xb8   :  { %v1875_v30 = vsel %vm200_vm3, %v1874_v19, %v1873_v34  ;;  %v1983_v28 = vrot.slane %v1816_v52, 5  ;;  %v1869_v39 = vsel %vm212_vm7, %v1868_v24, %v1867_v17  ;;  %v1978_v16 = vsel %vm194_vm1, %v1813_v45, %v1977_v26  ;;  %v5733_v60 = vld [vmem:[%s6721_s1 + $0x8] sm:$0xff]   ;;  %v5744_v24 = vld [vmem:[%s6722_s0 + $0x5c] ss:$0 sps:$4 sm:$0x22]  }
  0xb9   :  { %v1877_v40 = vsel %vm203_vm4, %v1876_v33, %v1875_v30  ;;  %v1985_v1 = vrot.slane %v1817_v61, 4  ;;  %v1980_v36 = vsel %vm197_vm2, %v1979_v35, %v1978_v16  ;;  %v1987_v12 = vrot.slane %v1818_v57, 3  ;;  %v5753_v33 = vld [vmem:[%s6722_s0 + $0x64] ss:$0 sps:$4 sm:$0x22]  }
  0xba   :  { %v1879_v32 = vsel %vm206_vm5, %v1878_v53, %v1877_v40  ;;  %v1989_v27 = vrot.slane %v1819_v56, 2  ;;  %v1982_v45 = vsel %vm200_vm3, %v1981_v14, %v1980_v36  ;;  %v1991_v0 = vrot.slane %v1820_v4, 1  ;;  %v5758_v53 = vld [vmem:[%s6722_s0 + $0x6c] ss:$0 sps:$4 sm:$0x22]  }
  0xbb   :  { %v1881_v47 = vsel %vm209_vm6, %v1880_v6, %v1879_v32  ;;  %v1993_v48 = vrot.slane %v1822_v10, 7  ;;  %v1984_v52 = vsel %vm203_vm4, %v1983_v28, %v1982_v45  ;;  %v1995_v51 = vrot.slane %v1823_v11, 6  ;;  %v5699_v11 = vld [vmem:[%s6722_s0 + $0x2c] ss:$0 sps:$4 sm:$0x22]  }
  0xbc   :  { %v1883_v37 = vsel %vm212_vm7, %v1882_v23, %v1881_v47  ;;  %v1997_v55 = vrot.slane %v1824_v31, 5  ;;  %v1986_v57 = vsel %vm206_vm5, %v1985_v1, %v1984_v52  ;;  %v1992_v56 = vsel %vm194_vm1, %v1821_v9, %v1991_v0  ;;  %v5767_v5 = vld [vmem:[%s6722_s0 + $0x74] ss:$0 sps:$4 sm:$0x22]  }
  0xbd   :  { %v1885_v61 = vpack.c.b16 %v1883_v37, %v1869_v39  ;;  %v1999_v58 = vrot.slane %v1825_v13, 4  ;;  %v1988_v38 = vsel %vm209_vm6, %v1987_v12, %v1986_v57  ;;  %v1994_v4 = vsel %vm197_vm2, %v1993_v48, %v1992_v56  ;;  %v5772_v34 = vld [vmem:[%s6722_s0 + $0x7c] ss:$0 sps:$4 sm:$0x22]  }
  0xbe   :  { %v2001_v10 = vrot.slane %v1826_v59, 3  ;;  %v2003_v62 = vrot.slane %v1827_v15, 2  ;;  %v1990_v9 = vsel %vm212_vm7, %v1989_v27, %v1988_v38  ;;  %v1996_v31 = vsel %vm200_vm3, %v1995_v51, %v1994_v4  ;;  %v5719_v59 = vld [vmem:[%s6722_s0 + $0x44] ss:$0 sps:$4 sm:$0x22]  }
  0xbf   :  { %3863 = vmatmul.mubr.msk.bf16.vlgmr.msra.gmra.mrb[16].mxu0 %vm273_vm8, %v1885_v61  ;;  %v1998_v13 = vsel %vm203_vm4, %v1997_v55, %v1996_v31  ;;  %v2198_v2 = vunpack.c.l.b16 %v5666_v42  ;;  %v2199_v15 = vunpack.c.l.b16 %v5671_v46  ;;  %v2200_v20 = vunpack.c.l.b16 %v5678_v21  ;;  %v5783_v40 = vld [vmem:[%s6721_s1 + $0x10] ss:$0 sps:$4 sm:$0x33]  }
  0xc0   :  { %3877 = vmatpush3.bf16.msra.mxu0 %v5567_v18  ;;  %v2000_v25 = vsel %vm206_vm5, %v1999_v58, %v1998_v13  ;;  %v2201_v49 = vunpack.c.l.b16 %v5685_v44  ;;  %v2202_v41 = vunpack.c.l.b16 %v5692_v63  ;;  %v2203_v7 = vunpack.c.l.b16 %v5699_v11  ;;  %v5841_v44 = vld [vmem:[%s6722_s0 + $0x94] ss:$0 sps:$4 sm:$0x22]  }
  0xc1   :  { %3878 = vmatprep.subr.bf16.mxu0 %v5733_v60  ;;  %v2002_v19 = vsel %vm209_vm6, %v2001_v10, %v2000_v25  ;;  %v2204_v29 = vunpack.c.l.b16 %v5707_v50  ;;  %v2205_v54 = vunpack.c.l.b16 %v5712_v43  ;;  %v2206_v6 = vunpack.c.l.b16 %v5719_v59 }
  0xc2   :  { %v2004_v23 = vsel %vm212_vm7, %v2003_v62, %v2002_v19  ;;  %v2207_v26 = vunpack.c.l.b16 %v5724_v8  ;;  %v2208_v35 = vunpack.c.l.b16 %v5739_v22  ;;  %v2209_v17 = vunpack.c.l.b16 %v5744_v24  ;;  %v5833_v19 = vld [vmem:[%s6722_s0 + $0x8c] ss:$0 sps:$4 sm:$0x22]   ;;  %v5881_v24 = vld [vmem:[%s6722_s0 + $0xbc] ss:$0 sps:$4 sm:$0x22]  }
  0xc3   :  { %v2006_v30 = vpack.c.b16 %v2004_v23, %v1990_v9  ;;  %v2210_v14 = vunpack.c.l.b16 %v5753_v33  ;;  %v2211_v28 = vunpack.c.l.b16 %v5758_v53  ;;  %v2230_v39 = vrot.slane %v2198_v2, 2  ;;  %v4145_v53 = vld [vmem:[%s6722_s0 + $0xa4] ss:$0 sps:$4 sm:$0x22]  }
  0xc4   :  { %3879 = vmatpush3.bf16.msra.mxu0 %v5733_v60  ;;  %v2212_v16 = vunpack.c.l.b16 %v5767_v5  ;;  %v2213_v1 = vunpack.c.l.b16 %v5772_v34  ;;  %v2231_v32 = vrot.slane %v2199_v15, 1  ;;  %v2234_v36 = vrot.slane %v2201_v49, 7  ;;  %v5874_v5 = vld [vmem:[%s6722_s0 + $0xb4] ss:$0 sps:$4 sm:$0x22]  }
  0xc5   :  { %3956 = vmatprep.subr.msk.bf16.mxu0 %vm280_vm0, %v5783_v40  ;;  %3873 = vmatmul.mubr.msk.bf16.vlgmr.msra.gmra.mrb[16].mxu1 %vm273_vm8, %v2006_v30  ;;  %v2236_v12 = vrot.slane %v2202_v41, 6  ;;  %v2238_v27 = vrot.slane %v2203_v7, 5  ;;  %v2240_v42 = vrot.slane %v2204_v29, 4  ;;  %v2242_v46 = vrot.slane %v2205_v54, 3 }
  0xc6   :  { %3887 = vmatpush3.bf16.msra.mxu1 %v5567_v18  ;;  %v2232_v47 = vsel %vm194_vm1, %v2231_v32, %v2230_v39  ;;  %v2244_v45 = vrot.slane %v2206_v6, 2  ;;  %v2245_v0 = vrot.slane %v2207_v26, 1  ;;  %v2248_v48 = vrot.slane %v2209_v17, 7  ;;  %v5850_v39 = vld [vmem:[%s6722_s0 + $0x9c] ss:$0 sps:$4 sm:$0x22]  }
  0xc7   :  { %3888 = vmatprep.subr.bf16.mxu1 %v5733_v60  ;;  %v2233_v21 = vsel %vm197_vm2, %v2200_v20, %v2232_v47  ;;  %v2250_v37 = vrot.slane %v2210_v14, 6  ;;  %v2252_v52 = vrot.slane %v2211_v28, 5  ;;  %v2254_v51 = vrot.slane %v2212_v16, 4  ;;  %v5899_v47 = vld [vmem:[%s6722_s0 + $0xd4] ss:$0 sps:$4 sm:$0x22]  }
  0xc8   :  { %3881 = vmatpush3.bf16.msra.mxu0 %v4288_v3  ;;  %v2235_v55 = vsel %vm200_vm3, %v2234_v36, %v2233_v21  ;;  %v2246_v61 = vsel %vm194_vm1, %v2245_v0, %v2244_v45  ;;  %v2256_v57 = vrot.slane %v2213_v1, 3  ;;  %v2351_v56 = vrot.slane %v2198_v2, 3 }
  0xc9   :  { %3896 = vmatprep.subr.bf16.mxu0 %v5567_v18  ;;  %v2237_v58 = vsel %vm203_vm4, %v2236_v12, %v2235_v55  ;;  %v2247_v63 = vsel %vm197_vm2, %v2208_v35, %v2246_v61  ;;  %v2352_v38 = vrot.slane %v2199_v15, 2  ;;  %v2354_v4 = vrot.slane %v2200_v20, 1  ;;  %v5824_v20 = vld [vmem:[%s6722_s0 + $0x84] ss:$0 sps:$4 sm:$0x22]  }
  0xca   :  { %3889 = vmatpush3.bf16.msra.mxu1 %v5733_v60  ;;  %v2239_v10 = vsel %vm206_vm5, %v2238_v27, %v2237_v58  ;;  %v2249_v62 = vsel %vm200_vm3, %v2248_v48, %v2247_v63  ;;  %v2357_v11 = vrot.slane %v2202_v41, 7  ;;  %v2359_v9 = vrot.slane %v2203_v7, 6  ;;  %v5869_v12 = vld [vmem:[%s6722_s0 + $0xac] ss:$0 sps:$4 sm:$0x22]  }
  0xcb   :  { %3957 = vmatprep.subr.msk.bf16.mxu1 %vm280_vm0, %v5783_v40  ;;  %v2241_v31 = vsel %vm209_vm6, %v2240_v42, %v2239_v10  ;;  %v2251_v50 = vsel %vm203_vm4, %v2250_v37, %v2249_v62  ;;  %v2353_v43 = vsel %vm194_vm1, %v2352_v38, %v2351_v56  ;;  %v2361_v13 = vrot.slane %v2204_v29, 5  ;;  %v5907_v37 = vld [vmem:[%s6722_s0 + $0xdc] ss:$0 sps:$4 sm:$0x22]  }
  0xcc   :  { %v2243_v59 = vsel %vm212_vm7, %v2242_v46, %v2241_v31  ;;  %v2253_v8 = vsel %vm206_vm5, %v2252_v52, %v2251_v50  ;;  %v2355_v2 = vsel %vm197_vm2, %v2354_v4, %v2353_v43  ;;  %v2363_v15 = vrot.slane %v2205_v54, 4  ;;  %v5894_v46 = vld [vmem:[%s6722_s0 + $0xcc] ss:$0 sps:$4 sm:$0x22]  }
  0xcd   :  { %v2255_v25 = vsel %vm209_vm6, %v2254_v51, %v2253_v8  ;;  %v2356_v22 = vsel %vm200_vm3, %v2201_v49, %v2355_v2  ;;  %v2365_v41 = vrot.slane %v2206_v6, 3  ;;  %v2366_v7 = vrot.slane %v2207_v26, 2  ;;  %v5912_v52 = vld [vmem:[%s6722_s0 + $0xe4] ss:$0 sps:$4 sm:$0x22]  }
  0xce   :  { %3891 = vmatpush3.bf16.msra.mxu1 %v4288_v3  ;;  %v2257_v33 = vsel %vm212_vm7, %v2256_v57, %v2255_v25  ;;  %v2358_v29 = vsel %vm203_vm4, %v2357_v11, %v2356_v22  ;;  %v2368_v54 = vrot.slane %v2208_v35, 1  ;;  %v2371_v23 = vrot.slane %v2210_v14, 7  ;;  %v4154_v56 = vld [vmem:[%s6722_s0 + $0xec] ss:$0 sps:$4 sm:$0x22]  }
  0xcf   :  { %v2286_v49 = vpack.c.b16 %v2257_v33, %v2243_v59  ;;  %v2360_v6 = vsel %vm206_vm5, %v2359_v9, %v2358_v29  ;;  %v2367_v26 = vsel %vm194_vm1, %v2366_v7, %v2365_v41  ;;  %v2373_v30 = vrot.slane %v2211_v28, 6  ;;  %3906 = vmatprep.subr.bf16.mxu1 %v5567_v18  ;;  %v5924_v58 = vld [vmem:[%s6722_s0 + $0xf4] ss:$0 sps:$4 sm:$0x22]  }
  0xd0   :  { %v2362_v35 = vsel %vm209_vm6, %v2361_v13, %v2360_v6  ;;  %v2369_v14 = vsel %vm197_vm2, %v2368_v54, %v2367_v26  ;;  %v2375_v32 = vrot.slane %v2212_v16, 5  ;;  %v2377_v36 = vrot.slane %v2213_v1, 4  ;;  %v4156_v62 = vld [vmem:[%s6722_s0 + $0xfc] ss:$0 sps:$4 sm:$0x22]  }
  0xd1   :  { %3882 = vmatprep.mubr.msk.bf16.mxu0 %vm273_vm8, %v2286_v49  ;;  %v2370_v28 = vsel %vm200_vm3, %v2209_v17, %v2369_v14  ;;  %v2364_v34 = vsel %vm212_vm7, %v2363_v15, %v2362_v35  ;;  %v5886_v17 = vld [vmem:[%s6722_s0 + $0xc4] ss:$0 sps:$4 sm:$0x22]   ;;  %v2214_v1 = vunpack.c.l.b16 %v5824_v20  ;;  %v2215_v27 = vunpack.c.l.b16 %v5833_v19 }
  0xd2   :  { %v2372_v16 = vsel %vm203_vm4, %v2371_v23, %v2370_v28  ;;  %v2216_v45 = vunpack.c.l.b16 %v5841_v44  ;;  %v2217_v0 = vunpack.c.l.b16 %v5850_v39  ;;  %v2218_v48 = vunpack.c.l.b16 %v4145_v53 }
  0xd3   :  { %v2374_v42 = vsel %vm206_vm5, %v2373_v30, %v2372_v16  ;;  %v2219_v51 = vunpack.c.l.b16 %v5869_v12  ;;  %v2220_v55 = vunpack.c.l.b16 %v5874_v5  ;;  %v2221_v61 = vunpack.c.l.b16 %v5881_v24 }
  0xd4   :  { %v2376_v21 = vsel %vm209_vm6, %v2375_v32, %v2374_v42  ;;  %v2222_v63 = vunpack.c.l.b16 %v5886_v17  ;;  %v2223_v38 = vunpack.c.l.b16 %v5894_v46  ;;  %v2224_v4 = vunpack.c.l.b16 %v5899_v47 }
  0xd5   :  { %v2378_v57 = vsel %vm212_vm7, %v2377_v36, %v2376_v21  ;;  %v2225_v11 = vunpack.c.l.b16 %v5907_v37  ;;  %v2226_v9 = vunpack.c.l.b16 %v5912_v52  ;;  %v2258_v31 = vrot.slane %v2214_v1, 2 }
  0xd6   :  { %v2407_v10 = vpack.c.b16 %v2378_v57, %v2364_v34  ;;  %v2227_v50 = vunpack.c.l.b16 %v4154_v56  ;;  %v2228_v43 = vunpack.c.l.b16 %v5924_v58  ;;  %v2259_v13 = vrot.slane %v2215_v27, 1  ;;  %v5969_v57 = vld [vmem:[%s6722_s0 + $0x14] ss:$0 sps:$4 sm:$0x44]  }
  0xd7   :  { %v2262_v59 = vrot.slane %v2217_v0, 7  ;;  %v2229_v8 = vunpack.c.l.b16 %v4156_v62  ;;  %v2264_v2 = vrot.slane %v2218_v48, 6  ;;  %v2266_v15 = vrot.slane %v2219_v51, 5 }
  0xd8   :  { %3892 = vmatprep.mubr.msk.bf16.mxu1 %vm273_vm8, %v2407_v10  ;;  %v2268_v20 = vrot.slane %v2220_v55, 4  ;;  %v2260_v25 = vsel %vm194_vm1, %v2259_v13, %v2258_v31  ;;  %v2270_v22 = vrot.slane %v2221_v61, 3  ;;  %v2272_v41 = vrot.slane %v2222_v63, 2  ;;  %v5982_v31 = vld [vmem:[%s6722_s0 + $0x24] ss:$0 sps:$4 sm:$0x44]  }
  0xd9   :  { %v2273_v7 = vrot.slane %v2223_v38, 1  ;;  %v2261_v19 = vsel %vm197_vm2, %v2216_v45, %v2260_v25  ;;  %v2276_v33 = vrot.slane %v2225_v11, 7  ;;  %v2278_v29 = vrot.slane %v2226_v9, 6  ;;  %v5994_v13 = vld [vmem:[%s6722_s0 + $0x34] ss:$0 sps:$4 sm:$0x44]  }
  0xda   :  { %v2280_v54 = vrot.slane %v2227_v50, 5  ;;  %v2263_v23 = vsel %vm200_vm3, %v2262_v59, %v2261_v19  ;;  %v2282_v49 = vrot.slane %v2228_v43, 4  ;;  %v2284_v6 = vrot.slane %v2229_v8, 3  ;;  %v6023_v25 = vld [vmem:[%s6722_s0 + $0x54] ss:$0 sps:$4 sm:$0x44]  }
  0xdb   :  { %v2274_v44 = vsel %vm194_vm1, %v2273_v7, %v2272_v41  ;;  %v2265_v26 = vsel %vm203_vm4, %v2264_v2, %v2263_v23  ;;  %v2379_v39 = vrot.slane %v2214_v1, 3  ;;  %v2380_v35 = vrot.slane %v2215_v27, 2  ;;  %v5955_v27 = vld [vmem:[%s6722_s0 + $0x4] ss:$0 sps:$4 sm:$0x44]  }
  0xdc   :  { %v2275_v30 = vsel %vm197_vm2, %v2224_v4, %v2274_v44  ;;  %v2267_v14 = vsel %vm206_vm5, %v2266_v15, %v2265_v26  ;;  %v2382_v36 = vrot.slane %v2216_v45, 1  ;;  %v2385_v53 = vrot.slane %v2218_v48, 7  ;;  %v5962_v48 = vld [vmem:[%s6722_s0 + $0xc] ss:$0 sps:$4 sm:$0x44]  }
  0xdd   :  { %v2277_v32 = vsel %vm200_vm3, %v2276_v33, %v2275_v30  ;;  %v2269_v28 = vsel %vm209_vm6, %v2268_v20, %v2267_v14  ;;  %v2381_v5 = vsel %vm194_vm1, %v2380_v35, %v2379_v39  ;;  %v2387_v34 = vrot.slane %v2219_v51, 6  ;;  %v6009_v2 = vld [vmem:[%s6722_s0 + $0x44] ss:$0 sps:$4 sm:$0x44]  }
  0xde   :  { %v2279_v12 = vsel %vm203_vm4, %v2278_v29, %v2277_v32  ;;  %v2271_v16 = vsel %vm212_vm7, %v2270_v22, %v2269_v28  ;;  %v2383_v17 = vsel %vm197_vm2, %v2382_v36, %v2381_v5  ;;  %v2389_v1 = vrot.slane %v2220_v55, 5  ;;  %v6032_v33 = vld [vmem:[%s6722_s0 + $0x5c] ss:$0 sps:$4 sm:$0x44]  }
  0xdf   :  { %v2281_v24 = vsel %vm206_vm5, %v2280_v54, %v2279_v12  ;;  %v2384_v46 = vsel %vm200_vm3, %v2217_v0, %v2383_v17  ;;  %v2391_v47 = vrot.slane %v2221_v61, 4  ;;  %v2393_v45 = vrot.slane %v2222_v63, 3  ;;  %v5975_v63 = vld [vmem:[%s6722_s0 + $0x1c] ss:$0 sps:$4 sm:$0x44]  }
  0xe0   :  { %v2283_v42 = vsel %vm209_vm6, %v2282_v49, %v2281_v24  ;;  %v2386_v52 = vsel %vm203_vm4, %v2385_v53, %v2384_v46  ;;  %v2394_v51 = vrot.slane %v2223_v38, 2  ;;  %v2396_v55 = vrot.slane %v2224_v4, 1  ;;  %v6037_v29 = vld [vmem:[%s6722_s0 + $0x64] ss:$0 sps:$4 sm:$0x44]  }
  0xe1   :  { %v2285_v21 = vsel %vm212_vm7, %v2284_v6, %v2283_v42  ;;  %v2388_v0 = vsel %vm206_vm5, %v2387_v34, %v2386_v52  ;;  %v2399_v61 = vrot.slane %v2226_v9, 7  ;;  %v2401_v58 = vrot.slane %v2227_v50, 6  ;;  %v5989_v50 = vld [vmem:[%s6722_s0 + $0x2c] ss:$0 sps:$4 sm:$0x44]  }
  0xe2   :  { %v2287_v56 = vpack.c.b16 %v2285_v21, %v2271_v16  ;;  %v2390_v10 = vsel %vm209_vm6, %v2389_v1, %v2388_v0  ;;  %v2395_v38 = vsel %vm194_vm1, %v2394_v51, %v2393_v45  ;;  %v2403_v4 = vrot.slane %v2228_v43, 5  ;;  %v6046_v6 = vld [vmem:[%s6722_s0 + $0x6c] ss:$0 sps:$4 sm:$0x44]  }
  0xe3   :  { %v2405_v62 = vrot.slane %v2229_v8, 4  ;;  %v2397_v9 = vsel %vm197_vm2, %v2396_v55, %v2395_v38  ;;  %v2392_v43 = vsel %vm212_vm7, %v2391_v47, %v2390_v10  ;;  %v6004_v8 = vld [vmem:[%s6722_s0 + $0x3c] ss:$0 sps:$4 sm:$0x44]   ;;  %v2600_v15 = vunpack.c.l.b16 %v5955_v27 }
  0xe4   :  { %3883 = vmatmul.mubr.msk.bf16.vlgmr.msra.gmra.mrb[20].mxu0 %vm273_vm8, %v2287_v56  ;;  %v2398_v59 = vsel %vm200_vm3, %v2225_v11, %v2397_v9  ;;  %v2601_v20 = vunpack.c.l.b16 %v5962_v48  ;;  %v6018_v11 = vld [vmem:[%s6722_s0 + $0x4c] ss:$0 sps:$4 sm:$0x44]   ;;  %v2602_v22 = vunpack.c.l.b16 %v5969_v57  ;;  %v2603_v41 = vunpack.c.l.b16 %v5975_v63  ;;  %v6051_v26 = vld [vmem:[%s6722_s0 + $0x74] ss:$0 sps:$4 sm:$0x44]  }
  0xe5   :  { %3897 = vmatpush3.bf16.msra.mxu0 %v5567_v18  ;;  %v2400_v37 = vsel %vm203_vm4, %v2399_v61, %v2398_v59  ;;  %v2604_v7 = vunpack.c.l.b16 %v5982_v31  ;;  %v2605_v54 = vunpack.c.l.b16 %v5989_v50  ;;  %v2606_v23 = vunpack.c.l.b16 %v5994_v13  ;;  %v6061_v32 = vld [vmem:[%s6722_s0 + $0x7c] ss:$0 sps:$4 sm:$0x44]  }
  0xe6   :  { %3898 = vmatprep.subr.bf16.mxu0 %v5733_v60  ;;  %v2402_v19 = vsel %vm206_vm5, %v2401_v58, %v2400_v37  ;;  %v2607_v44 = vunpack.c.l.b16 %v6004_v8  ;;  %v2608_v30 = vunpack.c.l.b16 %v6009_v2  ;;  %v2609_v39 = vunpack.c.l.b16 %v6018_v11 }
  0xe7   :  { %v2404_v49 = vsel %vm209_vm6, %v2403_v4, %v2402_v19  ;;  %v2610_v35 = vunpack.c.l.b16 %v6023_v25  ;;  %v2611_v36 = vunpack.c.l.b16 %v6032_v33  ;;  %v2612_v53 = vunpack.c.l.b16 %v6037_v29 }
  0xe8   :  { %v2406_v14 = vsel %vm212_vm7, %v2405_v62, %v2404_v49  ;;  %v2632_v28 = vrot.slane %v2600_v15, 4  ;;  %v2613_v5 = vunpack.c.l.b16 %v6046_v6  ;;  %v2614_v34 = vunpack.c.l.b16 %v6051_v26 }
  0xe9   :  { %3899 = vmatpush3.bf16.msra.mxu0 %v5733_v60  ;;  %v2408_v12 = vpack.c.b16 %v2406_v14, %v2392_v43  ;;  %v2633_v16 = vrot.slane %v2601_v20, 3  ;;  %v2615_v24 = vunpack.c.l.b16 %v6061_v32  ;;  %v2635_v17 = vrot.slane %v2602_v22, 2 }
  0xea   :  { %3958 = vmatprep.subr.msk.bf16.mxu0 %vm280_vm0, %v5783_v40  ;;  %v2637_v1 = vrot.slane %v2603_v41, 1  ;;  %v2640_v27 = vrot.slane %v2605_v54, 7  ;;  %v2642_v46 = vrot.slane %v2606_v23, 6  ;;  %v2644_v47 = vrot.slane %v2607_v44, 5 }
  0xeb   :  { %3893 = vmatmul.mubr.msk.bf16.vlgmr.msra.gmra.mrb[20].mxu1 %vm273_vm8, %v2408_v12  ;;  %v2634_v42 = vsel %vm194_vm1, %v2633_v16, %v2632_v28  ;;  %v2646_v45 = vrot.slane %v2608_v30, 4  ;;  %v2647_v21 = vrot.slane %v2609_v39, 3  ;;  %v2649_v52 = vrot.slane %v2610_v35, 2  ;;  %v6126_v16 = vld [vmem:[%s6722_s0 + $0x9c] ss:$0 sps:$4 sm:$0x44]  }
  0xec   :  { %3907 = vmatpush3.bf16.msra.mxu1 %v5567_v18  ;;  %v2636_v48 = vsel %vm197_vm2, %v2635_v17, %v2634_v42  ;;  %v2651_v51 = vrot.slane %v2611_v36, 1  ;;  %v2654_v57 = vrot.slane %v2613_v5, 7  ;;  %v2656_v56 = vrot.slane %v2614_v34, 6  ;;  %v6154_v17 = vld [vmem:[%s6722_s0 + $0xbc] ss:$0 sps:$4 sm:$0x44]  }
  0xed   :  { %3901 = vmatpush3.bf16.msra.mxu0 %v4288_v3  ;;  %3908 = vmatprep.subr.bf16.mxu1 %v5733_v60  ;;  %v2638_v55 = vsel %vm200_vm3, %v2637_v1, %v2636_v48  ;;  %v2658_v0 = vrot.slane %v2615_v24, 5  ;;  %v2648_v58 = vsel %vm194_vm1, %v2647_v21, %v2646_v45  ;;  %v2753_v63 = vrot.slane %v2600_v15, 5  ;;  %v6159_v1 = vld [vmem:[%s6722_s0 + $0xc4] ss:$0 sps:$4 sm:$0x44]  }
  0xee   :  { %3916 = vmatprep.subr.bf16.mxu0 %v5567_v18  ;;  %v2639_v61 = vsel %vm203_vm4, %v2604_v7, %v2638_v55  ;;  %v2754_v10 = vrot.slane %v2601_v20, 4  ;;  %v2650_v4 = vsel %vm197_vm2, %v2649_v52, %v2648_v58  ;;  %v2756_v62 = vrot.slane %v2602_v22, 3  ;;  %v6174_v45 = vld [vmem:[%s6722_s0 + $0xd4] ss:$0 sps:$4 sm:$0x44]  }
  0xef   :  { %v2641_v38 = vsel %vm206_vm5, %v2640_v27, %v2639_v61  ;;  %v2758_v31 = vrot.slane %v2603_v41, 2  ;;  %v2652_v13 = vsel %vm200_vm3, %v2651_v51, %v2650_v4  ;;  %v2760_v59 = vrot.slane %v2604_v7, 1  ;;  %v6102_v41 = vld [vmem:[%s6722_s0 + $0x84] ss:$0 sps:$4 sm:$0x44]  }
  0xf0   :  { %3909 = vmatpush3.bf16.msra.mxu1 %v5733_v60  ;;  %v2643_v9 = vsel %vm209_vm6, %v2642_v46, %v2641_v38  ;;  %v2755_v43 = vsel %vm194_vm1, %v2754_v10, %v2753_v63  ;;  %v2653_v2 = vsel %vm203_vm4, %v2612_v53, %v2652_v13  ;;  %v2763_v20 = vrot.slane %v2606_v23, 7  ;;  %v6109_v23 = vld [vmem:[%s6722_s0 + $0x8c] ss:$0 sps:$4 sm:$0x44]  }
  0xf1   :  { %3959 = vmatprep.subr.msk.bf16.mxu1 %vm280_vm0, %v5783_v40  ;;  %v2645_v8 = vsel %vm212_vm7, %v2644_v47, %v2643_v9  ;;  %v2757_v15 = vsel %vm197_vm2, %v2756_v62, %v2755_v43  ;;  %v2655_v37 = vsel %vm206_vm5, %v2654_v57, %v2653_v2  ;;  %v2765_v25 = vrot.slane %v2607_v44, 6  ;;  %v6169_v47 = vld [vmem:[%s6722_s0 + $0xcc] ss:$0 sps:$4 sm:$0x44]  }
  0xf2   :  { %v2759_v11 = vsel %vm200_vm3, %v2758_v31, %v2757_v15  ;;  %v2767_v22 = vrot.slane %v2608_v30, 5  ;;  %v2657_v7 = vsel %vm209_vm6, %v2656_v56, %v2655_v37  ;;  %v2768_v33 = vrot.slane %v2609_v39, 4  ;;  %v6119_v39 = vld [vmem:[%s6722_s0 + $0x94] ss:$0 sps:$4 sm:$0x44]  }
  0xf3   :  { %v2761_v19 = vsel %vm203_vm4, %v2760_v59, %v2759_v11  ;;  %v2770_v29 = vrot.slane %v2610_v35, 3  ;;  %v2659_v44 = vsel %vm212_vm7, %v2658_v0, %v2657_v7  ;;  %v2772_v26 = vrot.slane %v2611_v36, 2  ;;  %v6135_v36 = vld [vmem:[%s6722_s0 + $0xa4] ss:$0 sps:$4 sm:$0x44]  }
  0xf4   :  { %3911 = vmatpush3.bf16.msra.mxu1 %v4288_v3  ;;  %v2762_v49 = vsel %vm206_vm5, %v2605_v54, %v2761_v19  ;;  %v2774_v30 = vrot.slane %v2612_v53, 1  ;;  %v2688_v35 = vpack.c.b16 %v2659_v44, %v2645_v8  ;;  %v2769_v28 = vsel %vm194_vm1, %v2768_v33, %v2767_v22  ;;  %v6188_v51 = vld [vmem:[%s6722_s0 + $0xe4] ss:$0 sps:$4 sm:$0x44]  }
  0xf5   :  { %v2764_v14 = vsel %vm209_vm6, %v2763_v20, %v2762_v49  ;;  %v2777_v12 = vrot.slane %v2614_v34, 7  ;;  %3926 = vmatprep.subr.bf16.mxu1 %v5567_v18  ;;  %v2771_v50 = vsel %vm197_vm2, %v2770_v29, %v2769_v28  ;;  %v2779_v54 = vrot.slane %v2615_v24, 6  ;;  %v6142_v34 = vld [vmem:[%s6722_s0 + $0xac] ss:$0 sps:$4 sm:$0x44]  }
  0xf6   :  { %3902 = vmatprep.mubr.msk.bf16.mxu0 %vm273_vm8, %v2688_v35  ;;  %v2773_v53 = vsel %vm200_vm3, %v2772_v26, %v2771_v50  ;;  %v6147_v18 = vld [vmem:[%s6722_s0 + $0xb4] ss:$0 sps:$4 sm:$0x44]   ;;  %v2766_v32 = vsel %vm212_vm7, %v2765_v25, %v2764_v14  ;;  %v2616_v27 = vunpack.c.l.b16 %v6102_v41  ;;  %v2617_v42 = vunpack.c.l.b16 %v6109_v23  ;;  %v6197_v61 = vld [vmem:[%s6722_s0 + $0xec] ss:$0 sps:$4 sm:$0x44]  }
  0xf7   :  { %v2775_v24 = vsel %vm203_vm4, %v2774_v30, %v2773_v53  ;;  %v2618_v48 = vunpack.c.l.b16 %v6119_v39  ;;  %v2619_v21 = vunpack.c.l.b16 %v6126_v16  ;;  %v2620_v52 = vunpack.c.l.b16 %v6135_v36  ;;  %v6202_v58 = vld [vmem:[%s6722_s0 + $0xf4] ss:$0 sps:$4 sm:$0x44]   ;;  %v6210_v62 = vld [vmem:[%s6722_s0 + $0xfc] ss:$0 sps:$4 sm:$0x44]  }
  0xf8   :  { %v2776_v46 = vsel %vm206_vm5, %v2613_v5, %v2775_v24  ;;  %v6183_v5 = vld [vmem:[%s6722_s0 + $0xdc] ss:$0 sps:$4 sm:$0x44]   ;;  %v2621_v55 = vunpack.c.l.b16 %v6142_v34  ;;  %v2622_v57 = vunpack.c.l.b16 %v6147_v18  ;;  %v2623_v56 = vunpack.c.l.b16 %v6154_v17  ;;  %v6282_v34 = vld [vmem:[%s6722_s0 + $0x24] ss:$0 sps:$4 sm:$0x88]  }
  0xf9   :  { %v2778_v6 = vsel %vm209_vm6, %v2777_v12, %v2776_v46  ;;  %v2624_v63 = vunpack.c.l.b16 %v6159_v1  ;;  %v2625_v10 = vunpack.c.l.b16 %v6169_v47  ;;  %v2626_v38 = vunpack.c.l.b16 %v6174_v45 }
  0xfa   :  { %v2780_v0 = vsel %vm212_vm7, %v2779_v54, %v2778_v6  ;;  %v2627_v31 = vunpack.c.l.b16 %v6183_v5  ;;  %v2628_v9 = vunpack.c.l.b16 %v6188_v51  ;;  %v2660_v13 = vrot.slane %v2616_v27, 4  ;;  %v6254_v51 = vld [vmem:[%s6722_s0 + $0xc] ss:$0 sps:$4 sm:$0x88]  }
  0xfb   :  { %v2809_v4 = vpack.c.b16 %v2780_v0, %v2766_v32  ;;  %v2629_v43 = vunpack.c.l.b16 %v6197_v61  ;;  %v2630_v59 = vunpack.c.l.b16 %v6202_v58  ;;  %v2661_v8 = vrot.slane %v2617_v42, 3 }
  0xfc   :  { %v2663_v2 = vrot.slane %v2618_v48, 2  ;;  %v2631_v15 = vunpack.c.l.b16 %v6210_v62  ;;  %v2665_v20 = vrot.slane %v2619_v21, 1  ;;  %v2668_v37 = vrot.slane %v2621_v55, 7 }
  0xfd   :  { %3912 = vmatprep.mubr.msk.bf16.mxu1 %vm273_vm8, %v2809_v4  ;;  %v2670_v11 = vrot.slane %v2622_v57, 6  ;;  %v6220_v25 = vpop.f32.mrb[0].mxu0  ;;  %v2662_v22 = vsel %vm194_vm1, %v2661_v8, %v2660_v13  ;;  %v2672_v41 = vrot.slane %v2623_v56, 5  ;;  %v2674_v7 = vrot.slane %v2624_v63, 4 }
  0xfe   :  { %v2675_v19 = vrot.slane %v2625_v10, 3  ;;  %v2664_v29 = vsel %vm197_vm2, %v2663_v2, %v2662_v22  ;;  %v2677_v23 = vrot.slane %v2626_v38, 2  ;;  %v2679_v44 = vrot.slane %v2627_v31, 1  ;;  %v6228_v26 = vpop.f32.mrb[1].mxu0 }
  0xff   :  { %v2682_v49 = vrot.slane %v2629_v43, 7  ;;  %v2666_v30 = vsel %vm200_vm3, %v2665_v20, %v2664_v29  ;;  %v2684_v35 = vrot.slane %v2630_v59, 6  ;;  %v2686_v14 = vrot.slane %v2631_v15, 5  ;;  %v6256_v0 = vpop.f32.mrb[2].mxu0 }
 0x100   :  { %v2676_v39 = vsel %vm194_vm1, %v2675_v19, %v2674_v7  ;;  %v2667_v28 = vsel %vm203_vm4, %v2620_v52, %v2666_v30  ;;  %v2781_v16 = vrot.slane %v2616_v27, 5  ;;  %v2782_v50 = vrot.slane %v2617_v42, 4  ;;  %v6263_v13 = vld [vmem:[%s6722_s0 + $0x14] ss:$0 sps:$4 sm:$0x88]   ;;  %v4227_v19 = vld [vmem:[%s6721_s1] sm:$0xff]  }
 0x101   :  { %v2678_v12 = vsel %vm197_vm2, %v2677_v23, %v2676_v39  ;;  %v2669_v54 = vsel %vm206_vm5, %v2668_v37, %v2667_v28  ;;  %v2784_v53 = vrot.slane %v2618_v48, 3  ;;  %v2786_v18 = vrot.slane %v2619_v21, 2  ;;  %v6247_v48 = vld [vmem:[%s6722_s0 + $0x4] ss:$0 sps:$4 sm:$0x88]  }
 0x102   :  { %v2680_v36 = vsel %vm200_vm3, %v2679_v44, %v2678_v12  ;;  %v2671_v32 = vsel %vm209_vm6, %v2670_v11, %v2669_v54  ;;  %v2783_v17 = vsel %vm194_vm1, %v2782_v50, %v2781_v16  ;;  %v2788_v1 = vrot.slane %v2620_v52, 1  ;;  %v6273_v37 = vld [vmem:[%s6722_s0 + $0x1c] ss:$0 sps:$4 sm:$0x88]  }
 0x103   :  { %v2681_v24 = vsel %vm203_vm4, %v2628_v9, %v2680_v36  ;;  %v2673_v47 = vsel %vm212_vm7, %v2672_v41, %v2671_v32  ;;  %v2785_v42 = vsel %vm197_vm2, %v2784_v53, %v2783_v17  ;;  %v2791_v45 = vrot.slane %v2622_v57, 7  ;;  %v6306_v29 = vld [vmem:[%s6722_s0 + $0x3c] ss:$0 sps:$4 sm:$0x88]  }
 0x104   :  { %v2683_v27 = vsel %vm206_vm5, %v2682_v49, %v2681_v24  ;;  %v2787_v6 = vsel %vm200_vm3, %v2786_v18, %v2785_v42  ;;  %v2793_v5 = vrot.slane %v2623_v56, 6  ;;  %v2795_v52 = vrot.slane %v2624_v63, 5  ;;  %v6311_v23 = vld [vmem:[%s6722_s0 + $0x44] ss:$0 sps:$4 sm:$0x88]  }
 0x105   :  { %v6223_v33 = vpop.f32.mrb[0].mxu1  ;;  %v2685_v21 = vsel %vm209_vm6, %v2684_v35, %v2683_v27  ;;  %v2789_v58 = vsel %vm203_vm4, %v2788_v1, %v2787_v6  ;;  %v2796_v4 = vrot.slane %v2625_v10, 4  ;;  %v2798_v62 = vrot.slane %v2626_v38, 3  ;;  %v6275_v10 = vpop.f32.mrb[3].mxu0 }
 0x106   :  { %v6239_v46 = vpop.f32.mrb[1].mxu1  ;;  %v2687_v57 = vsel %vm212_vm7, %v2686_v14, %v2685_v21  ;;  %v2790_v8 = vsel %vm206_vm5, %v2621_v55, %v2789_v58  ;;  %v2800_v2 = vrot.slane %v2627_v31, 2  ;;  %v2802_v20 = vrot.slane %v2628_v9, 1  ;;  %v6291_v9 = vld [vmem:[%s6722_s0 + $0x2c] ss:$0 sps:$4 sm:$0x88]  }
 0x107   :  { %v6265_v56 = vpop.f32.mrb[2].mxu1  ;;  %v2689_v63 = vpack.c.b16 %v2687_v57, %v2673_v47  ;;  %v2792_v38 = vsel %vm209_vm6, %v2791_v45, %v2790_v8  ;;  %v2797_v11 = vsel %vm194_vm1, %v2796_v4, %v2795_v52  ;;  %v2805_v22 = vrot.slane %v2630_v59, 7  ;;  %v6296_v59 = vld [vmem:[%s6722_s0 + $0x34] ss:$0 sps:$4 sm:$0x88]  }
 0x108   :  { %v2807_v41 = vrot.slane %v2631_v15, 6  ;;  %v6284_v55 = vpop.f32.mrb[3].mxu1  ;;  %v2799_v31 = vsel %vm197_vm2, %v2798_v62, %v2797_v11  ;;  %v2794_v15 = vsel %vm212_vm7, %v2793_v5, %v2792_v38  ;;  %v3002_v44 = vunpack.c.l.b16 %v6247_v48  ;;  %v6320_v39 = vld [vmem:[%s6722_s0 + $0x4c] ss:$0 sps:$4 sm:$0x88]  }
 0x109   :  { %3903 = vmatmul.mubr.msk.bf16.vlgmr.msra.gmra.mrb[24].mxu0 %vm273_vm8, %v2689_v63  ;;  %v2801_v7 = vsel %vm200_vm3, %v2800_v2, %v2799_v31  ;;  %v3003_v49 = vunpack.c.l.b16 %v6254_v51  ;;  %v6325_v35 = vld [vmem:[%s6722_s0 + $0x54] ss:$0 sps:$4 sm:$0x88]   ;;  %v3004_v14 = vunpack.c.l.b16 %v6263_v13  ;;  %v3005_v28 = vunpack.c.l.b16 %v6273_v37  ;;  %v6336_v50 = vld [vmem:[%s6722_s0 + $0x5c] ss:$0 sps:$4 sm:$0x88]  }
 0x10a   :  { %3917 = vmatpush3.bf16.msra.mxu0 %v4227_v19  ;;  %v2803_v30 = vsel %vm203_vm4, %v2802_v20, %v2801_v7  ;;  %v3006_v12 = vunpack.c.l.b16 %v6282_v34  ;;  %v6341_v54 = vld [vmem:[%s6722_s0 + $0x64] ss:$0 sps:$4 sm:$0x88]   ;;  %v3007_v36 = vunpack.c.l.b16 %v6291_v9  ;;  %v3008_v53 = vunpack.c.l.b16 %v6296_v59  ;;  %v6355_v32 = vld [vmem:[%s6722_s0 + $0x74] ss:$0 sps:$4 sm:$0x88]  }
 0x10b   :  { %3918 = vmatprep.subr.bf16.mxu0 %v5733_v60  ;;  %v2804_v16 = vsel %vm206_vm5, %v2629_v43, %v2803_v30  ;;  %v3009_v18 = vunpack.c.l.b16 %v6306_v29  ;;  %v6350_v43 = vld [vmem:[%s6722_s0 + $0x6c] ss:$0 sps:$4 sm:$0x88]   ;;  %v3010_v24 = vunpack.c.l.b16 %v6311_v23  ;;  %v3011_v17 = vunpack.c.l.b16 %v6320_v39  ;;  %v6365_v27 = vld [vmem:[%s6722_s0 + $0x7c] ss:$0 sps:$4 sm:$0x88]  }
 0x10c   :  { %v2806_v61 = vsel %vm209_vm6, %v2805_v22, %v2804_v16  ;;  %v3012_v1 = vunpack.c.l.b16 %v6325_v35  ;;  %v3013_v42 = vunpack.c.l.b16 %v6336_v50  ;;  %v3014_v45 = vunpack.c.l.b16 %v6341_v54  ;;  %v4228_v30 = vld [vmem:[%s6721_s1 + $0x8] sm:$0xff]  }
 0x10d   :  { %v2808_v47 = vsel %vm212_vm7, %v2807_v41, %v2806_v61  ;;  %v3034_v48 = vrot.slane %v3002_v44, 6  ;;  %v3015_v6 = vunpack.c.l.b16 %v6350_v43  ;;  %v3016_v5 = vunpack.c.l.b16 %v6355_v32  ;;  %v6465_v32 = vld [vmem:[%s6722_s0 + $0xb4] ss:$0 sps:$4 sm:$0x88]  }
 0x10e   :  { %3919 = vmatpush3.bf16.msra.mxu0 %v5733_v60  ;;  %v2810_v21 = vpack.c.b16 %v2808_v47, %v2794_v15  ;;  %v3035_v52 = vrot.slane %v3003_v49, 5  ;;  %v3017_v51 = vunpack.c.l.b16 %v6365_v27  ;;  %v3037_v57 = vrot.slane %v3004_v14, 4 }
 0x10f   :  { %3960 = vmatprep.subr.msk.bf16.mxu0 %vm280_vm0, %v5783_v40  ;;  %v3039_v58 = vrot.slane %v3005_v28, 3  ;;  %v3041_v4 = vrot.slane %v3006_v12, 2  ;;  %v3043_v13 = vrot.slane %v3007_v36, 1  ;;  %v3046_v63 = vrot.slane %v3009_v18, 7 }
 0x110   :  { %3913 = vmatmul.mubr.msk.bf16.vlgmr.msra.gmra.mrb[24].mxu1 %vm273_vm8, %v2810_v21  ;;  %v3036_v62 = vsel %vm194_vm1, %v3035_v52, %v3034_v48  ;;  %v3048_v8 = vrot.slane %v3010_v24, 6  ;;  %v3049_v20 = vrot.slane %v3011_v17, 5  ;;  %v3051_v37 = vrot.slane %v3012_v1, 4 }
 0x111   :  { %3927 = vmatpush3.bf16.msra.mxu1 %v4227_v19  ;;  %v3038_v2 = vsel %vm197_vm2, %v3037_v57, %v3036_v62  ;;  %v3053_v38 = vrot.slane %v3013_v42, 3  ;;  %v3055_v22 = vrot.slane %v3014_v45, 2  ;;  %v3057_v41 = vrot.slane %v3015_v6, 1  ;;  %v6423_v62 = vld [vmem:[%s6722_s0 + $0x94] ss:$0 sps:$4 sm:$0x88]  }
 0x112   :  { %3921 = vmatpush3.bf16.msra.mxu0 %v4288_v3  ;;  %3928 = vmatprep.subr.bf16.mxu1 %v5733_v60  ;;  %v3040_v11 = vsel %vm200_vm3, %v3039_v58, %v3038_v2  ;;  %v3060_v34 = vrot.slane %v3017_v51, 7  ;;  %v3050_v9 = vsel %vm194_vm1, %v3049_v20, %v3048_v8  ;;  %v3155_v59 = vrot.slane %v3002_v44, 7 }
 0x113   :  { %v3042_v31 = vsel %vm203_vm4, %v3041_v4, %v3040_v11  ;;  %v3156_v15 = vrot.slane %v3003_v49, 6  ;;  %v3052_v19 = vsel %vm197_vm2, %v3051_v37, %v3050_v9  ;;  %v3158_v60 = vrot.slane %v3004_v14, 5 }
 0x114   :  { %v3044_v7 = vsel %vm206_vm5, %v3043_v13, %v3042_v31  ;;  %v3160_v23 = vrot.slane %v3005_v28, 4  ;;  %v3054_v35 = vsel %vm200_vm3, %v3053_v38, %v3052_v19  ;;  %v3162_v50 = vrot.slane %v3006_v12, 3  ;;  %v6406_v12 = vld [vmem:[%s6722_s0 + $0x84] ss:$0 sps:$4 sm:$0x88]  }
 0x115   :  { %3929 = vmatpush3.bf16.msra.mxu1 %v4228_v30  ;;  %v3045_v39 = vsel %vm209_vm6, %v3008_v53, %v3044_v7  ;;  %v3157_v16 = vsel %vm194_vm1, %v3156_v15, %v3155_v59  ;;  %v3056_v49 = vsel %vm203_vm4, %v3055_v22, %v3054_v35  ;;  %v3164_v28 = vrot.slane %v3007_v36, 2  ;;  %v6415_v36 = vld [vmem:[%s6722_s0 + $0x8c] ss:$0 sps:$4 sm:$0x88]  }
 0x116   :  { %3961 = vmatprep.subr.msk.bf16.mxu1 %vm280_vm0, %v5783_v40  ;;  %v3047_v44 = vsel %vm212_vm7, %v3046_v63, %v3045_v39  ;;  %v3159_v14 = vsel %vm197_vm2, %v3158_v60, %v3157_v16  ;;  %v3058_v54 = vsel %vm206_vm5, %v3057_v41, %v3056_v49  ;;  %v3166_v47 = vrot.slane %v3008_v53, 1  ;;  %v6474_v41 = vld [vmem:[%s6722_s0 + $0xbc] ss:$0 sps:$4 sm:$0x88]  }
 0x117   :  { %v3161_v61 = vsel %vm200_vm3, %v3160_v23, %v3159_v14  ;;  %v3169_v48 = vrot.slane %v3010_v24, 7  ;;  %v3059_v40 = vsel %vm209_vm6, %v3016_v5, %v3058_v54  ;;  %v3170_v52 = vrot.slane %v3011_v17, 6  ;;  %v6494_v7 = vld [vmem:[%s6722_s0 + $0xcc] ss:$0 sps:$4 sm:$0x88]  }
 0x118   :  { %v3163_v21 = vsel %vm203_vm4, %v3162_v50, %v3161_v61  ;;  %v3172_v57 = vrot.slane %v3012_v1, 5  ;;  %v3061_v53 = vsel %vm212_vm7, %v3060_v34, %v3059_v40  ;;  %v3174_v58 = vrot.slane %v3013_v42, 4  ;;  %v6434_v42 = vld [vmem:[%s6722_s0 + $0x9c] ss:$0 sps:$4 sm:$0x88]  }
 0x119   :  { %3931 = vmatpush3.bf16.msra.mxu1 %v4288_v3  ;;  %v3165_v24 = vsel %vm206_vm5, %v3164_v28, %v3163_v21  ;;  %v3176_v4 = vrot.slane %v3014_v45, 3  ;;  %v3090_v1 = vpack.c.b16 %v3061_v53, %v3047_v44  ;;  %v3171_v63 = vsel %vm194_vm1, %v3170_v52, %v3169_v48  ;;  %v6439_v45 = vld [vmem:[%s6723_s2] ss:$0 sm:$0xff]  ;;  %v6479_v34 = vld [vmem:[%s6722_s0 + $0xc4] ss:$0 sps:$4 sm:$0x88]  }
 0x11a   :  { %v3167_v13 = vsel %vm209_vm6, %v3166_v47, %v3165_v24  ;;  %v3178_v3 = vrot.slane %v3015_v6, 2  ;;  %v3173_v2 = vsel %vm197_vm2, %v3172_v57, %v3171_v63  ;;  %v3180_v43 = vrot.slane %v3016_v5, 1  ;;  %v6450_v6 = vld [vmem:[%s6722_s0 + $0xa4] ss:$0 sps:$4 sm:$0x88]  }
 0x11b   :  { %v3168_v8 = vsel %vm212_vm7, %v3009_v18, %v3167_v13  ;;  %v3018_v20 = vunpack.c.l.b16 %v6406_v12  ;;  %3922 = vmatprep.mubr.msk.bf16.mxu0 %vm273_vm8, %v3090_v1  ;;  %v3175_v29 = vsel %vm200_vm3, %v3174_v58, %v3173_v2  ;;  %v6460_v18 = vld [vmem:[%s6722_s0 + $0xac] ss:$0 sps:$4 sm:$0x88]   ;;  %v3019_v5 = vunpack.c.l.b16 %v6415_v36  ;;  %v6499_v19 = vld [vmem:[%s6722_s0 + $0xd4] ss:$0 sps:$4 sm:$0x88]  }
 0x11c   :  { %v3020_v38 = vunpack.c.l.b16 %v6423_v62  ;;  %v3021_v11 = vunpack.c.l.b16 %v6434_v42  ;;  %v3177_v22 = vsel %vm203_vm4, %v3176_v4, %v3175_v29  ;;  %v3022_v31 = vunpack.c.l.b16 %v6450_v6  ;;  %v6511_v30 = vld [vmem:[%s6722_s0 + $0xdc] ss:$0 sps:$4 sm:$0x88]   ;;  %v6516_v39 = vld [vmem:[%s6722_s0 + $0xe4] ss:$0 sps:$4 sm:$0x88]  }
 0x11d   :  { %v6484_v9 = vadd.f32 %v6220_v25, %v6439_v45  ;;  %v6488_v59 = vadd.f32 %v6223_v33, %v6439_v45  ;;  %v3179_v15 = vsel %vm206_vm5, %v3178_v3, %v3177_v22  ;;  %v3023_v60 = vunpack.c.l.b16 %v6460_v18  ;;  %v6530_v44 = vld [vmem:[%s6722_s0 + $0xec] ss:$0 sps:$4 sm:$0x88]   ;;  %v6535_v49 = vld [vmem:[%s6722_s0 + $0xf4] ss:$0 sps:$4 sm:$0x88]  }
 0x11e   :  { %v3024_v25 = vunpack.c.l.b16 %v6465_v32  ;;  %v6505_v33 = vadd.f32 %v6439_v45, %v6228_v26  ;;  %v3181_v23 = vsel %vm209_vm6, %v3180_v43, %v3179_v15  ;;  %v3025_v35 = vunpack.c.l.b16 %v6474_v41 }
 0x11f   :  { %v3026_v16 = vunpack.c.l.b16 %v6479_v34  ;;  %v6522_v26 = vadd.f32 %v6439_v45, %v6239_v46  ;;  %v3182_v50 = vsel %vm212_vm7, %v3017_v51, %v3181_v23  ;;  %v3027_v14 = vunpack.c.l.b16 %v6494_v7  ;;  %v6546_v51 = vld [vmem:[%s6722_s0 + $0xfc] ss:$0 sps:$4 sm:$0x88]  }
 0x120   :  { %v3028_v28 = vunpack.c.l.b16 %v6499_v19  ;;  %v6541_v46 = vadd.f32 %v6256_v0, %v6439_v45  ;;  %v3211_v27 = vpack.c.b16 %v3182_v50, %v3168_v8  ;;  %v3029_v54 = vunpack.c.l.b16 %v6511_v30 }
 0x121   :  { %v3030_v61 = vunpack.c.l.b16 %v6516_v39  ;;  %v3062_v47 = vrot.slane %v3018_v20, 6  ;;  %v3031_v0 = vunpack.c.l.b16 %v6530_v44  ;;  %v3032_v21 = vunpack.c.l.b16 %v6535_v49 }
 0x122   :  { %v3063_v52 = vrot.slane %v3019_v5, 5  ;;  %v3065_v57 = vrot.slane %v3020_v38, 4  ;;  %3932 = vmatprep.mubr.msk.bf16.mxu1 %vm273_vm8, %v3211_v27  ;;  %v3033_v24 = vunpack.c.l.b16 %v6546_v51  ;;  %v3067_v58 = vrot.slane %v3021_v11, 3 }
 0x123   :  { %v6425_v17 = vpop.f32.mrb[4].mxu0  ;;  %v3069_v4 = vrot.slane %v3022_v31, 2  ;;  %v3071_v1 = vrot.slane %v3023_v60, 1  ;;  %v3074_v3 = vrot.slane %v3025_v35, 7  ;;  %v3076_v8 = vrot.slane %v3026_v16, 6 }
 0x124   :  { %v6453_v37 = vpop.f32.mrb[5].mxu0  ;;  %v3064_v63 = vsel %vm194_vm1, %v3063_v52, %v3062_v47  ;;  %v3077_v2 = vrot.slane %v3027_v14, 5  ;;  %v3079_v22 = vrot.slane %v3028_v28, 4  ;;  %v3081_v34 = vrot.slane %v3029_v54, 3 }
 0x125   :  { %v6554_v40 = vpop.f32.mrb[6].mxu0  ;;  %v3066_v29 = vsel %vm197_vm2, %v3065_v57, %v3064_v63  ;;  %v3083_v15 = vrot.slane %v3030_v61, 2  ;;  %v3085_v23 = vrot.slane %v3031_v0, 1  ;;  %v3088_v30 = vrot.slane %v3033_v24, 7 }
 0x126   :  { %v6562_v53 = vpop.f32.mrb[7].mxu0  ;;  %v3068_v7 = vsel %vm200_vm3, %v3067_v58, %v3066_v29  ;;  %v3078_v19 = vsel %vm194_vm1, %v3077_v2, %v3076_v8  ;;  %v3183_v44 = vrot.slane %v3018_v20, 7  ;;  %v3184_v49 = vrot.slane %v3019_v5, 6 }
 0x127   :  { %v3070_v39 = vsel %vm203_vm4, %v3069_v4, %v3068_v7  ;;  %v3080_v50 = vsel %vm197_vm2, %v3079_v22, %v3078_v19  ;;  %v3186_v52 = vrot.slane %v3020_v38, 5  ;;  %v3188_v57 = vrot.slane %v3021_v11, 4 }
 0x128   :  { %v3072_v27 = vsel %vm206_vm5, %v3071_v1, %v3070_v39  ;;  %v3082_v47 = vsel %vm200_vm3, %v3081_v34, %v3080_v50  ;;  %v3185_v12 = vsel %vm194_vm1, %v3184_v49, %v3183_v44  ;;  %v3190_v20 = vrot.slane %v3022_v31, 3 }
 0x129   :  { %v3073_v58 = vsel %vm209_vm6, %v3024_v25, %v3072_v27  ;;  %v3084_v4 = vsel %vm203_vm4, %v3083_v15, %v3082_v47  ;;  %v3187_v62 = vsel %vm197_vm2, %v3186_v52, %v3185_v12  ;;  %v3192_v42 = vrot.slane %v3023_v60, 2 }
 0x12a   :  { %v6552_v48 = vpop.f32.mrb[4].mxu1  ;;  %v3075_v5 = vsel %vm212_vm7, %v3074_v3, %v3073_v58  ;;  %v3086_v1 = vsel %vm206_vm5, %v3085_v23, %v3084_v4  ;;  %v3189_v11 = vsel %vm200_vm3, %v3188_v57, %v3187_v62  ;;  %v3194_v63 = vrot.slane %v3024_v25, 1 }
 0x12b   :  { %v6560_v36 = vpop.f32.mrb[5].mxu1  ;;  %v3087_v38 = vsel %vm209_vm6, %v3032_v21, %v3086_v1  ;;  %v3197_v8 = vrot.slane %v3026_v16, 7  ;;  %v3191_v31 = vsel %vm203_vm4, %v3190_v20, %v3189_v11  ;;  %v3198_v3 = vrot.slane %v3027_v14, 6 }
 0x12c   :  { %v6572_v13 = vpop.f32.mrb[6].mxu1  ;;  %v3089_v6 = vsel %vm212_vm7, %v3088_v30, %v3087_v38  ;;  %v3200_v2 = vrot.slane %v3028_v28, 5  ;;  %v3193_v22 = vsel %vm206_vm5, %v3192_v42, %v3191_v31  ;;  %v3202_v34 = vrot.slane %v3029_v54, 4 }
 0x12d   :  { %v6577_v43 = vpop.f32.mrb[7].mxu1  ;;  %v3091_v29 = vpack.c.b16 %v3089_v6, %v3075_v5  ;;  %v3204_v18 = vrot.slane %v3030_v61, 3  ;;  %v3195_v60 = vsel %vm209_vm6, %v3194_v63, %v3193_v22  ;;  %v3199_v15 = vsel %vm194_vm1, %v3198_v3, %v3197_v8 }
 0x12e   :  { %v3206_v7 = vrot.slane %v3031_v0, 2  ;;  %v3208_v19 = vrot.slane %v3032_v21, 1  ;;  %v3196_v32 = vsel %vm212_vm7, %v3025_v35, %v3195_v60  ;;  %v3201_v25 = vsel %vm197_vm2, %v3200_v2, %v3199_v15 }
 0x12f   :  { %3923 = vmatmul.mubr.msk.bf16.vlgmr.msra.gmra.mrb[28].mxu0 %vm273_vm8, %v3091_v29  ;;  %v335_v16 = vmax.f32 %v6484_v9, 0.0  ;;  %v456_v14 = vmax.f32 %v6488_v59, 0.0  ;;  %v3203_v28 = vsel %vm200_vm3, %v3202_v34, %v3201_v25  ;;  %v333_v54 = vmax.f32 %v6505_v33, 0.0 }
 0x130   :  { %v454_v61 = vmax.f32 %v6522_v26, 0.0  ;;  %v336_v0 = vmax.f32 %v6541_v46, 0.0  ;;  %v3205_v21 = vsel %vm203_vm4, %v3204_v18, %v3203_v28  ;;  %v451_v41 = vadd.f32 %v6265_v56, %v6439_v45 }
 0x131   :  { %v460_v23 = vadd.f32 %v456_v14, %v335_v16  ;;  %v322_v35 = vadd.f32 %v6439_v45, %v6275_v10  ;;  %v3207_v9 = vsel %vm206_vm5, %v3206_v7, %v3205_v21  ;;  %v443_v30 = vadd.f32 %v6439_v45, %v6284_v55 }
 0x132   :  { %v458_v59 = vadd.f32 %v454_v61, %v333_v54  ;;  %v729_v33 = vadd.f32 %v6425_v17, %v6439_v45  ;;  %v3209_v26 = vsel %vm209_vm6, %v3208_v19, %v3207_v9  ;;  %v457_v46 = vmax.f32 %v451_v41, 0.0 }
 0x133   :  { %v334_v39 = vmax.f32 %v322_v35, 0.0  ;;  %v850_v50 = vadd.f32 %v6552_v48, %v6439_v45  ;;  %v3210_v56 = vsel %vm212_vm7, %v3033_v24, %v3209_v26  ;;  %v455_v10 = vmax.f32 %v443_v30, 0.0 }
 0x134   :  { %v737_v44 = vmax.f32 %v729_v33, 0.0  ;;  %v721_v49 = vadd.f32 %v6439_v45, %v6453_v37  ;;  %v3212_v55 = vpack.c.b16 %v3210_v56, %v3196_v32  ;;  %v461_v27 = vadd.f32 %v457_v46, %v336_v0 }
 0x135   :  { %v858_v47 = vmax.f32 %v850_v50, 0.0  ;;  %v842_v17 = vadd.f32 %v6439_v45, %v6560_v36  ;;  %v459_v52 = vadd.f32 %v455_v10, %v334_v39  ;;  %v732_v48 = vadd.f32 %v6554_v40, %v6439_v45 }
 0x136   :  { %v741_v57 = vadd.f32 %v737_v44, %v460_v23  ;;  %v735_v58 = vmax.f32 %v721_v49, 0.0  ;;  %3933 = vmatmul.mubr.msk.bf16.vlgmr.msra.gmra.mrb[28].mxu1 %vm273_vm8, %v3212_v55  ;;  %v853_v24 = vadd.f32 %v6572_v13, %v6439_v45  ;;  %v724_v37 = vadd.f32 %v6439_v45, %v6562_v53 }
 0x137   :  { %v856_v51 = vmax.f32 %v842_v17, 0.0  ;;  %v845_v4 = vadd.f32 %v6439_v45, %v6577_v43  ;;  %v738_v20 = vmax.f32 %v732_v48, 0.0  ;;  %vm3288_vm9 = vcmask 64512  }
 0x138   :  { %v862_v12 = vadd.f32 %v858_v47, %v741_v57  ;;  %v739_v36 = vadd.f32 %v735_v58, %v458_v59  ;;  %v859_v5 = vmax.f32 %v853_v24, 0.0  ;;  %v736_v1 = vmax.f32 %v724_v37, 0.0 }
 0x139   :  { %v742_v42 = vadd.f32 %v738_v20, %v461_v27  ;;  %v857_v38 = vmax.f32 %v845_v4, 0.0 }
 0x13a   :  { %v860_v62 = vadd.f32 %v856_v51, %v739_v36  ;;  %v740_v40 = vadd.f32 %v736_v1, %v459_v52 }
 0x13b   :  { %v863_v11 = vadd.f32 %v859_v5, %v742_v42 }
 0x13c   :  { %v861_v63 = vadd.f32 %v857_v38, %v740_v40 }
 0x148   :  { %v3824_v8 = vpop.f32.mrb[8].mxu0 }
 0x149   :  { %v1131_v13 = vadd.f32 %v3824_v8, %v6439_v45  ;;  %v1122_v6 = vpop.f32.mrb[9].mxu0 }
 0x14a   :  { %v1123_v53 = vadd.f32 %v6439_v45, %v1122_v6  ;;  %v3825_v31 = vpop.f32.mrb[10].mxu0 }
 0x14b   :  { %v1139_v3 = vmax.f32 %v1131_v13, 0.0  ;;  %v1134_v43 = vadd.f32 %v3825_v31, %v6439_v45  ;;  %v1125_v2 = vpop.f32.mrb[11].mxu0 }
 0x14c   :  { %v1137_v29 = vmax.f32 %v1123_v53, 0.0  ;;  %v1126_v22 = vadd.f32 %v6439_v45, %v1125_v2 }
 0x14d   :  { %v1143_v34 = vadd.f32 %v1139_v3, %v862_v12  ;;  %v1140_v18 = vmax.f32 %v1134_v43, 0.0 }
 0x14e   :  { %v1141_v60 = vadd.f32 %v1137_v29, %v860_v62  ;;  %v1138_v15 = vmax.f32 %v1126_v22, 0.0 }
 0x14f   :  { %v1144_v7 = vadd.f32 %v1140_v18, %v863_v11  ;;  %v3834_v19 = vpop.f32.mrb[8].mxu1 }
 0x150   :  { %v1142_v32 = vadd.f32 %v1138_v15, %v861_v63  ;;  %v1252_v25 = vadd.f32 %v3834_v19, %v6439_v45  ;;  %v1243_v16 = vpop.f32.mrb[9].mxu1  ;;  %v3280_v19 = vld [vmem:[%s6724_s3] sm:$0xff] }
 0x151   :  { %v1244_v14 = vadd.f32 %v6439_v45, %v1243_v16  ;;  %v3835_v28 = vpop.f32.mrb[10].mxu1  ;;  %3936 = vmatprep.subr.mxu0 %v3280_v19  ;;  %3944 = vmatprep.subr.mxu1 %v3280_v19 }
 0x152   :  { %v1260_v54 = vmax.f32 %v1252_v25, 0.0  ;;  %v1255_v61 = vadd.f32 %v3835_v28, %v6439_v45  ;;  %v1246_v0 = vpop.f32.mrb[11].mxu1  ;;  %3937 = vmatpush3.msra.mxu0 %v3280_v19  ;;  %3945 = vmatpush3.msra.mxu1 %v3280_v19 }
 0x153   :  { %v1258_v21 = vmax.f32 %v1244_v14, 0.0  ;;  %v1247_v23 = vadd.f32 %v6439_v45, %v1246_v0 }
 0x154   :  { %v1264_v41 = vadd.f32 %v1260_v54, %v1143_v34  ;;  %v1261_v35 = vmax.f32 %v1255_v61, 0.0 }
 0x155   :  { %v1262_v9 = vadd.f32 %v1258_v21, %v1141_v60  ;;  %v1259_v59 = vmax.f32 %v1247_v23, 0.0 }
 0x156   :  { %v1265_v30 = vadd.f32 %v1261_v35, %v1144_v7 }
 0x157   :  { %v1263_v33 = vadd.f32 %v1259_v59, %v1142_v32 }
 0x16d   :  { %v3844_v26 = vpop.f32.mrb[12].mxu0 }
 0x16e   :  { %v1533_v46 = vadd.f32 %v3844_v26, %v6439_v45  ;;  %v1524_v39 = vpop.f32.mrb[13].mxu0 }
 0x16f   :  { %v1525_v50 = vadd.f32 %v6439_v45, %v1524_v39  ;;  %v3845_v56 = vpop.f32.mrb[14].mxu0 }
 0x170   :  { %v1541_v10 = vmax.f32 %v1533_v46, 0.0  ;;  %v1536_v44 = vadd.f32 %v3845_v56, %v6439_v45  ;;  %v1527_v49 = vpop.f32.mrb[15].mxu0 }
 0x171   :  { %v1539_v55 = vmax.f32 %v1525_v50, 0.0  ;;  %v1528_v27 = vadd.f32 %v6439_v45, %v1527_v49 }
 0x172   :  { %v1545_v47 = vadd.f32 %v1541_v10, %v1264_v41  ;;  %v1542_v17 = vmax.f32 %v1536_v44, 0.0 }
 0x173   :  { %v1543_v52 = vadd.f32 %v1539_v55, %v1262_v9  ;;  %v1540_v57 = vmax.f32 %v1528_v27, 0.0 }
 0x174   :  { %v1546_v58 = vadd.f32 %v1542_v17, %v1265_v30  ;;  %v3854_v48 = vpop.f32.mrb[12].mxu1 }
 0x175   :  { %v1544_v51 = vadd.f32 %v1540_v57, %v1263_v33  ;;  %v1654_v24 = vadd.f32 %v3854_v48, %v6439_v45  ;;  %v1645_v37 = vpop.f32.mrb[13].mxu1 }
 0x176   :  { %v1646_v4 = vadd.f32 %v6439_v45, %v1645_v37  ;;  %v3855_v12 = vpop.f32.mrb[14].mxu1 }
 0x177   :  { %v1662_v36 = vmax.f32 %v1654_v24, 0.0  ;;  %v1657_v20 = vadd.f32 %v3855_v12, %v6439_v45  ;;  %v1648_v5 = vpop.f32.mrb[15].mxu1 }
 0x178   :  { %v1660_v1 = vmax.f32 %v1646_v4, 0.0  ;;  %v1649_v62 = vadd.f32 %v6439_v45, %v1648_v5 }
 0x179   :  { %v1666_v42 = vadd.f32 %v1662_v36, %v1545_v47  ;;  %v1663_v40 = vmax.f32 %v1657_v20, 0.0 }
 0x17a   :  { %v1664_v38 = vadd.f32 %v1660_v1, %v1543_v52  ;;  %v1661_v11 = vmax.f32 %v1649_v62, 0.0 }
 0x17b   :  { %v1667_v63 = vadd.f32 %v1663_v40, %v1546_v58 }
 0x17c   :  { %v1665_v8 = vadd.f32 %v1661_v11, %v1544_v51 }
 0x192   :  { %v3864_v13 = vpop.f32.mrb[16].mxu0 }
 0x193   :  { %v1935_v6 = vadd.f32 %v3864_v13, %v6439_v45  ;;  %v1926_v53 = vpop.f32.mrb[17].mxu0 }
 0x194   :  { %v1927_v31 = vadd.f32 %v6439_v45, %v1926_v53  ;;  %v3865_v3 = vpop.f32.mrb[18].mxu0 }
 0x195   :  { %v1943_v43 = vmax.f32 %v1935_v6, 0.0  ;;  %v1938_v2 = vadd.f32 %v3865_v3, %v6439_v45  ;;  %v1929_v29 = vpop.f32.mrb[19].mxu0 }
 0x196   :  { %v1941_v22 = vmax.f32 %v1927_v31, 0.0  ;;  %v1930_v34 = vadd.f32 %v6439_v45, %v1929_v29 }
 0x197   :  { %v1947_v18 = vadd.f32 %v1943_v43, %v1666_v42  ;;  %v1944_v60 = vmax.f32 %v1938_v2, 0.0 }
 0x198   :  { %v1945_v15 = vadd.f32 %v1941_v22, %v1664_v38  ;;  %v1942_v7 = vmax.f32 %v1930_v34, 0.0  ;;  %v3874_v32 = vpop.f32.mrb[16].mxu1 }
 0x199   :  { %v1948_v25 = vadd.f32 %v1944_v60, %v1667_v63  ;;  %v2056_v16 = vadd.f32 %v3874_v32, %v6439_v45  ;;  %v2047_v14 = vpop.f32.mrb[17].mxu1 }
 0x19a   :  { %v1946_v28 = vadd.f32 %v1942_v7, %v1665_v8  ;;  %v2048_v54 = vadd.f32 %v6439_v45, %v2047_v14  ;;  %v3875_v61 = vpop.f32.mrb[18].mxu1 }
 0x19b   :  { %v2064_v0 = vmax.f32 %v2056_v16, 0.0  ;;  %v2059_v21 = vadd.f32 %v3875_v61, %v6439_v45  ;;  %v2050_v23 = vpop.f32.mrb[19].mxu1 }
 0x19c   :  { %v2062_v41 = vmax.f32 %v2048_v54, 0.0  ;;  %v2051_v35 = vadd.f32 %v6439_v45, %v2050_v23 }
 0x19d   :  { %v2068_v9 = vadd.f32 %v2064_v0, %v1947_v18  ;;  %v2065_v59 = vmax.f32 %v2059_v21, 0.0 }
 0x19e   :  { %v2066_v30 = vadd.f32 %v2062_v41, %v1945_v15  ;;  %v2063_v33 = vmax.f32 %v2051_v35, 0.0 }
 0x19f   :  { %v2069_v26 = vadd.f32 %v2065_v59, %v1948_v25 }
 0x1a0   :  { %v2067_v46 = vadd.f32 %v2063_v33, %v1946_v28 }
 0x1b7   :  { %v3884_v39 = vpop.f32.mrb[20].mxu0 }
 0x1b8   :  { %v2337_v50 = vadd.f32 %v3884_v39, %v6439_v45  ;;  %v2328_v56 = vpop.f32.mrb[21].mxu0 }
 0x1b9   :  { %v2329_v10 = vadd.f32 %v6439_v45, %v2328_v56  ;;  %v3885_v44 = vpop.f32.mrb[22].mxu0 }
 0x1ba   :  { %v2345_v49 = vmax.f32 %v2337_v50, 0.0  ;;  %v2340_v55 = vadd.f32 %v3885_v44, %v6439_v45  ;;  %v2331_v27 = vpop.f32.mrb[23].mxu0 }
 0x1bb   :  { %v2343_v47 = vmax.f32 %v2329_v10, 0.0  ;;  %v2332_v17 = vadd.f32 %v6439_v45, %v2331_v27 }
 0x1bc   :  { %v2349_v52 = vadd.f32 %v2345_v49, %v2068_v9  ;;  %v2346_v57 = vmax.f32 %v2340_v55, 0.0 }
 0x1bd   :  { %v2347_v58 = vadd.f32 %v2343_v47, %v2066_v30  ;;  %v2344_v48 = vmax.f32 %v2332_v17, 0.0 }
 0x1be   :  { %v2350_v51 = vadd.f32 %v2346_v57, %v2069_v26  ;;  %v3894_v24 = vpop.f32.mrb[20].mxu1 }
 0x1bf   :  { %v2348_v37 = vadd.f32 %v2344_v48, %v2067_v46  ;;  %v2458_v4 = vadd.f32 %v3894_v24, %v6439_v45  ;;  %v2449_v12 = vpop.f32.mrb[21].mxu1 }
 0x1c0   :  { %v2450_v36 = vadd.f32 %v6439_v45, %v2449_v12  ;;  %v3895_v20 = vpop.f32.mrb[22].mxu1 }
 0x1c1   :  { %v2466_v5 = vmax.f32 %v2458_v4, 0.0  ;;  %v2461_v1 = vadd.f32 %v3895_v20, %v6439_v45  ;;  %v2452_v62 = vpop.f32.mrb[23].mxu1 }
 0x1c2   :  { %v2464_v42 = vmax.f32 %v2450_v36, 0.0  ;;  %v2453_v40 = vadd.f32 %v6439_v45, %v2452_v62 }
 0x1c3   :  { %v2470_v38 = vadd.f32 %v2466_v5, %v2349_v52  ;;  %v2467_v11 = vmax.f32 %v2461_v1, 0.0 }
 0x1c4   :  { %v2468_v63 = vadd.f32 %v2464_v42, %v2347_v58  ;;  %v2465_v8 = vmax.f32 %v2453_v40, 0.0 }
 0x1c5   :  { %v2471_v13 = vadd.f32 %v2467_v11, %v2350_v51 }
 0x1c6   :  { %v2469_v6 = vadd.f32 %v2465_v8, %v2348_v37 }
 0x1dc   :  { %v3904_v53 = vpop.f32.mrb[24].mxu0 }
 0x1dd   :  { %v2739_v31 = vadd.f32 %v3904_v53, %v6439_v45  ;;  %v2730_v3 = vpop.f32.mrb[25].mxu0 }
 0x1de   :  { %v2731_v43 = vadd.f32 %v6439_v45, %v2730_v3  ;;  %v3905_v2 = vpop.f32.mrb[26].mxu0 }
 0x1df   :  { %v2747_v29 = vmax.f32 %v2739_v31, 0.0  ;;  %v2742_v22 = vadd.f32 %v3905_v2, %v6439_v45  ;;  %v2733_v34 = vpop.f32.mrb[27].mxu0 }
 0x1e0   :  { %v2745_v18 = vmax.f32 %v2731_v43, 0.0  ;;  %v2734_v60 = vadd.f32 %v6439_v45, %v2733_v34 }
 0x1e1   :  { %v2751_v15 = vadd.f32 %v2747_v29, %v2470_v38  ;;  %v2748_v7 = vmax.f32 %v2742_v22, 0.0  ;;  %v3686_v29 = vld [vmem:[%s6725_s4] ss:$0 sm:$0xff] }
 0x1e2   :  { %v2749_v19 = vadd.f32 %v2745_v18, %v2468_v63  ;;  %v2746_v32 = vmax.f32 %v2734_v60, 0.0 }
 0x1e3   :  { %v2752_v25 = vadd.f32 %v2748_v7, %v2471_v13  ;;  %v3914_v16 = vpop.f32.mrb[24].mxu1 }
 0x1e4   :  { %v2750_v14 = vadd.f32 %v2746_v32, %v2469_v6  ;;  %v2860_v28 = vadd.f32 %v3914_v16, %v6439_v45  ;;  %v2851_v54 = vpop.f32.mrb[25].mxu1 }
 0x1e5   :  { %v2852_v61 = vadd.f32 %v6439_v45, %v2851_v54  ;;  %v3915_v0 = vpop.f32.mrb[26].mxu1 }
 0x1e6   :  { %v2868_v21 = vmax.f32 %v2860_v28, 0.0  ;;  %v2863_v23 = vadd.f32 %v3915_v0, %v6439_v45  ;;  %v2854_v41 = vpop.f32.mrb[27].mxu1 }
 0x1e7   :  { %v2866_v35 = vmax.f32 %v2852_v61, 0.0  ;;  %v2855_v9 = vadd.f32 %v6439_v45, %v2854_v41 }
 0x1e8   :  { %v2872_v59 = vadd.f32 %v2868_v21, %v2751_v15  ;;  %v2869_v30 = vmax.f32 %v2863_v23, 0.0 }
 0x1e9   :  { %v2870_v33 = vadd.f32 %v2866_v35, %v2749_v19  ;;  %v2867_v26 = vmax.f32 %v2855_v9, 0.0 }
 0x1ea   :  { %v2873_v46 = vadd.f32 %v2869_v30, %v2752_v25 }
 0x1eb   :  { %v2871_v39 = vadd.f32 %v2867_v26, %v2750_v14 }
 0x202   :  { %v3924_v50 = vpop.f32.mrb[28].mxu0 }
 0x203   :  { %v3141_v56 = vadd.f32 %v3924_v50, %v6439_v45  ;;  %v3132_v10 = vpop.f32.mrb[29].mxu0 }
 0x204   :  { %v3133_v44 = vadd.f32 %v6439_v45, %v3132_v10  ;;  %v3925_v49 = vpop.f32.mrb[30].mxu0 }
 0x205   :  { %v3149_v55 = vmax.f32 %v3141_v56, 0.0  ;;  %v3144_v27 = vadd.f32 %v3925_v49, %v6439_v45  ;;  %v3135_v47 = vpop.f32.mrb[31].mxu0 }
 0x206   :  { %v3147_v17 = vmax.f32 %v3133_v44, 0.0  ;;  %v3136_v52 = vadd.f32 %v6439_v45, %v3135_v47 }
 0x207   :  { %v3153_v57 = vadd.f32 %v3149_v55, %v2872_v59  ;;  %v3150_v58 = vmax.f32 %v3144_v27, 0.0 }
 0x208   :  { %v3151_v48 = vadd.f32 %v3147_v17, %v2870_v33  ;;  %v3148_v51 = vmax.f32 %v3136_v52, 0.0 }
 0x209   :  { %v3154_v24 = vadd.f32 %v3150_v58, %v2873_v46  ;;  %v3934_v37 = vpop.f32.mrb[28].mxu1 }
 0x20a   :  { %v3152_v4 = vadd.f32 %v3148_v51, %v2871_v39  ;;  %v3262_v12 = vadd.f32 %v3934_v37, %v6439_v45  ;;  %v3253_v36 = vpop.f32.mrb[29].mxu1 }
 0x20b   :  { %v3254_v20 = vadd.f32 %v6439_v45, %v3253_v36  ;;  %v3935_v5 = vpop.f32.mrb[30].mxu1 }
 0x20c   :  { %v3270_v1 = vmax.f32 %v3262_v12, 0.0  ;;  %v3265_v62 = vadd.f32 %v3935_v5, %v6439_v45  ;;  %v3256_v42 = vpop.f32.mrb[31].mxu1 }
 0x20d   :  { %v3268_v40 = vmax.f32 %v3254_v20, 0.0  ;;  %v3257_v38 = vadd.f32 %v6439_v45, %v3256_v42 }
 0x20e   :  { %v3274_v11 = vadd.f32 %v3270_v1, %v3153_v57  ;;  %v3271_v63 = vmax.f32 %v3265_v62, 0.0 }
 0x20f   :  { %v3272_v8 = vadd.f32 %v3268_v40, %v3151_v48  ;;  %v3269_v13 = vmax.f32 %v3257_v38, 0.0 }
 0x210   :  { %v3278_v6 = vmul.f32 0.0625, %v3274_v11  ;;  %v3275_v53 = vadd.f32 %v3271_v63, %v3154_v24 }
 0x211   :  { %v3276_v31 = vmul.f32 0.0625, %v3272_v8  ;;  %v3273_v3 = vadd.f32 %v3269_v13, %v3152_v4 }
 0x212   :  { %v3279_v43 = vmul.f32 0.0625, %v3275_v53  ;;  %3941 = vmatprep.mubr.msk.f32.mxu1 %vm3288_vm9, %v3278_v6 }
 0x213   :  { %v3277_v2 = vmul.f32 0.0625, %v3273_v3  ;;  %3938 = vmatprep.mubr.msk.f32.mxu0 %vm3288_vm9, %v3276_v31 }
 0x214   :  { %3942 = vmatmul.mubr.msk.f32.vlgmr.msra.gmra.mrb[32].mxu1 %vm3288_vm9, %v3279_v43 }
 0x215   :  { %3939 = vmatmul.mubr.msk.f32.vlgmr.msra.gmra.mrb[32].mxu0 %vm3288_vm9, %v3277_v2 }
 0x2e7   :  { %v3943_v45 = vpop.f32.mrb[32].mxu1 }
 0x2e8   :  { %v3383_v22 = vadd.f32 %v3943_v45, %v3686_v29  ;;  %v3940_v34 = vpop.f32.mrb[32].mxu0  ;;  %v3377_v18 = vpop.f32.mrb[33].mxu1 }
 0x2e9   :  { %v3373_v60 = vadd.f32 %v3940_v34, %v3686_v29  ;;  %v3378_v15 = vadd.f32 %v3686_v29, %v3377_v18  ;;  %v3367_v7 = vpop.f32.mrb[33].mxu0 }
 0x2ea   :  { %3389 = vst [vmem:[%s6726_s5 + $0x18] sm:$0xff] %v3383_v22  ;;  %v3368_v19 = vadd.f32 %v3686_v29, %v3367_v7 }
 0x2eb   :  { %3387 = vst [vmem:[%s6726_s5 + $0x8] sm:$0xff] %v3373_v60  ;;  %3388 = vst [vmem:[%s6726_s5 + $0x10] sm:$0xff] %v3378_v15 }
 0x2ec   :  { %3386 = vst [vmem:[%s6726_s5] sm:$0xff] %v3368_v19 }

</bundles_post_ra>
